<compile_context>
chip_gen: v7x
topology: tpu7x:2x2x1
jax: 0.10.0
libtpu: 0.0.40
codegen_flags: <defaults>
</compile_context>

<pallas_src>
import jax
import jax.numpy as jnp
from jax.experimental import pallas as pl
from jax.experimental.pallas import tpu as pltpu


# --------------------------------------------------------------------------
# Generation-aware VMEM budget and tiling helpers.
# --------------------------------------------------------------------------
def _vmem_limit_bytes():
    cap = 64 * 1024 * 1024  # conservative fallback (v7x physical)
    try:
        info_fn = getattr(pltpu, "get_tpu_info", None)
        if info_fn is not None:
            cap = int(getattr(info_fn(), "vmem_capacity_bytes", cap) or cap)
    except Exception:
        pass
    # ~48 MiB on v7x (64 MiB physical), ~96-100 MiB on v5e/v6e (128 MiB physical)
    return max(32 * 1024 * 1024, min(cap - 16 * 1024 * 1024, 100 * 1024 * 1024))


_VMEM_LIMIT = _vmem_limit_bytes()
_BIG_VMEM = _VMEM_LIMIT >= 80 * 1024 * 1024


def _cparams(sem):
    return pltpu.CompilerParams(dimension_semantics=sem,
                                vmem_limit_bytes=_VMEM_LIMIT)


def _batch_tile(b):
    # 8 rows per tile keeps (TB, C) blocks sublane-aligned and maximizes the
    # number of batch grid steps (megacore sharding on v7x); fall back to the
    # full batch when it is not a multiple of 8 (full-dim blocks are legal).
    return 8 if b % 8 == 0 else b


def _div_tile(n, target):
    # largest multiple of 128 that divides n and is <= target; else the full axis
    if n % 128 != 0:
        return n
    t = 128
    while t * 2 <= target and n % (t * 2) == 0:
        t *= 2
    return t


def _point_chunk(n, target):
    # point-axis chunk: multiple of 8 dividing n (keeps blocks aligned), <= target
    if n <= target:
        return n
    c = (target // 8) * 8
    while c >= 8:
        if n % c == 0:
            return c
        c -= 8
    return n


# --------------------------------------------------------------------------
# Kernel 1: PointNetfeat — per-point MLP (3->64->128->1024) + global max pool.
# Grid: (batch tiles [parallel], point chunks [arbitrary, running max]).
# --------------------------------------------------------------------------
def pointnet_feat_kernel(x_ref, w1_ref, b1_ref, w2_ref, b2_ref, w3_ref, b3_ref,
                         feat_ref):
    @pl.when(pl.program_id(1) == 0)
    def _():
        feat_ref[...] = jnp.full_like(feat_ref, -jnp.inf)

    tb, npts, _ = x_ref.shape
    x = x_ref[...]                                                     # (TB, NC, 3) f32
    w1 = w1_ref[...]                                                   # (3, 64) f32
    # K=3 first layer on the VPU: three broadcast multiply-adds (an MXU pass
    # would use 3/256 of the contraction depth).
    h1 = (x[:, :, 0:1] * w1[0:1, :]
          + x[:, :, 1:2] * w1[1:2, :]
          + x[:, :, 2:3] * w1[2:3, :]) + b1_ref[...]                   # (TB, NC, 64)
    h1 = jnp.maximum(h1, 0.0).reshape(tb * npts, 64)
    h2 = jnp.dot(h1.astype(jnp.bfloat16), w2_ref[...],
                 preferred_element_type=jnp.float32) + b2_ref[...]
    h2 = jnp.maximum(h2, 0.0)                                          # (rows, 128)
    h3 = jnp.dot(h2.astype(jnp.bfloat16), w3_ref[...],
                 preferred_element_type=jnp.float32) + b3_ref[...]     # (rows, 1024), no ReLU
    # torch.max(x, 2): running global max over points, accumulated in the
    # resident output block (same block index across all point chunks).
    feat_ref[...] = jnp.maximum(feat_ref[...],
                                jnp.max(h3.reshape(tb, npts, -1), axis=1))


def pointnet_feat(x, w1, b1, w2, b2, w3, b3):
    B, N, _ = x.shape
    C3 = w3.shape[1]
    TB = _batch_tile(B)
    NC = _point_chunk(N, 512 if _BIG_VMEM else 256)
    return pl.pallas_call(
        pointnet_feat_kernel,
        out_shape=jax.ShapeDtypeStruct((B, C3), jnp.float32),
        grid_spec=pltpu.PrefetchScalarGridSpec(
            num_scalar_prefetch=0,
            grid=(B // TB, N // NC),
            in_specs=[
                pl.BlockSpec((TB, NC, 3), lambda b, n: (b, n, 0)),
                pl.BlockSpec(w1.shape, lambda b, n: (0, 0)),
                pl.BlockSpec(b1.shape, lambda b, n: (0, 0)),
                pl.BlockSpec(w2.shape, lambda b, n: (0, 0)),
                pl.BlockSpec(b2.shape, lambda b, n: (0, 0)),
                pl.BlockSpec(w3.shape, lambda b, n: (0, 0)),
                pl.BlockSpec(b3.shape, lambda b, n: (0, 0)),
            ],
            out_specs=pl.BlockSpec((TB, C3), lambda b, n: (b, 0)),
        ),
        compiler_params=_cparams(("parallel", "arbitrary")),
    )(x, w1, b1, w2, b2, w3, b3)


# --------------------------------------------------------------------------
# Kernel 2: fused encoder bottleneck + decoder.
#   1024 -> bottleneck (Linear+BN+ReLU) -> 1024 -> 1024 -> npoints_out*3
# The hidden stack is computed once (step 0) into a VMEM scratch; the large
# final weight wd3 streams in lane-dense column tiles across the grid.
# --------------------------------------------------------------------------
def decoder_kernel(f_ref, we_ref, be_ref, w1_ref, b1_ref, w2_ref, b2_ref,
                   w3_ref, b3_ref, out_ref, h_scr):
    @pl.when(pl.program_id(0) == 0)
    def _():
        z = jnp.dot(f_ref[...].astype(jnp.bfloat16), we_ref[...],
                    preferred_element_type=jnp.float32) + be_ref[...]
        z = jnp.maximum(z, 0.0)                                        # bottleneck (BN folded)
        h = jnp.dot(z.astype(jnp.bfloat16), w1_ref[...],
                    preferred_element_type=jnp.float32) + b1_ref[...]
        h = jnp.maximum(h, 0.0)
        h = jnp.dot(h.astype(jnp.bfloat16), w2_ref[...],
                    preferred_element_type=jnp.float32) + b2_ref[...]
        h = jnp.maximum(h, 0.0)
        h_scr[...] = h.astype(h_scr.dtype)                             # (B, 1024) bf16

    out_ref[...] = (jnp.dot(h_scr[...], w3_ref[...],
                            preferred_element_type=jnp.float32)
                    + b3_ref[...])


def decoder(feat, we, be, wd1, bd1, wd2, bd2, wd3, bd3, npoints_out):
    B, C = feat.shape
    H = wd2.shape[1]
    out_dim = wd3.shape[1]
    # pad the output columns to a multiple of 128: lane-dense stores + column
    # pipelining even when 3*npoints_out is not 128-aligned (padded cols are 0).
    out_pad = ((out_dim + 127) // 128) * 128
    if out_pad != out_dim:
        wd3 = jnp.pad(wd3, ((0, 0), (0, out_pad - out_dim)))
        bd3 = jnp.pad(bd3, ((0, 0), (0, out_pad - out_dim)))
    TN = _div_tile(out_pad, 2048 if _BIG_VMEM else 1024)

    out_flat = pl.pallas_call(
        decoder_kernel,
        out_shape=jax.ShapeDtypeStruct((B, out_pad), jnp.float32),
        grid_spec=pltpu.PrefetchScalarGridSpec(
            num_scalar_prefetch=0,
            grid=(out_pad // TN,),
            in_specs=[
                pl.BlockSpec((B, C), lambda j: (0, 0)),
                pl.BlockSpec(we.shape, lambda j: (0, 0)),
                pl.BlockSpec(be.shape, lambda j: (0, 0)),
                pl.BlockSpec(wd1.shape, lambda j: (0, 0)),
                pl.BlockSpec(bd1.shape, lambda j: (0, 0)),
                pl.BlockSpec(wd2.shape, lambda j: (0, 0)),
                pl.BlockSpec(bd2.shape, lambda j: (0, 0)),
                pl.BlockSpec((wd3.shape[0], TN), lambda j: (0, j)),
                pl.BlockSpec((1, TN), lambda j: (0, j)),
            ],
            out_specs=pl.BlockSpec((B, TN), lambda j: (0, j)),
            scratch_shapes=[pltpu.VMEM((B, H), jnp.bfloat16)],
        ),
        # step-0 hidden scratch is reused by later steps -> sequential axis
        compiler_params=_cparams(("arbitrary",)),
    )(feat, we, be, wd1, bd1, wd2, bd2, wd3, bd3)
    return out_flat[:, :out_dim].reshape(B, npoints_out, 3)


# --------------------------------------------------------------------------
# Kernel 3: per-point matching distance between prediction and target.
# TODO(synk): exact emd.emdModule (auction-algorithm EMD, external CUDA ext,
#   uses eps/iters) has no clean Pallas equivalent; a one-sided nearest-
#   neighbor match is used as the per-point squared distance here.
# d = ||p||^2 + ||q||^2 - 2 p.q : the cross term is three VPU broadcast MACs
# (with -2 folded into the small pred tile), ||p||^2 + sqrt are hoisted into
# the last-step epilogue, and the running min over gt tiles lives in the
# resident (TB, TM) output block.  gt is fed as (B, 3, G) so tiles are
# lane-dense along G.
# --------------------------------------------------------------------------
def nn_emd_kernel(pred_ref, gtt_ref, dist_ref):
    gi = pl.program_id(2)

    @pl.when(gi == 0)
    def _():
        dist_ref[...] = jnp.full_like(dist_ref, jnp.inf)

    p2 = -2.0 * pred_ref[...]                                          # (TB, TM, 3)
    q = gtt_ref[...]                                                   # (TB, 3, TG)
    qn = jnp.sum(q * q, axis=1, keepdims=True)                         # (TB, 1, TG)
    d = (qn
         + p2[:, :, 0:1] * q[:, 0:1, :]
         + p2[:, :, 1:2] * q[:, 1:2, :]
         + p2[:, :, 2:3] * q[:, 2:3, :])                               # (TB, TM, TG)
    dist_ref[...] = jnp.minimum(dist_ref[...], jnp.min(d, axis=-1))    # (TB, TM)

    @pl.when(gi == pl.num_programs(2) - 1)
    def _():
        p = pred_ref[...]
        pn = jnp.sum(p * p, axis=-1)                                   # (TB, TM)
        dist_ref[...] = jnp.sqrt(jnp.maximum(dist_ref[...] + pn, 0.0))


def nn_emd(pred, gt):
    """Returns per-point sqrt nearest-neighbor distances, shape (B, M)."""
    B, M, _ = pred.shape
    _, G, _ = gt.shape
    gt_t = jnp.transpose(gt, (0, 2, 1))                                # (B, 3, G)
    TB = _batch_tile(B)
    TM = _div_tile(M, 256)
    TG = _div_tile(G, 1024 if _BIG_VMEM else 512)
    return pl.pallas_call(
        nn_emd_kernel,
        out_shape=jax.ShapeDtypeStruct((B, M), jnp.float32),
        grid_spec=pltpu.PrefetchScalarGridSpec(
            num_scalar_prefetch=0,
            grid=(B // TB, M // TM, G // TG),
            in_specs=[
                pl.BlockSpec((TB, TM, 3), lambda b, m, g: (b, m, 0)),
                pl.BlockSpec((TB, 3, TG), lambda b, m, g: (b, 0, g)),
            ],
            out_specs=pl.BlockSpec((TB, TM), lambda b, m, g: (b, m)),
        ),
        compiler_params=_cparams(("parallel", "parallel", "arbitrary")),
    )(pred, gt_t)


# --------------------------------------------------------------------------
# Parameter setup (deterministic, PyTorch-default-style uniform init) + BN fold.
# Weights feeding MXU matmuls are stored bf16; the K=3 VPU layer and biases f32.
# --------------------------------------------------------------------------
def _linear_init(key, fan_in, fan_out):
    bound = 1.0 / jnp.sqrt(jnp.float32(fan_in))
    kw, kb = jax.random.split(key)
    w = jax.random.uniform(kw, (fan_in, fan_out), jnp.float32, -bound, bound)
    b = jax.random.uniform(kb, (1, fan_out), jnp.float32, -bound, bound)
    return w, b


def _fold_bn(w, b, c, eps=1e-5):
    # inference-mode BN with default params: gamma=1, beta=0, mean=0, var=1
    gamma = jnp.ones((c,), jnp.float32)
    beta = jnp.zeros((c,), jnp.float32)
    mean = jnp.zeros((c,), jnp.float32)
    var = jnp.ones((c,), jnp.float32)
    s = gamma / jnp.sqrt(var + eps)
    return w * s[None, :], (b - mean[None, :]) * s[None, :] + beta[None, :]


def init_params(key, bottleneck_size, npoints_out):
    ks = jax.random.split(key, 7)
    # PointNetfeat conv1d(kernel=1) weights stored as (in, out)
    w1, b1 = _linear_init(ks[0], 3, 64)
    w2, b2 = _linear_init(ks[1], 64, 128)
    w3, b3 = _linear_init(ks[2], 128, 1024)
    w1, b1 = _fold_bn(w1, b1, 64)
    w2, b2 = _fold_bn(w2, b2, 128)
    w3, b3 = _fold_bn(w3, b3, 1024)
    # encoder bottleneck Linear(1024, bs) + BN(bs)
    we, be = _linear_init(ks[3], 1024, bottleneck_size)
    we, be = _fold_bn(we, be, bottleneck_size)
    # NormalDecoder
    wd1, bd1 = _linear_init(ks[4], bottleneck_size, 1024)
    wd2, bd2 = _linear_init(ks[5], 1024, 1024)
    wd3, bd3 = _linear_init(ks[6], 1024, npoints_out * 3)
    bf16 = jnp.bfloat16
    return dict(
        w1=w1, b1=b1,                               # VPU layer stays f32
        w2=w2.astype(bf16), b2=b2,
        w3=w3.astype(bf16), b3=b3,
        we=we.astype(bf16), be=be,
        wd1=wd1.astype(bf16), bd1=bd1,
        wd2=wd2.astype(bf16), bd2=bd2,
        wd3=wd3.astype(bf16), bd3=bd3,
    )


# --------------------------------------------------------------------------
# FCAEmodel.forward(in_partial, in_complete, eps, iters)
# --------------------------------------------------------------------------
def fcae_forward(params, in_partial, in_complete, eps, iters, npoints_out):
    # Encoder: PointNetfeat (per-point MLP + max pool)
    feat = pointnet_feat(in_partial,
                         params["w1"], params["b1"],
                         params["w2"], params["b2"],
                         params["w3"], params["b3"])                   # (B, 1024) f32
    # Bottleneck (Linear/BN/ReLU) + NormalDecoder, fused in one call
    out_complete = decoder(feat,
                           params["we"], params["be"],
                           params["wd1"], params["bd1"],
                           params["wd2"], params["bd2"],
                           params["wd3"], params["bd3"],
                           npoints_out)                                # (B, P, 3)
    # dist, _ = emd(out_complete, in_complete, eps, iters); sqrt(dist).mean(1).mean()
    del eps, iters  # surrogate matching does not use the auction parameters
    per_point = nn_emd(out_complete, in_complete)                      # (B, M)
    loss = jnp.mean(jnp.mean(per_point, axis=1))
    return out_complete, loss


if __name__ == "__main__":
    bottleneck_size = 32
    npoints_in = 64
    npoints_out = 16
    B = 8

    key = jax.random.PRNGKey(0)
    kp, k_in, k_gt = jax.random.split(key, 3)
    params = init_params(kp, bottleneck_size, npoints_out)

    in_partial = jax.random.normal(k_in, (B, npoints_in, 3), jnp.float32)
    in_complete = jax.random.normal(k_gt, (B, npoints_out, 3), jnp.float32)
    eps, iters = 0.005, 50

    out_complete, loss = fcae_forward(params, in_partial, in_complete,
                                      eps, iters, npoints_out)
    jax.block_until_ready((out_complete, loss))

    assert out_complete.shape == (B, npoints_out, 3)
    assert loss.shape == ()
    assert bool(jnp.isfinite(loss))
    print("KERNEL_OK")
</pallas_src>

<mosaic_0001>
module attributes {stable_mosaic.version = 11 : i64} {
  func.func @pointnet_feat_kernel(%arg0: i32, %arg1: i32, %arg2: memref<8x64x3xf32, #tpu.memory_space<vmem>>, %arg3: memref<3x64xf32, #tpu.memory_space<vmem>>, %arg4: memref<1x64xf32, #tpu.memory_space<vmem>>, %arg5: memref<64x128xbf16, #tpu.memory_space<vmem>>, %arg6: memref<1x128xf32, #tpu.memory_space<vmem>>, %arg7: memref<128x1024xbf16, #tpu.memory_space<vmem>>, %arg8: memref<1x1024xf32, #tpu.memory_space<vmem>>, %arg9: memref<8x1024xf32, #tpu.memory_space<vmem>>) attributes {dimension_semantics = [#tpu.dimension_semantics<parallel>, #tpu.dimension_semantics<arbitrary>], iteration_bounds = array<i64: 1, 1>, scalar_prefetch = 0 : i64, scratch_operands = 0 : i64, tpu.core_type = #tpu.core_type<tc>, window_params = [{transform_indices = @transform_0, window_bounds = array<i64: 8, 64, 3>}, {pipeline_mode = #tpu.pipeline_mode<synchronous>, transform_indices = @transform_1, window_bounds = array<i64: 3, 64>}, {pipeline_mode = #tpu.pipeline_mode<synchronous>, transform_indices = @transform_2, window_bounds = array<i64: 1, 64>}, {pipeline_mode = #tpu.pipeline_mode<synchronous>, transform_indices = @transform_3, window_bounds = array<i64: 64, 128>}, {pipeline_mode = #tpu.pipeline_mode<synchronous>, transform_indices = @transform_4, window_bounds = array<i64: 1, 128>}, {pipeline_mode = #tpu.pipeline_mode<synchronous>, transform_indices = @transform_5, window_bounds = array<i64: 128, 1024>}, {pipeline_mode = #tpu.pipeline_mode<synchronous>, transform_indices = @transform_6, window_bounds = array<i64: 1, 1024>}, {transform_indices = @transform_7, window_bounds = array<i64: 8, 1024>}]} {
    %c0_i32 = arith.constant 0 : i32
    %0 = arith.cmpi eq, %arg1, %c0_i32 : i32
    %1 = arith.extui %0 : i1 to i32
    %c0_i32_0 = arith.constant 0 : i32
    %2 = arith.cmpi ne, %1, %c0_i32_0 : i32
    scf.if %2 {
      %cst_23 = arith.constant 0xFF800000 : f32
      %51 = vector.broadcast %cst_23 : f32 to vector<8x1024xf32>
      %c0_24 = arith.constant 0 : index
      %c0_25 = arith.constant 0 : index
      %52 = vector.load %arg9[%c0_24, %c0_25] : memref<8x1024xf32, #tpu.memory_space<vmem>>, vector<8x1024xf32>
      tpu.vector_store %arg9[%c0_24, %c0_25], %51 {strides = array<i32>} : memref<8x1024xf32, #tpu.memory_space<vmem>>, vector<8x1024xf32>,
    } else {
    }
    %c0 = arith.constant 0 : index
    %c0_1 = arith.constant 0 : index
    %c0_2 = arith.constant 0 : index
    %3 = vector.load %arg2[%c0, %c0_1, %c0_2] : memref<8x64x3xf32, #tpu.memory_space<vmem>>, vector<8x64x3xf32>
    %c0_3 = arith.constant 0 : index
    %c0_4 = arith.constant 0 : index
    %4 = vector.load %arg3[%c0_3, %c0_4] : memref<3x64xf32, #tpu.memory_space<vmem>>, vector<3x64xf32>
    %5 = vector.extract_strided_slice %3 {offsets = [0, 0, 0], sizes = [8, 64, 1], strides = [1, 1, 1]} : vector<8x64x3xf32> to vector<8x64x1xf32>
    %6 = vector.extract_strided_slice %4 {offsets = [0, 0], sizes = [1, 64], strides = [1, 1]} : vector<3x64xf32> to vector<1x64xf32>
    %7 = vector.shape_cast %6 : vector<1x64xf32> to vector<1x1x64xf32>
    %8 = vector.broadcast %5 : vector<8x64x1xf32> to vector<8x64x64xf32>
    %9 = vector.broadcast %7 : vector<1x1x64xf32> to vector<8x64x64xf32>
    %10 = arith.mulf %8, %9 : vector<8x64x64xf32>
    %11 = vector.extract_strided_slice %3 {offsets = [0, 0, 1], sizes = [8, 64, 1], strides = [1, 1, 1]} : vector<8x64x3xf32> to vector<8x64x1xf32>
    %12 = vector.extract_strided_slice %4 {offsets = [1, 0], sizes = [1, 64], strides = [1, 1]} : vector<3x64xf32> to vector<1x64xf32>
    %13 = vector.shape_cast %12 : vector<1x64xf32> to vector<1x1x64xf32>
    %14 = vector.broadcast %11 : vector<8x64x1xf32> to vector<8x64x64xf32>
    %15 = vector.broadcast %13 : vector<1x1x64xf32> to vector<8x64x64xf32>
    %16 = arith.mulf %14, %15 : vector<8x64x64xf32>
    %17 = arith.addf %10, %16 : vector<8x64x64xf32>
    %18 = vector.extract_strided_slice %3 {offsets = [0, 0, 2], sizes = [8, 64, 1], strides = [1, 1, 1]} : vector<8x64x3xf32> to vector<8x64x1xf32>
    %19 = vector.extract_strided_slice %4 {offsets = [2, 0], sizes = [1, 64], strides = [1, 1]} : vector<3x64xf32> to vector<1x64xf32>
    %20 = vector.shape_cast %19 : vector<1x64xf32> to vector<1x1x64xf32>
    %21 = vector.broadcast %18 : vector<8x64x1xf32> to vector<8x64x64xf32>
    %22 = vector.broadcast %20 : vector<1x1x64xf32> to vector<8x64x64xf32>
    %23 = arith.mulf %21, %22 : vector<8x64x64xf32>
    %24 = arith.addf %17, %23 : vector<8x64x64xf32>
    %c0_5 = arith.constant 0 : index
    %c0_6 = arith.constant 0 : index
    %25 = vector.load %arg4[%c0_5, %c0_6] : memref<1x64xf32, #tpu.memory_space<vmem>>, vector<1x64xf32>
    %26 = vector.shape_cast %25 : vector<1x64xf32> to vector<1x1x64xf32>
    %27 = vector.broadcast %26 : vector<1x1x64xf32> to vector<8x64x64xf32>
    %28 = arith.addf %24, %27 : vector<8x64x64xf32>
    %cst = arith.constant 0.000000e+00 : f32
    %29 = vector.broadcast %cst : f32 to vector<8x64x64xf32>
    %30 = arith.maximumf %28, %29 : vector<8x64x64xf32>
    %31 = vector.shape_cast %30 : vector<8x64x64xf32> to vector<512x64xf32>
    %32 = arith.truncf %31 : vector<512x64xf32> to vector<512x64xbf16>
    %c0_7 = arith.constant 0 : index
    %c0_8 = arith.constant 0 : index
    %33 = vector.load %arg5[%c0_7, %c0_8] : memref<64x128xbf16, #tpu.memory_space<vmem>>, vector<64x128xbf16>
    %cst_9 = arith.constant dense<0.000000e+00> : vector<512x128xf32>
    %34 = tpu.matmul %32, %33, %cst_9 {dimension_numbers = #tpu.dot_dimension_numbers<[1], [0], [0], [1], [0, 0, 1, 1], [], []>} : vector<512x64xbf16>, vector<64x128xbf16>, vector<512x128xf32> -> vector<512x128xf32>
    %c0_10 = arith.constant 0 : index
    %c0_11 = arith.constant 0 : index
    %35 = vector.load %arg6[%c0_10, %c0_11] : memref<1x128xf32, #tpu.memory_space<vmem>>, vector<1x128xf32>
    %36 = vector.broadcast %35 : vector<1x128xf32> to vector<512x128xf32>
    %37 = arith.addf %34, %36 : vector<512x128xf32>
    %cst_12 = arith.constant 0.000000e+00 : f32
    %38 = vector.broadcast %cst_12 : f32 to vector<512x128xf32>
    %39 = arith.maximumf %37, %38 : vector<512x128xf32>
    %40 = arith.truncf %39 : vector<512x128xf32> to vector<512x128xbf16>
    %c0_13 = arith.constant 0 : index
    %c0_14 = arith.constant 0 : index
    %41 = vector.load %arg7[%c0_13, %c0_14] : memref<128x1024xbf16, #tpu.memory_space<vmem>>, vector<128x1024xbf16>
    %cst_15 = arith.constant dense<0.000000e+00> : vector<512x1024xf32>
    %42 = tpu.matmul %40, %41, %cst_15 {dimension_numbers = #tpu.dot_dimension_numbers<[1], [0], [0], [1], [0, 0, 1, 1], [], []>} : vector<512x128xbf16>, vector<128x1024xbf16>, vector<512x1024xf32> -> vector<512x1024xf32>
    %c0_16 = arith.constant 0 : index
    %c0_17 = arith.constant 0 : index
    %43 = vector.load %arg8[%c0_16, %c0_17] : memref<1x1024xf32, #tpu.memory_space<vmem>>, vector<1x1024xf32>
    %44 = vector.broadcast %43 : vector<1x1024xf32> to vector<512x1024xf32>
    %45 = arith.addf %42, %44 : vector<512x1024xf32>
    %c0_18 = arith.constant 0 : index
    %c0_19 = arith.constant 0 : index
    %46 = vector.load %arg9[%c0_18, %c0_19] : memref<8x1024xf32, #tpu.memory_space<vmem>>, vector<8x1024xf32>
    %47 = vector.shape_cast %45 : vector<512x1024xf32> to vector<8x64x1024xf32>
    %cst_20 = arith.constant dense<0xFF800000> : vector<8x1024xf32>
    %48 = vector.multi_reduction <maximumf>, %47, %cst_20 [1] : vector<8x64x1024xf32> to vector<8x1024xf32>
    %49 = arith.maximumf %46, %48 : vector<8x1024xf32>
    %c0_21 = arith.constant 0 : index
    %c0_22 = arith.constant 0 : index
    %50 = vector.load %arg9[%c0_21, %c0_22] : memref<8x1024xf32, #tpu.memory_space<vmem>>, vector<8x1024xf32>
    tpu.vector_store %arg9[%c0_21, %c0_22], %49 {strides = array<i32>} : memref<8x1024xf32, #tpu.memory_space<vmem>>, vector<8x1024xf32>,
    return
  }
  func.func @transform_0(%arg0: i32, %arg1: i32) -> (i32, i32, i32) {
    %c0_i32 = arith.constant 0 : i32
    %c0_i32_0 = arith.constant 0 : i32
    return %arg0, %arg1, %c0_i32 : i32, i32, i32
  }
  func.func @transform_1(%arg0: i32, %arg1: i32) -> (i32, i32) {
    %c0_i32 = arith.constant 0 : i32
    %c0_i32_0 = arith.constant 0 : i32
    %c0_i32_1 = arith.constant 0 : i32
    return %c0_i32, %c0_i32_0 : i32, i32
  }
  func.func @transform_2(%arg0: i32, %arg1: i32) -> (i32, i32) {
    %c0_i32 = arith.constant 0 : i32
    %c0_i32_0 = arith.constant 0 : i32
    %c0_i32_1 = arith.constant 0 : i32
    return %c0_i32, %c0_i32_0 : i32, i32
  }
  func.func @transform_3(%arg0: i32, %arg1: i32) -> (i32, i32) {
    %c0_i32 = arith.constant 0 : i32
    %c0_i32_0 = arith.constant 0 : i32
    %c0_i32_1 = arith.constant 0 : i32
    return %c0_i32, %c0_i32_0 : i32, i32
  }
  func.func @transform_4(%arg0: i32, %arg1: i32) -> (i32, i32) {
    %c0_i32 = arith.constant 0 : i32
    %c0_i32_0 = arith.constant 0 : i32
    %c0_i32_1 = arith.constant 0 : i32
    return %c0_i32, %c0_i32_0 : i32, i32
  }
  func.func @transform_5(%arg0: i32, %arg1: i32) -> (i32, i32) {
    %c0_i32 = arith.constant 0 : i32
    %c0_i32_0 = arith.constant 0 : i32
    %c0_i32_1 = arith.constant 0 : i32
    return %c0_i32, %c0_i32_0 : i32, i32
  }
  func.func @transform_6(%arg0: i32, %arg1: i32) -> (i32, i32) {
    %c0_i32 = arith.constant 0 : i32
    %c0_i32_0 = arith.constant 0 : i32
    %c0_i32_1 = arith.constant 0 : i32
    return %c0_i32, %c0_i32_0 : i32, i32
  }
  func.func @transform_7(%arg0: i32, %arg1: i32) -> (i32, i32) {
    %c0_i32 = arith.constant 0 : i32
    %c0_i32_0 = arith.constant 0 : i32
    return %arg0, %c0_i32 : i32, i32
  }
}

</mosaic_0001>

<bundles_post_ra>
// kernel: tpu_custom_call.1
= control target key start
LH: loop header
LB: loop body
LE: loop exit
PB: predicated region body
PF: predicated region fallthrough
CT: control target
= control target key end

     0   :  { %12 = vsyncpa [#allocation3], 0  ;;  %s7689_s0 = inlined_call_operand.vmem [shape: f32[8,64,3], index: 0, kind: input, shape index: {}]   ;;  %s7690_s1 = inlined_call_operand.hbm [shape: f32[3,64], index: 1, kind: input, shape index: {}]   ;;  %s7691_s2 = inlined_call_operand.vmem [shape: f32[1,64], index: 2, kind: input, shape index: {}]   ;;  %s7692_s3 = inlined_call_operand.vmem [shape: bf16[64,128], index: 3, kind: input, shape index: {}]   ;;  %s7693_s4 = inlined_call_operand.vmem [shape: f32[1,128], index: 4, kind: input, shape index: {}]   ;;  %s7694_s5 = inlined_call_operand.vmem [shape: bf16[128,1024], index: 5, kind: input, shape index: {}]   ;;  %s7695_s6 = inlined_call_operand.vmem [shape: f32[1,1024], index: 6, kind: input, shape index: {}]   ;;  %s7696_s7 = inlined_call_operand.hbm [shape: f32[8,1024], index: 7, kind: output, shape index: {}]  }
   0x1   :  { %13 = vsyncpa [#allocation4], 0  ;;  %s5186_s24 = smov [#allocation2]   ;;  %s5138_s28 = scalar_lea.hbm %s7690_s1, 64 }
   0x2   :  { %s22_s25 = sshll.u32 %s5186_s24, 4  ;;  %p5139_p0 = scmp.ne.s32.totalorder %s7690_s1, %s5138_s28  ;;  %s23_s25 = int_to_ptr.vmem [resolvable:$true] %s22_s25 }
   0x3   :  { %p5142_p1 = scmp.lt.u32.totalorder %s5138_s28, %s7690_s1 }
   0x5   :  { %p5144_p2 = pnand %p5142_p1, %p5139_p0 }
   0x7   :  { %5147 = shalt.err (!%p5144_p2)
}
   0x8   :  { %s5148_s10 = scalar_lea.vmem %s23_s25, 64  ;;  %p5153_p4 = scmp.lt.s32.totalorder %s23_s25, %s23_s25 }
   0x9   :  { %p5149_p3 = scmp.ne.s32.totalorder %s23_s25, %s5148_s10  ;;  %p5154_p5 = scmp.lt.s32.totalorder %s5148_s10, %s5148_s10 }
   0xb   :  { %p5155_p6 = por %p5154_p5, %p5153_p4 }
   0xd   :  { %p5156_p7 = pnand %p5155_p6, %p5149_p3 }
   0xf   :  { %5159 = shalt.err (!%p5156_p7)
}
  0x10   :  { %25 = dma.hbm_to_vmem [thread:$0]  %s7690_s1, 64, %s23_s25, [#allocation3]  }
  0x11   :  { %5182 = dma.done.wait [#allocation3], 64  }
  0x12   :  { %5183 = vsyncadd [#allocation3], 4294967232  ;;  %v7700_v0 = vmov 2   ;;  %v7704_v1 = vmov 1   ;;  %v53_v2 = vld [vmem:[%s7689_s0 + $0x8] sm:$0xff]  ;;  %v52_v3 = vld [vmem:[%s7689_s0] sm:$0xff]  ;;  %v437_v44 = vlaneseq }
  0x13   :  { %5041 = vset.pattern.permute.xlu0 %v7700_v0  ;;  %5037 = vset.pattern.permute.xlu1 %v7704_v1  ;;  %v56_v4 = vld [vmem:[%s7689_s0 + $0x20] sm:$0xff]  ;;  %v59_v5 = vld [vmem:[%s7689_s0 + $0x38] sm:$0xff]  ;;  %v7702_v7 = vmov 0   ;;  %v61_v8 = vld [vmem:[%s7689_s0 + $0x48] sm:$0xff]  ;;  %vm1487_vm0 = vcmask 523264   ;;  %vm4711_vm1 = vcmask 1041409  }
  0x14   :  { %898 = vperm.xlu0 %5041, %v53_v2   ;;  %506 = vperm.xlu1 %5037, %v52_v3   ;;  %v55_v6 = vld [vmem:[%s7689_s0 + $0x18] sm:$0xff]  ;;  %v5268_v9 = vld [vmem:[%s7689_s0 + $0x60] sm:$0xff]  ;;  %v54_v11 = vld [vmem:[%s7689_s0 + $0x10] sm:$0xff]  ;;  %v5445_v48 = vshrl.u32 %v437_v44, 7  ;;  %vm4713_vm2 = vcmask 1042434   ;;  %vm4715_vm3 = vcmask 1043459  }
  0x15   :  { %v5274_v10 = vld [vmem:[%s7689_s0 + $0x78] sm:$0xff]  ;;  %v5284_v12 = vld [vmem:[%s7689_s0 + $0x88] sm:$0xff]  ;;  %v58_v14 = vld [vmem:[%s7689_s0 + $0x30] sm:$0xff]  ;;  %vm4717_vm4 = vcmask 1044484   ;;  %vm4719_vm5 = vcmask 1045509   ;;  %vm4721_vm6 = vcmask 1046534  }
  0x16   :  { %v57_v13 = vld [vmem:[%s7689_s0 + $0x28] sm:$0xff]  ;;  %v5300_v15 = vld [vmem:[%s7689_s0 + $0x50] sm:$0xff]  ;;  %v5316_v17 = vld [vmem:[%s7689_s0 + $0xa0] sm:$0xff]  ;;  %7722 = vst [vmem:[#allocation9_spill] sm:$0xff] %v5445_v48  ;;  %v7697_v53 = vsub.s32 1, %v5445_v48  ;;  %v7699_v56 = vsub.s32 2, %v5445_v48 }
  0x17   :  { %v5310_v16 = vld [vmem:[%s7689_s0 + $0x90] sm:$0xff]  ;;  %v60_v18 = vld [vmem:[%s7689_s0 + $0x40] sm:$0xff]  ;;  %v5326_v19 = vld [vmem:[%s7689_s0 + $0xc8] sm:$0xff]  ;;  %v7698_v57 = vsub.s32 0, %v5445_v48  ;;  %vm4723_vm7 = vcmask 1047559  }
  0x18   :  { %910 = vperm.xlu0 %5041, %v56_v4   ;;  %510 = vperm.xlu1 %5037, %v53_v2   ;;  %v5333_v20 = vld [vmem:[%s7689_s0 + $0xd0] sm:$0xff]  ;;  %v5339_v21 = vld [vmem:[%s7689_s0 + $0xe0] sm:$0xff]  ;;  %v63_v22 = vld [vmem:[%s7689_s0 + $0x58] sm:$0xff] }
  0x19   :  { %v5349_v23 = vld [vmem:[%s7689_s0 + $0x108] sm:$0xff]  ;;  %v5355_v24 = vld [vmem:[%s7689_s0 + $0x110] sm:$0xff]  ;;  %v5123_v25 = vld [vmem:[%s7692_s3] sm:$0xff]  }
  0x1a   :  { %4951 = vmatprep.subr.bf16.mxu0 %v5123_v25  ;;  %5023 = vmatprep.subr.bf16.mxu1 %v5123_v25  ;;  %v5124_v26 = vld [vmem:[%s7692_s3 + $0x8] sm:$0xff]   ;;  %v5125_v27 = vld [vmem:[%s7692_s3 + $0x10] sm:$0xff]   ;;  %v5126_v28 = vld [vmem:[%s7692_s3 + $0x18] sm:$0xff]  }
  0x1b   :  { %4952 = vmatpush3.bf16.msra.mxu0 %v5123_v25  ;;  %5027 = vmatpush3.bf16.msra.mxu1 %v5123_v25  ;;  %v65_v29 = vld [vmem:[%s7689_s0 + $0x68] sm:$0xff]  ;;  %v66_v30 = vld [vmem:[%s7689_s0 + $0x70] sm:$0xff]  ;;  %v68_v39 = vld [vmem:[%s7689_s0 + $0x80] sm:$0xff] }
  0x1c   :  { %922 = vperm.xlu0 %5041, %v59_v5   ;;  %5038 = vset.pattern.permute.xlu1 %v7702_v7  ;;  %v5389_v31 = vld [vmem:[%s7689_s0 + $0xa8] sm:$0xff]  ;;  %v5396_v32 = vld [vmem:[%s7689_s0 + $0xb0] sm:$0xff]  ;;  %v71_v50 = vld [vmem:[%s7689_s0 + $0x98] sm:$0xff] }
  0x1d   :  { %134 = vperm.xlu1 %5038, %v55_v6   ;;  %4953 = vmatprep.subr.bf16.mxu0 %v5124_v26  ;;  %v5406_v35 = vld [vmem:[%s7689_s0 + $0xe8] sm:$0xff]  ;;  %v5414_v38 = vld [vmem:[%s7689_s0 + $0xf0] sm:$0xff]  ;;  %v116_v54 = vld [vmem:[#allocation2] sm:$0x7] }
  0x1e   :  { %5024 = vmatprep.subr.bf16.mxu1 %v5124_v26  ;;  %v5432_v43 = vld [vmem:[%s7689_s0 + $0x128] sm:$0xff]  ;;  %v5442_v47 = vld [vmem:[%s7689_s0 + $0x130] sm:$0xff]  ;;  %v5474_v60 = vrot.slane %v116_v54, %v7697_v53  ;;  %v5482_v62 = vrot.slane %v116_v54, %v7699_v56  ;;  %v5486_v63 = vrot.slane %v116_v54, %v7698_v57  ;;  %v5539_v54 = vld [vmem:[%s7689_s0 + $0xf8] sm:$0xff] }
  0x1f   :  { %4954 = vmatpush3.bf16.msra.mxu0 %v5124_v26  ;;  %5028 = vmatpush3.bf16.msra.mxu1 %v5124_v26  ;;  %7721 = vst [vmem:[#allocation8_spill] sm:$0xff] %v5442_v47  ;;  %v5456_v52 = vld [vmem:[%s7689_s0 + $0x150] sm:$0xff]  ;;  %v5470_v59 = vld [vmem:[%s7689_s0 + $0x168] sm:$0xff] }
  0x20   :  { %930 = vperm.xlu0 %5041, %v61_v8   ;;  %4955 = vmatprep.subr.bf16.mxu0 %v5125_v27  ;;  %7723 = vst [vmem:[#allocation10_spill] sm:$0xff] %v5470_v59 }
  0x21   :  { %5039 = vset.pattern.permute.xlu1 %v7704_v1  ;;  %5025 = vmatprep.subr.bf16.mxu1 %v5125_v27 }
  0x22   :  { %518 = vperm.xlu1 %5039, %v55_v6  }
  0x23   :  { %4956 = vmatpush3.bf16.msra.mxu0 %v5125_v27  ;;  %5029 = vmatpush3.bf16.msra.mxu1 %v5125_v27 }
  0x24   :  { %942 = vperm.xlu0 %5041, %v5268_v9   ;;  %4957 = vmatprep.subr.bf16.mxu0 %v5126_v28 }
  0x25   :  { %5026 = vmatprep.subr.bf16.mxu1 %v5126_v28 }
  0x26   :  { %5040 = vset.pattern.permute.xlu1 %v7700_v0 }
  0x27   :  { %894 = vperm.xlu1 %5040, %v52_v3   ;;  %4958 = vmatpush3.bf16.msra.mxu0 %v5126_v28 }
  0x28   :  { %954 = vperm.xlu0 %5041, %v5274_v10   ;;  %5030 = vmatpush3.bf16.msra.mxu1 %v5126_v28  ;;  %v75_v28 = vld [vmem:[%s7689_s0 + $0xb8] sm:$0xff] }
  0x2b   :  { %902 = vperm.xlu1 %5040, %v54_v11  }
  0x2c   :  { %962 = vperm.xlu0 %5041, %v5284_v12  }
  0x2f   :  { %906 = vperm.xlu1 %5040, %v55_v6  }
  0x30   :  { %5062 = vset.pattern.permute.xlu0 %v7702_v7 }
  0x31   :  { %119 = vperm.xlu0 %5062, %v52_v3  }
  0x33   :  { %5042 = vset.pattern.permute.xlu1 %v7702_v7 }
  0x34   :  { %144 = vperm.xlu1 %5042, %v57_v13  }
  0x35   :  { %124 = vperm.xlu0 %5062, %v53_v2   ;;  %v98_v2 = vld [vmem:[%s7689_s0 + $0x170] sm:$0xff] }
  0x38   :  { %5043 = vset.pattern.permute.xlu1 %v7704_v1 }
  0x39   :  { %129 = vperm.xlu0 %5062, %v54_v11   ;;  %522 = vperm.xlu1 %5043, %v56_v4  }
  0x3d   :  { %139 = vperm.xlu0 %5062, %v56_v4   ;;  %5044 = vset.pattern.permute.xlu1 %v7702_v7 }
  0x3e   :  { %149 = vperm.xlu1 %5044, %v58_v14  }
  0x41   :  { %164 = vperm.xlu0 %5062, %v61_v8  }
  0x42   :  { %154 = vperm.xlu1 %5044, %v59_v5  }
  0x45   :  { %169 = vperm.xlu0 %5062, %v5300_v15  }
  0x46   :  { %5045 = vset.pattern.permute.xlu1 %v7704_v1 }
  0x47   :  { %534 = vperm.xlu1 %5045, %v59_v5  }
  0x49   :  { %179 = vperm.xlu0 %5062, %v5268_v9  }
  0x4b   :  { %5046 = vset.pattern.permute.xlu1 %v7700_v0 }
  0x4c   :  { %914 = vperm.xlu1 %5046, %v57_v13  }
  0x4d   :  { %204 = vperm.xlu0 %5062, %v5284_v12  }
  0x50   :  { %918 = vperm.xlu1 %5046, %v58_v14  }
  0x51   :  { %209 = vperm.xlu0 %5062, %v5310_v16  }
  0x54   :  { %5047 = vset.pattern.permute.xlu1 %v7702_v7 }
  0x55   :  { %219 = vperm.xlu0 %5062, %v5316_v17   ;;  %159 = vperm.xlu1 %5047, %v60_v18  }
  0x59   :  { %244 = vperm.xlu0 %5062, %v5326_v19   ;;  %5048 = vset.pattern.permute.xlu1 %v7704_v1 }
  0x5a   :  { %538 = vperm.xlu1 %5048, %v60_v18  }
  0x5d   :  { %249 = vperm.xlu0 %5062, %v5333_v20  }
  0x5e   :  { %542 = vperm.xlu1 %5048, %v61_v8  }
  0x61   :  { %259 = vperm.xlu0 %5062, %v5339_v21  }
  0x62   :  { %5049 = vset.pattern.permute.xlu1 %v7702_v7 }
  0x63   :  { %174 = vperm.xlu1 %5049, %v63_v22  }
  0x65   :  { %284 = vperm.xlu0 %5062, %v5349_v23  }
  0x67   :  { %5050 = vset.pattern.permute.xlu1 %v7704_v1 }
  0x68   :  { %550 = vperm.xlu1 %5050, %v63_v22  }
  0x69   :  { %289 = vperm.xlu0 %5062, %v5355_v24  }
  0x6c   :  { %5051 = vset.pattern.permute.xlu1 %v7700_v0 }
  0x6d   :  { %5080 = vset.pattern.permute.xlu0 %v7704_v1  ;;  %926 = vperm.xlu1 %5051, %v60_v18   ;;  %v5506_v18 = vld [vmem:[%s7691_s2] ss:$0 sm:$0xff] }
  0x6e   :  { %514 = vperm.xlu0 %5080, %v54_v11  }
  0x71   :  { %934 = vperm.xlu1 %5051, %v5300_v15  }
  0x72   :  { %526 = vperm.xlu0 %5080, %v57_v13  }
  0x75   :  { %938 = vperm.xlu1 %5051, %v63_v22  }
  0x76   :  { %530 = vperm.xlu0 %5080, %v58_v14  }
  0x79   :  { %5052 = vset.pattern.permute.xlu1 %v7702_v7 }
  0x7a   :  { %546 = vperm.xlu0 %5080, %v5300_v15   ;;  %184 = vperm.xlu1 %5052, %v65_v29  }
  0x7e   :  { %558 = vperm.xlu0 %5080, %v65_v29   ;;  %5053 = vset.pattern.permute.xlu1 %v7704_v1 }
  0x7f   :  { %554 = vperm.xlu1 %5053, %v5268_v9  }
  0x82   :  { %562 = vperm.xlu0 %5080, %v66_v30  }
  0x83   :  { %5054 = vset.pattern.permute.xlu1 %v7702_v7 }
  0x84   :  { %189 = vperm.xlu1 %5054, %v66_v30  }
  0x86   :  { %578 = vperm.xlu0 %5080, %v5310_v16  }
  0x88   :  { %194 = vperm.xlu1 %5054, %v5274_v10  }
  0x8a   :  { %590 = vperm.xlu0 %5080, %v5389_v31  }
  0x8c   :  { %5055 = vset.pattern.permute.xlu1 %v7704_v1 }
  0x8d   :  { %566 = vperm.xlu1 %5055, %v5274_v10  }
  0x8e   :  { %594 = vperm.xlu0 %5080, %v5396_v32  }
  0x91   :  { %5056 = vset.pattern.permute.xlu1 %v7700_v0 }
  0x92   :  { %946 = vperm.xlu1 %5056, %v65_v29   ;;  %610 = vperm.xlu0 %5080, %v5333_v20  }
  0x93   :  { %v507_v33 = vpop.permute.xlu1 %506  ;;  %v899_v34 = vpop.permute.xlu0 %898 }
  0x94   :  { %v765_v4 = vmul.f32 %v5474_v60, %v507_v33  ;;  %v1154_v11 = vmul.f32 %v5482_v62, %v899_v34 }
  0x96   :  { %950 = vperm.xlu1 %5056, %v66_v30   ;;  %622 = vperm.xlu0 %5080, %v5406_v35  }
  0x97   :  { %v511_v36 = vpop.permute.xlu1 %510  ;;  %v5409_v37 = vpop.permute.xlu0 %910 }
  0x9a   :  { %5057 = vset.pattern.permute.xlu1 %v7702_v7  ;;  %626 = vperm.xlu0 %5080, %v5414_v38  }
  0x9b   :  { %199 = vperm.xlu1 %5057, %v68_v39   ;;  %v5421_v40 = vpop.permute.xlu0 %922 }
  0x9c   :  { %v5423_v41 = vpop.permute.xlu1 %134 }
  0x9d   :  { %v444_v56 = vmul.f32 %v5486_v63, %v5423_v41 }
  0x9e   :  { %642 = vperm.xlu0 %5080, %v5355_v24  }
  0x9f   :  { %5058 = vset.pattern.permute.xlu1 %v7704_v1  ;;  %v5427_v42 = vpop.permute.xlu0 %930 }
  0xa0   :  { %570 = vperm.xlu1 %5058, %v68_v39  }
  0xa1   :  { %v5434_v45 = vpop.permute.xlu1 %518 }
  0xa2   :  { %654 = vperm.xlu0 %5080, %v5432_v43   ;;  %v768_v53 = vmul.f32 %v5474_v60, %v5434_v45 }
  0xa3   :  { %v5437_v46 = vpop.permute.xlu0 %942 }
  0xa4   :  { %574 = vperm.xlu1 %5058, %v5284_v12   ;;  %v766_v12 = vmul.f32 %v5474_v60, %v511_v36  ;;  %v832_v48 = vadd.f32 %v768_v53, %v444_v56  ;;  %v5650_v53 = vld [vmem:[%s7689_s0 + $0x1c8] sm:$0xff] }
  0xa6   :  { %v895_v49 = vpop.permute.xlu1 %894  ;;  %658 = vperm.xlu0 %5080, %v5442_v47  }
  0xa7   :  { %v5451_v51 = vpop.permute.xlu0 %954  ;;  %v1153_v6 = vmul.f32 %v5482_v62, %v895_v49 }
  0xa8   :  { %5059 = vset.pattern.permute.xlu1 %v7702_v7 }
  0xa9   :  { %214 = vperm.xlu1 %5059, %v71_v50  }
  0xaa   :  { %v5460_v55 = vpop.permute.xlu1 %902  ;;  %674 = vperm.xlu0 %5080, %v5456_v52  }
  0xab   :  { %v5465_v58 = vpop.permute.xlu0 %962 }
  0xad   :  { %5060 = vset.pattern.permute.xlu1 %v7704_v1 }
  0xae   :  { %582 = vperm.xlu1 %5060, %v71_v50   ;;  %v5477_v61 = vpop.permute.xlu1 %906  ;;  %686 = vperm.xlu0 %5080, %v5470_v59  }
  0xb0   :  { %v120_v3 = vpop.permute.xlu0 %119 }
  0xb1   :  { %v441_v5 = vmul.f32 %v5486_v63, %v120_v3 }
  0xb2   :  { %5061 = vset.pattern.permute.xlu1 %v7700_v0  ;;  %690 = vperm.xlu0 %5080, %v98_v2  }
  0xb3   :  { %v829_v8 = vadd.f32 %v765_v4, %v441_v5  ;;  %958 = vperm.xlu1 %5061, %v68_v39   ;;  %v5495_v9 = vpop.permute.xlu1 %144  ;;  %v5554_v4 = vld [vmem:[%s7689_s0 + $0x120] sm:$0xff] }
  0xb4   :  { %v125_v10 = vpop.permute.xlu0 %124 }
  0xb5   :  { %v1217_v13 = vadd.f32 %v1153_v6, %v829_v8  ;;  %v442_v14 = vmul.f32 %v5486_v63, %v125_v10  ;;  %v5564_v8 = vld [vmem:[%s7689_s0 + $0x138] sm:$0xff] }
  0xb6   :  { %5097 = vset.pattern.permute.xlu0 %v7700_v0  ;;  %7724 = vst [vmem:[#allocation11_spill] sm:$0xff] %v5564_v8 }
  0xb7   :  { %v830_v15 = vadd.f32 %v766_v12, %v442_v14  ;;  %966 = vperm.xlu1 %5061, %v5310_v16   ;;  %974 = vperm.xlu0 %5097, %v5316_v17   ;;  %v1288_v27 = vadd.f32 %v5506_v18, %v1217_v13  ;;  %v5573_v12 = vld [vmem:[%s7689_s0 + $0x148] sm:$0xff]  ;;  %v5583_v14 = vld [vmem:[%s7689_s0 + $0x160] sm:$0xff] }
  0xb8   :  { %v5508_v22 = vpop.permute.xlu0 %129  ;;  %v5510_v25 = vpop.permute.xlu1 %522 }
  0xb9   :  { %v1218_v26 = vadd.f32 %v1154_v11, %v830_v15  ;;  %v1352_v33 = vmax.f32 %v1288_v27, 0.0  ;;  %v5592_v27 = vld [vmem:[%s7689_s0 + $0x178] sm:$0xff] }
  0xba   :  { %7727 = vst [vmem:[#allocation14_spill] sm:$0xff] %v5592_v27 }
  0xbb   :  { %970 = vperm.xlu1 %5061, %v71_v50   ;;  %v1289_v16 = vadd.f32 %v5506_v18, %v1218_v26  ;;  %986 = vperm.xlu0 %5097, %v75_v28  }
  0xbc   :  { %v5517_v29 = vpop.permute.xlu0 %139 }
  0xbd   :  { %v5519_v30 = vpop.permute.xlu1 %149  ;;  %v1353_v34 = vmax.f32 %v1289_v16, 0.0  ;;  %v445_v45 = vmul.f32 %v5486_v63, %v5517_v29 }
  0xbf   :  { %5063 = vset.pattern.permute.xlu1 %v7702_v7  ;;  %v1416_v36 = vpack.c.bf16 %v1353_v34, %v1352_v33  ;;  %994 = vperm.xlu0 %5097, %v5326_v19  }
  0xc0   :  { %224 = vperm.xlu1 %5063, %v5389_v31   ;;  %v5524_v39 = vpop.permute.xlu0 %164 }
  0xc1   :  { %4959 = vmatprep.mubr.msk.bf16.mxu0 %vm1487_vm0, %v1416_v36  ;;  %v5527_v44 = vpop.permute.xlu1 %154  ;;  %v5617_v36 = vld [vmem:[%s7689_s0 + $0x1a0] sm:$0xff] }
  0xc2   :  { %v448_v29 = vmul.f32 %v5486_v63, %v5527_v44 }
  0xc3   :  { %1006 = vperm.xlu0 %5097, %v5339_v21  }
  0xc4   :  { %5064 = vset.pattern.permute.xlu1 %v7704_v1  ;;  %v5531_v49 = vpop.permute.xlu0 %169 }
  0xc5   :  { %586 = vperm.xlu1 %5064, %v5316_v17  }
  0xc6   :  { %v5534_v50 = vpop.permute.xlu1 %534 }
  0xc7   :  { %1018 = vperm.xlu0 %5097, %v5539_v54  }
  0xc8   :  { %v5542_v2 = vpop.permute.xlu0 %179 }
  0xc9   :  { %5065 = vset.pattern.permute.xlu1 %v7702_v7 }
  0xca   :  { %229 = vperm.xlu1 %5065, %v5396_v32  }
  0xcb   :  { %v5546_v3 = vpop.permute.xlu1 %914  ;;  %1026 = vperm.xlu0 %5097, %v5349_v23  }
  0xcc   :  { %v5549_v17 = vpop.permute.xlu0 %204 }
  0xce   :  { %234 = vperm.xlu1 %5065, %v75_v28  }
  0xcf   :  { %v5556_v5 = vpop.permute.xlu1 %918  ;;  %1038 = vperm.xlu0 %5097, %v5554_v4  }
  0xd0   :  { %v5559_v6 = vpop.permute.xlu0 %209 }
  0xd2   :  { %5066 = vset.pattern.permute.xlu1 %v7704_v1 }
  0xd3   :  { %598 = vperm.xlu1 %5066, %v75_v28   ;;  %1050 = vperm.xlu0 %5097, %v5564_v8   ;;  %v5597_v28 = vld [vmem:[%s7689_s0 + $0xc0] sm:$0xff] }
  0xd4   :  { %v160_v10 = vpop.permute.xlu1 %159  ;;  %v5568_v11 = vpop.permute.xlu0 %219 }
  0xd7   :  { %5067 = vset.pattern.permute.xlu1 %v7700_v0  ;;  %1058 = vperm.xlu0 %5097, %v5573_v12   ;;  %v1156_v0 = vmul.f32 %v5482_v62, %v5477_v61  ;;  %v443_v61 = vmul.f32 %v5486_v63, %v5508_v22 }
  0xd8   :  { %978 = vperm.xlu1 %5067, %v5389_v31   ;;  %v5578_v13 = vpop.permute.xlu0 %244 }
  0xd9   :  { %7725 = vst [vmem:[#allocation12_spill] sm:$0xff] %v5578_v13  ;;  %v539_v15 = vpop.permute.xlu1 %538  ;;  %v1220_v41 = vadd.f32 %v1156_v0, %v832_v48  ;;  %v772_v0 = vmul.f32 %v5474_v60, %v5534_v50  ;;  %v450_v48 = vmul.f32 %v5486_v63, %v5524_v39  ;;  %v1155_v39 = vmul.f32 %v5482_v62, %v5460_v55 }
  0xda   :  { %v446_v13 = vmul.f32 %v5486_v63, %v5495_v9  ;;  %v1162_v55 = vmul.f32 %v5482_v62, %v5427_v42 }
  0xdb   :  { %1070 = vperm.xlu0 %5097, %v5583_v14   ;;  %v1291_v50 = vadd.f32 %v5506_v18, %v1220_v41  ;;  %v836_v44 = vadd.f32 %v772_v0, %v448_v29  ;;  %v447_v0 = vmul.f32 %v5486_v63, %v5519_v30 }
  0xdc   :  { %982 = vperm.xlu1 %5067, %v5396_v32   ;;  %v5587_v26 = vpop.permute.xlu0 %249  ;;  %v5606_v32 = vld [vmem:[%s7689_s0 + $0x188] sm:$0xff] }
  0xdd   :  { %7726 = vst [vmem:[#allocation13_spill] sm:$0xff] %v5587_v26  ;;  %v543_v31 = vpop.permute.xlu1 %542 }
  0xde   :  { %v774_v59 = vmul.f32 %v5474_v60, %v543_v31 }
  0xdf   :  { %1082 = vperm.xlu0 %5097, %v5592_v27  }
  0xe0   :  { %5068 = vset.pattern.permute.xlu1 %v7702_v7  ;;  %v5601_v16 = vpop.permute.xlu0 %259  ;;  %v838_v41 = vadd.f32 %v774_v59, %v450_v48 }
  0xe1   :  { %7728 = vst [vmem:[#allocation15_spill] sm:$0xff] %v5601_v16  ;;  %239 = vperm.xlu1 %5068, %v5597_v28   ;;  %v773_v16 = vmul.f32 %v5474_v60, %v539_v15  ;;  %v449_v15 = vmul.f32 %v5486_v63, %v160_v10  ;;  %v1158_v10 = vmul.f32 %v5482_v62, %v5546_v3 }
  0xe2   :  { %v5609_v33 = vpop.permute.xlu1 %174  ;;  %v1226_v29 = vadd.f32 %v1162_v55, %v838_v41 }
  0xe3   :  { %1090 = vperm.xlu0 %5097, %v5606_v32   ;;  %v837_v47 = vadd.f32 %v773_v16, %v449_v15 }
  0xe4   :  { %v5612_v34 = vpop.permute.xlu0 %284  ;;  %v1297_v41 = vadd.f32 %v5506_v18, %v1226_v29 }
  0xe5   :  { %7729 = vst [vmem:[#allocation16_spill] sm:$0xff] %v5612_v34  ;;  %5069 = vset.pattern.permute.xlu1 %v7704_v1  ;;  %v107_v1 = vld [vmem:[%s7689_s0 + $0x1b8] sm:$0xff]  ;;  %v769_v34 = vmul.f32 %v5474_v60, %v5510_v25  ;;  %v7731_v25 = vmov 0  }
  0xe6   :  { %602 = vperm.xlu1 %5069, %v5597_v28  }
  0xe7   :  { %v5623_v57 = vpop.permute.xlu1 %550  ;;  %1102 = vperm.xlu0 %5097, %v5617_v36   ;;  %v833_v56 = vadd.f32 %v769_v34, %v445_v45 }
  0xe8   :  { %v5630_v7 = vpop.permute.xlu0 %289 }
  0xe9   :  { %7730 = vst [vmem:[#allocation17_spill] sm:$0xff] %v5630_v7  ;;  %v5645_v7 = vld [vmem:[%s7689_s0 + $0xd8] sm:$0xff] }
  0xea   :  { %606 = vperm.xlu1 %5069, %v5326_v19   ;;  %v1157_v19 = vmul.f32 %v5482_v62, %v5409_v37  ;;  %v1160_v37 = vmul.f32 %v5482_v62, %v5421_v40 }
  0xeb   :  { %1114 = vperm.xlu0 %5097, %v107_v1  }
  0xec   :  { %v927_v27 = vpop.permute.xlu1 %926  ;;  %v1224_v16 = vadd.f32 %v1160_v37, %v836_v44 }
  0xed   :  { %v515_v1 = vpop.permute.xlu0 %514  ;;  %v1161_v31 = vmul.f32 %v5482_v62, %v927_v27 }
  0xee   :  { %v767_v22 = vmul.f32 %v5474_v60, %v515_v1  ;;  %5070 = vset.pattern.permute.xlu1 %v7731_v25  ;;  %v1221_v1 = vadd.f32 %v1157_v19, %v833_v56 }
  0xef   :  { %254 = vperm.xlu1 %5070, %v5645_v7   ;;  %1122 = vperm.xlu0 %5097, %v5650_v53   ;;  %v1225_v59 = vadd.f32 %v1161_v31, %v837_v47 }
  0xf0   :  { %v831_v34 = vadd.f32 %v767_v22, %v443_v61  ;;  %v935_v45 = vpop.permute.xlu1 %934  ;;  %v7732_v61 = vmov 1   ;;  %v1292_v42 = vadd.f32 %v5506_v18, %v1221_v1  ;;  %v1295_v1 = vadd.f32 %v5506_v18, %v1224_v16 }
  0xf1   :  { %v527_v26 = vpop.permute.xlu0 %526 }
  0xf2   :  { %v1219_v8 = vadd.f32 %v1155_v39, %v831_v34  ;;  %v770_v40 = vmul.f32 %v5474_v60, %v527_v26  ;;  %v1355_v26 = vmax.f32 %v1291_v50, 0.0  ;;  %v776_v39 = vmul.f32 %v5474_v60, %v5623_v57 }
  0xf3   :  { %5071 = vset.pattern.permute.xlu1 %v7732_v61  ;;  %5115 = vset.pattern.permute.xlu0 %v7731_v25  ;;  %v7733_v50 = vmov 2   ;;  %v1356_v34 = vmax.f32 %v1292_v42, 0.0 }
  0xf4   :  { %v1290_v27 = vadd.f32 %v5506_v18, %v1219_v8  ;;  %v834_v19 = vadd.f32 %v770_v40, %v446_v13  ;;  %614 = vperm.xlu1 %5071, %v5645_v7   ;;  %v939_v9 = vpop.permute.xlu1 %938  ;;  %299 = vperm.xlu0 %5115, %v5554_v4   ;;  %v451_v8 = vmul.f32 %v5486_v63, %v5531_v49 }
  0xf5   :  { %v531_v56 = vpop.permute.xlu0 %530  ;;  %v1159_v13 = vmul.f32 %v5482_v62, %v5556_v5  ;;  %v452_v49 = vmul.f32 %v5486_v63, %v5609_v33  ;;  %v1296_v5 = vadd.f32 %v5506_v18, %v1225_v59  ;;  %v1164_v31 = vmul.f32 %v5482_v62, %v939_v9 }
  0xf6   :  { %v1354_v48 = vmax.f32 %v1290_v27, 0.0  ;;  %v1222_v22 = vadd.f32 %v1158_v10, %v834_v19  ;;  %v771_v3 = vmul.f32 %v5474_v60, %v531_v56  ;;  %v1163_v27 = vmul.f32 %v5482_v62, %v935_v45 }
  0xf7   :  { %v840_v10 = vadd.f32 %v776_v39, %v452_v49  ;;  %v1359_v9 = vmax.f32 %v1295_v1, 0.0  ;;  %v1165_v1 = vmul.f32 %v5482_v62, %v5437_v46 }
  0xf8   :  { %v1293_v47 = vadd.f32 %v5506_v18, %v1222_v22  ;;  %v835_v37 = vadd.f32 %v771_v3, %v447_v0  ;;  %5072 = vset.pattern.permute.xlu1 %v7733_v50  ;;  %v1417_v30 = vpack.c.bf16 %v1355_v26, %v1354_v48  ;;  %324 = vperm.xlu0 %5115, %v5573_v12   ;;  %v1361_v0 = vmax.f32 %v1297_v41, 0.0 }
  0xf9   :  { %v547_v44 = vpop.permute.xlu0 %546  ;;  %990 = vperm.xlu1 %5072, %v5597_v28   ;;  %v185_v57 = vpop.permute.xlu1 %184  ;;  %v1360_v28 = vmax.f32 %v1296_v5, 0.0  ;;  %v1228_v42 = vadd.f32 %v1164_v31, %v840_v10 }
  0xfa   :  { %v1357_v15 = vmax.f32 %v1293_v47, 0.0  ;;  %v1223_v40 = vadd.f32 %v1159_v13, %v835_v37  ;;  %v775_v55 = vmul.f32 %v5474_v60, %v547_v44  ;;  %4960 = vmatmul.mubr.msk.bf16.vlgmr.msra.gmra.mrb[0].mxu0 %vm1487_vm0, %v1417_v30 }
  0xfb   :  { %v1420_v3 = vpack.c.bf16 %v1361_v0, %v1360_v28 }
  0xfc   :  { %v1294_v33 = vadd.f32 %v5506_v18, %v1223_v40  ;;  %v839_v19 = vadd.f32 %v775_v55, %v451_v8  ;;  %v1418_v26 = vpack.c.bf16 %v1357_v15, %v1356_v34  ;;  %329 = vperm.xlu0 %5115, %v5456_v52   ;;  %v1299_v8 = vadd.f32 %v5506_v18, %v1228_v42 }
  0xfd   :  { %998 = vperm.xlu1 %5072, %v5333_v20   ;;  %v559_v48 = vpop.permute.xlu0 %558  ;;  %v1168_v40 = vmul.f32 %v5482_v62, %v5451_v51 }
  0xfe   :  { %v1358_v16 = vmax.f32 %v1294_v33, 0.0  ;;  %v1227_v59 = vadd.f32 %v1163_v27, %v839_v19  ;;  %4963 = vmatprep.mubr.msk.bf16.mxu0 %vm1487_vm0, %v1418_v26  ;;  %v555_v56 = vpop.permute.xlu1 %554  ;;  %v1363_v39 = vmax.f32 %v1299_v8, 0.0 }
  0xff   :  { %v777_v30 = vmul.f32 %v5474_v60, %v555_v56 }
 0x100   :  { %v1298_v45 = vadd.f32 %v5506_v18, %v1227_v59  ;;  %v1419_v22 = vpack.c.bf16 %v1359_v9, %v1358_v16  ;;  %339 = vperm.xlu0 %5115, %v5583_v14  }
 0x101   :  { %1002 = vperm.xlu1 %5072, %v5645_v7   ;;  %v563_v20 = vpop.permute.xlu0 %562  ;;  %v453_v7 = vmul.f32 %v5486_v63, %v5542_v2  ;;  %v778_v2 = vmul.f32 %v5474_v60, %v559_v48 }
 0x102   :  { %4964 = vmatmul.mubr.msk.bf16.gmra.mrb[4].mxu0 %vm1487_vm0, %v1419_v22  ;;  %v1362_v29 = vmax.f32 %v1298_v45, 0.0  ;;  %v779_v27 = vmul.f32 %v5474_v60, %v563_v20 }
 0x103   :  { %4967 = vmatprep.mubr.msk.bf16.mxu0 %vm1487_vm0, %v1420_v3  ;;  %v190_v13 = vpop.permute.xlu1 %189  ;;  %v841_v49 = vadd.f32 %v777_v30, %v453_v7  ;;  %v5766_v30 = vld [vmem:[%s7689_s0 + $0x100] sm:$0xff] }
 0x104   :  { %364 = vperm.xlu0 %5115, %v5606_v32   ;;  %v1421_v34 = vpack.c.bf16 %v1363_v39, %v1362_v29  ;;  %v455_v33 = vmul.f32 %v5486_v63, %v190_v13 }
 0x105   :  { %5073 = vset.pattern.permute.xlu1 %v7731_v25  ;;  %v5721_v37 = vpop.permute.xlu0 %578  ;;  %v1229_v55 = vadd.f32 %v1165_v1, %v841_v49  ;;  %v458_v1 = vmul.f32 %v5486_v63, %v5549_v17 }
 0x106   :  { %264 = vperm.xlu1 %5073, %v5406_v35   ;;  %v843_v42 = vadd.f32 %v779_v27, %v455_v33  ;;  %v783_v17 = vmul.f32 %v5474_v60, %v5721_v37  ;;  %v1974_v37 = vld [vmem:[%s7694_s5 + $0x28] sm:$0xff] }
 0x107   :  { %v195_v47 = vpop.permute.xlu1 %194  ;;  %v1300_v28 = vadd.f32 %v5506_v18, %v1229_v55 }
 0x108   :  { %v456_v31 = vmul.f32 %v5486_v63, %v195_v47 }
 0x109   :  { %v5732_v15 = vpop.permute.xlu0 %590  ;;  %v1364_v56 = vmax.f32 %v1300_v28, 0.0 }
 0x10a   :  { %5074 = vset.pattern.permute.xlu1 %v7732_v61  ;;  %4968 = vmatmul.mubr.msk.bf16.gmra.mrb[8].mxu0 %vm1487_vm0, %v1421_v34 }
 0x10b   :  { %618 = vperm.xlu1 %5074, %v5339_v21   ;;  %v454_v21 = vmul.f32 %v5486_v63, %v185_v57 }
 0x10c   :  { %v567_v5 = vpop.permute.xlu1 %566 }
 0x10d   :  { %v780_v44 = vmul.f32 %v5474_v60, %v567_v5  ;;  %v842_v10 = vadd.f32 %v778_v2, %v454_v21  ;;  %v5744_v26 = vpop.permute.xlu0 %594  ;;  %v1170_v5 = vmul.f32 %v5482_v62, %v5465_v58  ;;  %v5793_v58 = vld [vmem:[%s7689_s0 + $0x118] sm:$0xff] }
 0x10f   :  { %5075 = vset.pattern.permute.xlu1 %v7731_v25  ;;  %v844_v41 = vadd.f32 %v780_v44, %v456_v31 }
 0x110   :  { %269 = vperm.xlu1 %5075, %v5414_v38  }
 0x111   :  { %v947_v46 = vpop.permute.xlu1 %946  ;;  %v1232_v9 = vadd.f32 %v1168_v40, %v844_v41  ;;  %v5753_v22 = vpop.permute.xlu0 %610  ;;  %v459_v40 = vmul.f32 %v5486_v63, %v5559_v6 }
 0x112   :  { %v1166_v19 = vmul.f32 %v5482_v62, %v947_v46 }
 0x113   :  { %v1303_v0 = vadd.f32 %v5506_v18, %v1232_v9  ;;  %v847_v6 = vadd.f32 %v783_v17, %v459_v40 }
 0x114   :  { %v1230_v51 = vadd.f32 %v1166_v19, %v842_v10  ;;  %274 = vperm.xlu1 %5075, %v5539_v54  }
 0x115   :  { %v951_v57 = vpop.permute.xlu1 %950  ;;  %v1367_v13 = vmax.f32 %v1303_v0, 0.0  ;;  %v5759_v7 = vpop.permute.xlu0 %622 }
 0x116   :  { %v1301_v16 = vadd.f32 %v5506_v18, %v1230_v51  ;;  %v1167_v59 = vmul.f32 %v5482_v62, %v951_v57 }
 0x118   :  { %v1365_v48 = vmax.f32 %v1301_v16, 0.0  ;;  %v1231_v45 = vadd.f32 %v1167_v59, %v843_v42  ;;  %5076 = vset.pattern.permute.xlu1 %v7732_v61 }
 0x119   :  { %630 = vperm.xlu1 %5076, %v5539_v54   ;;  %v5768_v34 = vpop.permute.xlu0 %626 }
 0x11a   :  { %v1302_v3 = vadd.f32 %v5506_v18, %v1231_v45  ;;  %v200_v8 = vpop.permute.xlu1 %199  ;;  %v1422_v20 = vpack.c.bf16 %v1365_v48, %v1364_v56  ;;  %v5813_v56 = vld [vmem:[%s7689_s0 + $0x190] sm:$0xff]  ;;  %v1978_v48 = vld [vmem:[%s7694_s5 + $0x48] sm:$0xff] }
 0x11b   :  { %v457_v21 = vmul.f32 %v5486_v63, %v200_v8  ;;  %369 = vperm.xlu0 %5115, %v5813_v56   ;;  %v1982_v45 = vld [vmem:[%s7694_s5 + $0x68] sm:$0xff] }
 0x11c   :  { %v1366_v29 = vmax.f32 %v1302_v3, 0.0  ;;  %4971 = vmatprep.mubr.msk.bf16.mxu0 %vm1487_vm0, %v1422_v20 }
 0x11d   :  { %5077 = vset.pattern.permute.xlu1 %v7733_v50 }
 0x11e   :  { %1010 = vperm.xlu1 %5077, %v5406_v35   ;;  %v1423_v39 = vpack.c.bf16 %v1367_v13, %v1366_v29  ;;  %v4862_v13 = vcombine.high %v1978_v48, %v1982_v45 }
 0x11f   :  { %v571_v47 = vpop.permute.xlu1 %570  ;;  %379 = vperm.xlu0 %5115, %v5617_v36  }
 0x120   :  { %4972 = vmatmul.mubr.msk.bf16.gmra.mrb[12].mxu0 %vm1487_vm0, %v1423_v39  ;;  %v781_v31 = vmul.f32 %v5474_v60, %v571_v47  ;;  %v4861_v39 = vcombine.low %v1978_v48, %v1982_v45  ;;  %v2018_v48 = vld [vmem:[%s7694_s5 + $0x188] sm:$0xff] }
 0x121   :  { %v2022_v45 = vld [vmem:[%s7694_s5 + $0x1a8] sm:$0xff] }
 0x122   :  { %1014 = vperm.xlu1 %5077, %v5414_v38   ;;  %v5776_v38 = vpop.permute.xlu0 %642  ;;  %v845_v10 = vadd.f32 %v781_v31, %v457_v21  ;;  %v1994_v21 = vld [vmem:[%s7694_s5 + $0xc8] sm:$0xff] }
 0x123   :  { %v575_v54 = vpop.permute.xlu1 %574  ;;  %404 = vperm.xlu0 %5115, %v5650_v53   ;;  %v5855_v53 = vld [vmem:[%s7689_s0 + $0x1d0] sm:$0xff] }
 0x124   :  { %v782_v49 = vmul.f32 %v5474_v60, %v575_v54 }
 0x126   :  { %5078 = vset.pattern.permute.xlu1 %v7731_v25  ;;  %v846_v44 = vadd.f32 %v782_v49, %v458_v1  ;;  %v5788_v41 = vpop.permute.xlu0 %654  ;;  %v1986_v1 = vld [vmem:[%s7694_s5 + $0x88] sm:$0xff] }
 0x127   :  { %279 = vperm.xlu1 %5078, %v5766_v30   ;;  %v1990_v49 = vld [vmem:[%s7694_s5 + $0xa8] sm:$0xff]  ;;  %409 = vperm.xlu0 %5115, %v5855_v53  }
 0x128   :  { %v215_v35 = vpop.permute.xlu1 %214  ;;  %v1234_v55 = vadd.f32 %v1170_v5, %v846_v44  ;;  %v4870_v31 = vcombine.high %v1986_v1, %v1990_v49  ;;  %v4869_v36 = vcombine.low %v1986_v1, %v1990_v49 }
 0x129   :  { %v460_v0 = vmul.f32 %v5486_v63, %v215_v35 }
 0x12a   :  { %v1305_v33 = vadd.f32 %v5506_v18, %v1234_v55  ;;  %v5807_v16 = vpop.permute.xlu0 %658  ;;  %v1998_v55 = vld [vmem:[%s7694_s5 + $0xe8] sm:$0xff] }
 0x12b   :  { %5079 = vset.pattern.permute.xlu1 %v7732_v61 }
 0x12c   :  { %634 = vperm.xlu1 %5079, %v5766_v30   ;;  %v1369_v3 = vmax.f32 %v1305_v33, 0.0  ;;  %v2002_v33 = vld [vmem:[%s7694_s5 + $0x108] sm:$0xff] }
 0x12d   :  { %v583_v2 = vpop.permute.xlu1 %582 }
 0x12e   :  { %v784_v57 = vmul.f32 %v5474_v60, %v583_v2  ;;  %v5834_v44 = vpop.permute.xlu0 %674 }
 0x130   :  { %638 = vperm.xlu1 %5079, %v5349_v23   ;;  %v1970_v23 = vld [vmem:[%s7694_s5 + $0x8] sm:$0xff]  ;;  %v848_v47 = vadd.f32 %v784_v57, %v460_v0 }
 0x131   :  { %v4853_v28 = vcombine.low %v1970_v23, %v1974_v37  ;;  %v4854_v9 = vcombine.high %v1970_v23, %v1974_v37  ;;  %v2014_v57 = vld [vmem:[%s7694_s5 + $0x168] sm:$0xff] }
 0x132   :  { %v959_v46 = vpop.permute.xlu1 %958  ;;  %v5849_v23 = vpop.permute.xlu0 %686 }
 0x133   :  { %v1169_v27 = vmul.f32 %v5482_v62, %v959_v46  ;;  %2748 = vmatprep.subr.bf16.mxu0 %v4854_v9  ;;  %v5869_v9 = vld [vmem:[%s7689_s0 + $0x1e0] sm:$0xff] }
 0x134   :  { %5081 = vset.pattern.permute.xlu1 %v7731_v25  ;;  %2749 = vmatpush1.bf16.msra.mxu0 %v4853_v28 }
 0x135   :  { %v1233_v19 = vadd.f32 %v1169_v27, %v845_v10  ;;  %294 = vperm.xlu1 %5081, %v5793_v58   ;;  %2750 = vmatprep.subr.bf16.mxu0 %v4862_v13  ;;  %v4878_v27 = vcombine.high %v1994_v21, %v1998_v55 }
 0x136   :  { %v967_v51 = vpop.permute.xlu1 %966  ;;  %419 = vperm.xlu0 %5115, %v5869_v9  }
 0x137   :  { %v1304_v42 = vadd.f32 %v5506_v18, %v1233_v19  ;;  %v1171_v59 = vmul.f32 %v5482_v62, %v967_v51  ;;  %v2006_v19 = vld [vmem:[%s7694_s5 + $0x128] sm:$0xff] }
 0x138   :  { %2751 = vmatpush1.bf16.msra.mxu0 %v4861_v39  ;;  %v4885_v28 = vcombine.low %v2002_v33, %v2006_v19  ;;  %v2010_v51 = vld [vmem:[%s7694_s5 + $0x148] sm:$0xff] }
 0x139   :  { %v1368_v8 = vmax.f32 %v1304_v42, 0.0  ;;  %v1235_v20 = vadd.f32 %v1171_v59, %v847_v6  ;;  %5082 = vset.pattern.permute.xlu1 %v7732_v61  ;;  %2752 = vmatprep.subr.bf16.mxu0 %v4870_v31  ;;  %v4877_v6 = vcombine.low %v1994_v21, %v1998_v55  ;;  %v5878_v42 = vpop.permute.xlu0 %690  ;;  %v4894_v59 = vcombine.high %v2010_v51, %v2014_v57 }
 0x13a   :  { %646 = vperm.xlu1 %5082, %v5793_v58   ;;  %v971_v29 = vpop.permute.xlu1 %970  ;;  %v4893_v0 = vcombine.low %v2010_v51, %v2014_v57  ;;  %5116 = vset.pattern.permute.xlu0 %v7732_v61 }
 0x13b   :  { %v1172_v54 = vmul.f32 %v5482_v62, %v971_v29  ;;  %v1424_v35 = vpack.c.bf16 %v1369_v3, %v1368_v8  ;;  %v1306_v5 = vadd.f32 %v5506_v18, %v1235_v20  ;;  %706 = vperm.xlu0 %5116, %v5813_v56   ;;  %v4902_v8 = vcombine.high %v2018_v48, %v2022_v45 }
 0x13c   :  { %2753 = vmatpush1.bf16.msra.mxu0 %v4869_v36  ;;  %v461_v20 = vmul.f32 %v5486_v63, %v5568_v11  ;;  %v4901_v29 = vcombine.low %v2018_v48, %v2022_v45  ;;  %v786_v36 = vmul.f32 %v5474_v60, %v5732_v15  ;;  %v787_v15 = vmul.f32 %v5474_v60, %v5744_v26 }
 0x13d   :  { %v1236_v2 = vadd.f32 %v1172_v54, %v848_v47  ;;  %4975 = vmatprep.mubr.msk.bf16.mxu0 %vm1487_vm0, %v1424_v35  ;;  %v1370_v46 = vmax.f32 %v1306_v5, 0.0  ;;  %2754 = vmatprep.subr.bf16.mxu0 %v4878_v27  ;;  %v975_v39 = vpop.permute.xlu0 %974  ;;  %v2026_v47 = vld [vmem:[%s7694_s5 + $0x1c8] sm:$0xff] }
 0x13e   :  { %5083 = vset.pattern.permute.xlu1 %v7733_v50  ;;  %v2030_v54 = vld [vmem:[%s7694_s5 + $0x1e8] sm:$0xff]  ;;  %v1173_v1 = vmul.f32 %v5482_v62, %v975_v39 }
 0x13f   :  { %v1307_v40 = vadd.f32 %v5506_v18, %v1236_v2  ;;  %1022 = vperm.xlu1 %5083, %v5766_v30   ;;  %v5840_v17 = vpop.permute.xlu1 %224  ;;  %v4910_v35 = vcombine.high %v2026_v47, %v2030_v54  ;;  %v4909_v5 = vcombine.low %v2026_v47, %v2030_v54 }
 0x140   :  { %2755 = vmatpush1.bf16.msra.mxu0 %v4877_v6  ;;  %v5914_v6 = vld [vmem:[%s7689_s0 + $0x1a8] sm:$0xff] }
 0x141   :  { %v1371_v10 = vmax.f32 %v1307_v40, 0.0  ;;  %v987_v31 = vpop.permute.xlu0 %986  ;;  %v462_v40 = vmul.f32 %v5486_v63, %v5840_v17  ;;  %718 = vperm.xlu0 %5116, %v5914_v6  }
 0x143   :  { %1030 = vperm.xlu1 %5083, %v5355_v24   ;;  %v1425_v30 = vpack.c.bf16 %v1371_v10, %v1370_v46  ;;  %v4886_v24 = vcombine.high %v2002_v33, %v2006_v19  ;;  %v1176_v46 = vmul.f32 %v5482_v62, %v987_v31  ;;  %v7734_v10 = vld [vmem:[#allocation8_spill] sm:$0xff]  ;;  %v850_v17 = vadd.f32 %v786_v36, %v462_v40 }
 0x144   :  { %v587_v37 = vpop.permute.xlu1 %586 }
 0x145   :  { %4976 = vmatmul.mubr.msk.bf16.gmra.mrb[16].mxu0 %vm1487_vm0, %v1425_v30  ;;  %2756 = vmatprep.subr.bf16.mxu0 %v4886_v24  ;;  %v785_v13 = vmul.f32 %v5474_v60, %v587_v37 }
 0x146   :  { %2757 = vmatpush1.bf16.msra.mxu0 %v4885_v28  ;;  %v7735_v28 = vld [vmem:[#allocation11_spill] sm:$0xff] }
 0x147   :  { %1034 = vperm.xlu1 %5083, %v5793_v58   ;;  %2758 = vmatprep.subr.bf16.mxu0 %v4894_v59  ;;  %v849_v11 = vadd.f32 %v785_v13, %v461_v20  ;;  %v5932_v13 = vld [vmem:[%s7689_s0 + $0x1b0] sm:$0xff] }
 0x148   :  { %722 = vperm.xlu0 %5116, %v5932_v13  }
 0x149   :  { %v230_v58 = vpop.permute.xlu1 %229 }
 0x14a   :  { %2759 = vmatpush1.bf16.msra.mxu0 %v4893_v0  ;;  %v463_v30 = vmul.f32 %v5486_v63, %v230_v58 }
 0x14b   :  { %5084 = vset.pattern.permute.xlu1 %v7731_v25  ;;  %2760 = vmatprep.subr.bf16.mxu0 %v4902_v8 }
 0x14c   :  { %304 = vperm.xlu1 %5084, %v5432_v43   ;;  %v851_v57 = vadd.f32 %v787_v15, %v463_v30  ;;  %738 = vperm.xlu0 %5116, %v5855_v53  }
 0x14d   :  { %v235_v3 = vpop.permute.xlu1 %234 }
 0x14e   :  { %2761 = vmatpush1.bf16.msra.mxu0 %v4901_v29  ;;  %v464_v21 = vmul.f32 %v5486_v63, %v235_v3 }
 0x14f   :  { %2762 = vmatprep.subr.bf16.mxu0 %v4910_v35 }
 0x150   :  { %5085 = vset.pattern.permute.xlu1 %v7732_v61 }
 0x151   :  { %650 = vperm.xlu1 %5085, %v5554_v4   ;;  %v1237_v4 = vadd.f32 %v1173_v1, %v849_v11  ;;  %v92_v11 = vld [vmem:[%s7689_s0 + $0x140] sm:$0xff] }
 0x152   :  { %v599_v49 = vpop.permute.xlu1 %598  ;;  %2763 = vmatpush1.bf16.msra.mxu0 %v4909_v5 }
 0x153   :  { %v788_v2 = vmul.f32 %v5474_v60, %v599_v49  ;;  %v1308_v33 = vadd.f32 %v5506_v18, %v1237_v4  ;;  %v7736_v49 = vld [vmem:[#allocation12_spill] sm:$0xff]  ;;  %v7737_v4 = vld [vmem:[#allocation13_spill] sm:$0xff] }
 0x155   :  { %5086 = vset.pattern.permute.xlu1 %v7731_v25  ;;  %v852_v55 = vadd.f32 %v788_v2, %v464_v21  ;;  %v1372_v26 = vmax.f32 %v1308_v33, 0.0  ;;  %v995_v2 = vpop.permute.xlu0 %994 }
 0x156   :  { %309 = vperm.xlu1 %5086, %v7734_v10   ;;  %v1178_v36 = vmul.f32 %v5482_v62, %v995_v2 }
 0x157   :  { %v979_v27 = vpop.permute.xlu1 %978  ;;  %v1240_v19 = vadd.f32 %v1176_v46, %v852_v55  ;;  %v467_v55 = vmul.f32 %v5486_v63, %v7737_v4  ;;  %v791_v46 = vmul.f32 %v5474_v60, %v5753_v22 }
 0x158   :  { %v1174_v37 = vmul.f32 %v5482_v62, %v979_v27 }
 0x159   :  { %v1311_v48 = vadd.f32 %v5506_v18, %v1240_v19 }
 0x15a   :  { %v1238_v24 = vadd.f32 %v1174_v37, %v850_v17  ;;  %314 = vperm.xlu1 %5086, %v7735_v28   ;;  %v95_v17 = vld [vmem:[%s7689_s0 + $0x158] sm:$0xff] }
 0x15b   :  { %v983_v51 = vpop.permute.xlu1 %982  ;;  %v1375_v29 = vmax.f32 %v1311_v48, 0.0 }
 0x15c   :  { %v1309_v59 = vadd.f32 %v5506_v18, %v1238_v24  ;;  %v1175_v0 = vmul.f32 %v5482_v62, %v983_v51 }
 0x15e   :  { %v1373_v58 = vmax.f32 %v1309_v59, 0.0  ;;  %v1239_v45 = vadd.f32 %v1175_v0, %v851_v57  ;;  %5087 = vset.pattern.permute.xlu1 %v7732_v61 }
 0x15f   :  { %662 = vperm.xlu1 %5087, %v7735_v28  }
 0x160   :  { %v1310_v3 = vadd.f32 %v5506_v18, %v1239_v45  ;;  %v240_v8 = vpop.permute.xlu1 %239  ;;  %v1426_v20 = vpack.c.bf16 %v1373_v58, %v1372_v26 }
 0x162   :  { %v1374_v39 = vmax.f32 %v1310_v3, 0.0  ;;  %4979 = vmatprep.mubr.msk.bf16.mxu0 %vm1487_vm0, %v1426_v20 }
 0x163   :  { %5088 = vset.pattern.permute.xlu1 %v7733_v50 }
 0x164   :  { %1042 = vperm.xlu1 %5088, %v5432_v43   ;;  %v1427_v47 = vpack.c.bf16 %v1375_v29, %v1374_v39  ;;  %v466_v43 = vmul.f32 %v5486_v63, %v7736_v49 }
 0x165   :  { %v603_v54 = vpop.permute.xlu1 %602 }
 0x166   :  { %4980 = vmatmul.mubr.msk.bf16.gmra.mrb[20].mxu0 %vm1487_vm0, %v1427_v47  ;;  %v789_v21 = vmul.f32 %v5474_v60, %v603_v54 }
 0x168   :  { %1046 = vperm.xlu1 %5088, %v7734_v10   ;;  %v465_v10 = vmul.f32 %v5486_v63, %v240_v8 }
 0x169   :  { %v607_v35 = vpop.permute.xlu1 %606 }
 0x16a   :  { %v790_v5 = vmul.f32 %v5474_v60, %v607_v35  ;;  %v853_v30 = vadd.f32 %v789_v21, %v465_v10  ;;  %v794_v10 = vmul.f32 %v5474_v60, %v5759_v7  ;;  %v6002_v7 = vld [vmem:[%s7689_s0 + $0x1f0] sm:$0xff] }
 0x16c   :  { %5089 = vset.pattern.permute.xlu1 %v7731_v25  ;;  %v854_v31 = vadd.f32 %v790_v5, %v466_v43  ;;  %v7738_v43 = vld [vmem:[#allocation10_spill] sm:$0xff]  ;;  %v1007_v5 = vpop.permute.xlu0 %1006 }
 0x16d   :  { %319 = vperm.xlu1 %5089, %v92_v11   ;;  %v1181_v21 = vmul.f32 %v5482_v62, %v1007_v5 }
 0x16e   :  { %v255_v1 = vpop.permute.xlu1 %254  ;;  %v1242_v27 = vadd.f32 %v1178_v36, %v854_v31  ;;  %v7739_v31 = vld [vmem:[#allocation15_spill] sm:$0xff] }
 0x16f   :  { %v468_v59 = vmul.f32 %v5486_v63, %v255_v1 }
 0x170   :  { %v1313_v33 = vadd.f32 %v5506_v18, %v1242_v27 }
 0x171   :  { %5090 = vset.pattern.permute.xlu1 %v7732_v61 }
 0x172   :  { %666 = vperm.xlu1 %5090, %v92_v11   ;;  %v1377_v57 = vmax.f32 %v1313_v33, 0.0 }
 0x173   :  { %v615_v40 = vpop.permute.xlu1 %614 }
 0x174   :  { %v792_v22 = vmul.f32 %v5474_v60, %v615_v40 }
 0x176   :  { %670 = vperm.xlu1 %5090, %v5573_v12   ;;  %v855_v12 = vadd.f32 %v791_v46, %v467_v55  ;;  %v856_v58 = vadd.f32 %v792_v22, %v468_v59  ;;  %v5986_v55 = vld [vmem:[%s7689_s0 + $0x1e8] sm:$0xff] }
 0x177   :  { %750 = vperm.xlu0 %5116, %v5986_v55  }
 0x178   :  { %v991_v15 = vpop.permute.xlu1 %990 }
 0x179   :  { %v1177_v37 = vmul.f32 %v5482_v62, %v991_v15 }
 0x17a   :  { %5091 = vset.pattern.permute.xlu1 %v7731_v25 }
 0x17b   :  { %v1241_v19 = vadd.f32 %v1177_v37, %v853_v30  ;;  %334 = vperm.xlu1 %5091, %v95_v17   ;;  %754 = vperm.xlu0 %5116, %v6002_v7  }
 0x17c   :  { %v999_v24 = vpop.permute.xlu1 %998 }
 0x17d   :  { %v1312_v28 = vadd.f32 %v5506_v18, %v1241_v19  ;;  %v1179_v51 = vmul.f32 %v5482_v62, %v999_v24  ;;  %v795_v19 = vmul.f32 %v5474_v60, %v5768_v34  ;;  %v6017_v34 = vld [vmem:[%s7691_s2] ss:$0 sm:$0xff] }
 0x17f   :  { %v1376_v0 = vmax.f32 %v1312_v28, 0.0  ;;  %v1243_v26 = vadd.f32 %v1179_v51, %v855_v12  ;;  %5092 = vset.pattern.permute.xlu1 %v7732_v61  ;;  %v5127_v12 = vld [vmem:[%s7689_s0 + $0x170] sm:$0xff]  ;;  %5121 = vset.pattern.permute.xlu0 %v7733_v50 }
 0x180   :  { %678 = vperm.xlu1 %5092, %v95_v17   ;;  %v1003_v48 = vpop.permute.xlu1 %1002  ;;  %1134 = vperm.xlu0 %5121, %v5869_v9  }
 0x181   :  { %v1180_v45 = vmul.f32 %v5482_v62, %v1003_v48  ;;  %v1428_v3 = vpack.c.bf16 %v1377_v57, %v1376_v0  ;;  %v1314_v8 = vadd.f32 %v5506_v18, %v1243_v26  ;;  %v7740_v0 = vld [vmem:[#allocation14_spill] sm:$0xff] }
 0x183   :  { %v1244_v20 = vadd.f32 %v1180_v45, %v856_v58  ;;  %4983 = vmatprep.mubr.msk.bf16.mxu0 %vm1487_vm0, %v1428_v3  ;;  %v1378_v47 = vmax.f32 %v1314_v8, 0.0 }
 0x184   :  { %5093 = vset.pattern.permute.xlu1 %v7733_v50 }
 0x185   :  { %v1315_v29 = vadd.f32 %v5506_v18, %v1244_v20  ;;  %1054 = vperm.xlu1 %5093, %v92_v11   ;;  %v265_v39 = vpop.permute.xlu1 %264  ;;  %v469_v11 = vmul.f32 %v5486_v63, %v7739_v31  ;;  %v6036_v31 = vld [vmem:[%s7689_s0 + $0x1f8] sm:$0xff] }
 0x186   :  { %v470_v27 = vmul.f32 %v5486_v63, %v265_v39  ;;  %1146 = vperm.xlu0 %5121, %v6036_v31  }
 0x187   :  { %v1379_v54 = vmax.f32 %v1315_v29, 0.0 }
 0x188   :  { %v858_v24 = vadd.f32 %v794_v10, %v470_v27 }
 0x189   :  { %1062 = vperm.xlu1 %5093, %v5456_v52   ;;  %v1429_v35 = vpack.c.bf16 %v1379_v54, %v1378_v47  ;;  %v1019_v52 = vpop.permute.xlu0 %1018 }
 0x18a   :  { %v619_v1 = vpop.permute.xlu1 %618  ;;  %v1184_v37 = vmul.f32 %v5482_v62, %v1019_v52  ;;  %v100_v52 = vld [vmem:[%s7689_s0 + $0x180] sm:$0xff] }
 0x18b   :  { %4984 = vmatmul.mubr.msk.bf16.gmra.mrb[24].mxu0 %vm1487_vm0, %v1429_v35  ;;  %v793_v36 = vmul.f32 %v5474_v60, %v619_v1 }
 0x18d   :  { %1066 = vperm.xlu1 %5093, %v95_v17   ;;  %v857_v40 = vadd.f32 %v793_v36, %v469_v11  ;;  %v1027_v15 = vpop.permute.xlu0 %1026 }
 0x18e   :  { %v1186_v27 = vmul.f32 %v5482_v62, %v1027_v15  ;;  %v799_v15 = vmul.f32 %v5474_v60, %v5776_v38 }
 0x18f   :  { %v270_v49 = vpop.permute.xlu1 %269  ;;  %v1245_v17 = vadd.f32 %v1181_v21, %v857_v40 }
 0x190   :  { %v471_v22 = vmul.f32 %v5486_v63, %v270_v49 }
 0x191   :  { %5094 = vset.pattern.permute.xlu1 %v7731_v25  ;;  %v1316_v51 = vadd.f32 %v5506_v18, %v1245_v17  ;;  %v6011_v48 = vpop.permute.xlu0 %1038 }
 0x192   :  { %344 = vperm.xlu1 %5094, %v7738_v43   ;;  %v859_v58 = vadd.f32 %v795_v19, %v471_v22  ;;  %v5129_v43 = vld [vmem:[%s7689_s0 + $0x168] sm:$0xff] }
 0x193   :  { %v275_v2 = vpop.permute.xlu1 %274  ;;  %v1380_v18 = vmax.f32 %v1316_v51, 0.0  ;;  %v7742_v22 = vld [vmem:[#allocation17_spill] sm:$0xff] }
 0x195   :  { %v6026_v35 = vpop.permute.xlu0 %1050 }
 0x196   :  { %5095 = vset.pattern.permute.xlu1 %v7732_v61 }
 0x197   :  { %682 = vperm.xlu1 %5095, %v5583_v14   ;;  %v472_v14 = vmul.f32 %v5486_v63, %v275_v2 }
 0x198   :  { %v631_v4 = vpop.permute.xlu1 %630 }
 0x199   :  { %v796_v46 = vmul.f32 %v5474_v60, %v631_v4  ;;  %v6040_v11 = vpop.permute.xlu0 %1058 }
 0x19b   :  { %5096 = vset.pattern.permute.xlu1 %v7731_v25  ;;  %v860_v30 = vadd.f32 %v796_v46, %v472_v14  ;;  %v7741_v46 = vld [vmem:[#allocation16_spill] sm:$0xff] }
 0x19c   :  { %349 = vperm.xlu1 %5096, %v5127_v12   ;;  %v474_v10 = vmul.f32 %v5486_v63, %v7741_v46 }
 0x19d   :  { %v1011_v33 = vpop.permute.xlu1 %1010  ;;  %v1248_v57 = vadd.f32 %v1184_v37, %v860_v30  ;;  %v6047_v40 = vpop.permute.xlu0 %1070 }
 0x19e   :  { %v1182_v28 = vmul.f32 %v5482_v62, %v1011_v33 }
 0x19f   :  { %v1319_v8 = vadd.f32 %v6017_v34, %v1248_v57 }
 0x1a0   :  { %v1246_v59 = vadd.f32 %v1182_v28, %v858_v24  ;;  %354 = vperm.xlu1 %5096, %v7740_v0   ;;  %v103_v24 = vld [vmem:[%s7689_s0 + $0x198] sm:$0xff]  ;;  %v475_v28 = vmul.f32 %v5486_v63, %v7742_v22 }
 0x1a1   :  { %v1015_v26 = vpop.permute.xlu1 %1014  ;;  %v1383_v1 = vmax.f32 %v1319_v8, 0.0  ;;  %v6054_v30 = vpop.permute.xlu0 %1082 }
 0x1a2   :  { %v1317_v45 = vadd.f32 %v6017_v34, %v1246_v59  ;;  %v1183_v3 = vmul.f32 %v5482_v62, %v1015_v26 }
 0x1a4   :  { %v1381_v20 = vmax.f32 %v1317_v45, 0.0  ;;  %v1247_v29 = vadd.f32 %v1183_v3, %v859_v58  ;;  %5098 = vset.pattern.permute.xlu1 %v7732_v61  ;;  %v863_v58 = vadd.f32 %v799_v15, %v475_v28 }
 0x1a5   :  { %694 = vperm.xlu1 %5098, %v7740_v0   ;;  %v6067_v59 = vpop.permute.xlu0 %1090 }
 0x1a6   :  { %v1318_v39 = vadd.f32 %v6017_v34, %v1247_v29  ;;  %v280_v47 = vpop.permute.xlu1 %279  ;;  %v1430_v54 = vpack.c.bf16 %v1381_v20, %v1380_v18 }
 0x1a8   :  { %v1382_v49 = vmax.f32 %v1318_v39, 0.0  ;;  %4987 = vmatprep.mubr.msk.bf16.mxu0 %vm1487_vm0, %v1430_v54 }
 0x1a9   :  { %5099 = vset.pattern.permute.xlu1 %v7733_v50  ;;  %v6075_v20 = vpop.permute.xlu0 %1102 }
 0x1aa   :  { %1074 = vperm.xlu1 %5099, %v5129_v43   ;;  %v1431_v5 = vpack.c.bf16 %v1383_v1, %v1382_v49 }
 0x1ab   :  { %v635_v2 = vpop.permute.xlu1 %634 }
 0x1ac   :  { %4988 = vmatmul.mubr.msk.bf16.gmra.mrb[28].mxu0 %vm1487_vm0, %v1431_v5  ;;  %v797_v37 = vmul.f32 %v5474_v60, %v635_v2 }
 0x1ad   :  { %2780 = vmatprep.mubr.bf16.mxu0 %v7731_v25 }
 0x1ae   :  { %1078 = vperm.xlu1 %5099, %v5127_v12   ;;  %v473_v12 = vmul.f32 %v5486_v63, %v280_v47 }
 0x1af   :  { %v639_v36 = vpop.permute.xlu1 %638 }
 0x1b0   :  { %v798_v4 = vmul.f32 %v5474_v60, %v639_v36  ;;  %v861_v51 = vadd.f32 %v797_v37, %v473_v12  ;;  %v6083_v36 = vpop.permute.xlu0 %1114 }
 0x1b2   :  { %5100 = vset.pattern.permute.xlu1 %v7731_v25  ;;  %v862_v14 = vadd.f32 %v798_v4, %v474_v10  ;;  %v6088_v4 = vld [vmem:[%s7693_s4] ss:$0 sm:$0xff] }
 0x1b3   :  { %359 = vperm.xlu1 %5100, %v100_v52  }
 0x1b4   :  { %v295_v21 = vpop.permute.xlu1 %294  ;;  %v1250_v33 = vadd.f32 %v1186_v27, %v862_v14  ;;  %v6094_v28 = vpop.permute.xlu0 %1122 }
 0x1b5   :  { %v476_v38 = vmul.f32 %v5486_v63, %v295_v21 }
 0x1b6   :  { %v1321_v0 = vadd.f32 %v6017_v34, %v1250_v33 }
 0x1b7   :  { %5101 = vset.pattern.permute.xlu1 %v7732_v61 }
 0x1b8   :  { %698 = vperm.xlu1 %5101, %v100_v52   ;;  %v1385_v39 = vmax.f32 %v1321_v0, 0.0 }
 0x1b9   :  { %v647_v17 = vpop.permute.xlu1 %646 }
 0x1ba   :  { %v800_v45 = vmul.f32 %v5474_v60, %v647_v17 }
 0x1bc   :  { %702 = vperm.xlu1 %5101, %v5606_v32   ;;  %v864_v54 = vadd.f32 %v800_v45, %v476_v38  ;;  %v300_v38 = vpop.permute.xlu0 %299 }
 0x1be   :  { %v1023_v19 = vpop.permute.xlu1 %1022 }
 0x1bf   :  { %v1185_v57 = vmul.f32 %v5482_v62, %v1023_v19 }
 0x1c0   :  { %5102 = vset.pattern.permute.xlu1 %v7731_v25 }
 0x1c1   :  { %v1249_v32 = vadd.f32 %v1185_v57, %v861_v51  ;;  %374 = vperm.xlu1 %5102, %v103_v24  }
 0x1c2   :  { %v1031_v26 = vpop.permute.xlu1 %1030 }
 0x1c3   :  { %v1187_v3 = vmul.f32 %v5482_v62, %v1031_v26  ;;  %v1320_v18 = vadd.f32 %v6017_v34, %v1249_v32 }
 0x1c5   :  { %v1251_v8 = vadd.f32 %v1187_v3, %v863_v58  ;;  %5103 = vset.pattern.permute.xlu1 %v7732_v61  ;;  %v1384_v29 = vmax.f32 %v1320_v18, 0.0 }
 0x1c6   :  { %710 = vperm.xlu1 %5103, %v103_v24   ;;  %v1035_v47 = vpop.permute.xlu1 %1034 }
 0x1c7   :  { %v1188_v1 = vmul.f32 %v5482_v62, %v1035_v47  ;;  %v1432_v49 = vpack.c.bf16 %v1385_v39, %v1384_v29  ;;  %v1322_v43 = vadd.f32 %v6017_v34, %v1251_v8 }
 0x1c9   :  { %v1252_v5 = vadd.f32 %v1188_v1, %v864_v54  ;;  %4991 = vmatprep.mubr.msk.bf16.mxu1 %vm1487_vm0, %v1432_v49  ;;  %v1386_v46 = vmax.f32 %v1322_v43, 0.0  ;;  %v477_v1 = vmul.f32 %v5486_v63, %v300_v38 }
 0x1ca   :  { %5104 = vset.pattern.permute.xlu1 %v7733_v50 }
 0x1cb   :  { %v1323_v2 = vadd.f32 %v6017_v34, %v1252_v5  ;;  %1086 = vperm.xlu1 %5104, %v100_v52   ;;  %v305_v21 = vpop.permute.xlu1 %304 }
 0x1cd   :  { %v1387_v10 = vmax.f32 %v1323_v2, 0.0  ;;  %v4961_v27 = vpop.f32.mrb[0].mxu0 }
 0x1ce   :  { %v1627_v14 = vadd.f32 %v4961_v27, %v6088_v4  ;;  %v1618_v17 = vpop.f32.mrb[1].mxu0 }
 0x1cf   :  { %v1619_v37 = vadd.f32 %v6088_v4, %v1618_v17  ;;  %v4962_v12 = vpop.f32.mrb[2].mxu0  ;;  %1094 = vperm.xlu1 %5104, %v5813_v56   ;;  %v1433_v33 = vpack.c.bf16 %v1387_v10, %v1386_v46  ;;  %v5130_v17 = vld [vmem:[%s7689_s0 + $0x1a0] sm:$0xff] }
 0x1d0   :  { %v1630_v52 = vadd.f32 %v4962_v12, %v6088_v4  ;;  %v1621_v19 = vpop.f32.mrb[3].mxu0  ;;  %v651_v22 = vpop.permute.xlu1 %650  ;;  %v1875_v51 = vmax.f32 %v1627_v14, 0.0 }
 0x1d1   :  { %v1622_v15 = vadd.f32 %v6088_v4, %v1621_v19  ;;  %4992 = vmatmul.mubr.msk.bf16.vlgmr.msra.gmra.mrb[0].mxu1 %vm1487_vm0, %v1433_v33  ;;  %v1873_v32 = vmax.f32 %v1619_v37, 0.0  ;;  %v801_v49 = vmul.f32 %v5474_v60, %v651_v22  ;;  %v1189_v37 = vmul.f32 %v5482_v62, %v6011_v48 }
 0x1d2   :  { %v1876_v57 = vmax.f32 %v1630_v52, 0.0 }
 0x1d3   :  { %v1874_v0 = vmax.f32 %v1622_v15, 0.0  ;;  %1098 = vperm.xlu1 %5104, %v103_v24   ;;  %v865_v12 = vadd.f32 %v801_v49, %v477_v1 }
 0x1d4   :  { %v6098_v26 = vpack.c.bf16 %v1876_v57, %v1875_v51  ;;  %v802_v57 = vmul.f32 %v5474_v60, %v5788_v41 }
 0x1d5   :  { %v6100_v58 = vpack.c.bf16 %v1874_v0, %v1873_v32  ;;  %v4965_v56 = vpop.f32.mrb[4].mxu0  ;;  %v310_v45 = vpop.permute.xlu1 %309  ;;  %v478_v32 = vmul.f32 %v5486_v63, %v305_v21  ;;  %v1253_v38 = vadd.f32 %v1189_v37, %v865_v12  ;;  %v803_v21 = vmul.f32 %v5474_v60, %v5807_v16  ;;  %v5131_v16 = vld [vmem:[%s7689_s0 + $0x1b8] sm:$0xff] }
 0x1d6   :  { %v1643_v3 = vadd.f32 %v4965_v56, %v6088_v4  ;;  %v1634_v18 = vpop.f32.mrb[5].mxu0  ;;  %v479_v1 = vmul.f32 %v5486_v63, %v310_v45 }
 0x1d7   :  { %v1635_v8 = vadd.f32 %v6088_v4, %v1634_v18  ;;  %v4966_v29 = vpop.f32.mrb[6].mxu0  ;;  %5105 = vset.pattern.permute.xlu1 %v7731_v25  ;;  %2781 = vmatmul.mubr.bf16.vlgmr.msra.gmra.mrb[32].mxu0 %v6100_v58 }
 0x1d8   :  { %v1646_v39 = vadd.f32 %v4966_v29, %v6088_v4  ;;  %v1637_v24 = vpop.f32.mrb[7].mxu0  ;;  %384 = vperm.xlu1 %5105, %v5914_v6   ;;  %2790 = vmatprep.mubr.bf16.mxu0 %v7731_v25  ;;  %v1879_v43 = vmax.f32 %v1643_v3, 0.0  ;;  %v1192_v3 = vmul.f32 %v5482_v62, %v6026_v35 }
 0x1d9   :  { %v1638_v47 = vadd.f32 %v6088_v4, %v1637_v24  ;;  %v315_v54 = vpop.permute.xlu1 %314  ;;  %v1877_v2 = vmax.f32 %v1635_v8, 0.0 }
 0x1da   :  { %v1880_v5 = vmax.f32 %v1646_v39, 0.0  ;;  %v480_v0 = vmul.f32 %v5486_v63, %v315_v54  ;;  %v866_v54 = vadd.f32 %v802_v57, %v478_v32 }
 0x1db   :  { %v1878_v46 = vmax.f32 %v1638_v47, 0.0 }
 0x1dc   :  { %v6112_v10 = vpack.c.bf16 %v1880_v5, %v1879_v43  ;;  %5106 = vset.pattern.permute.xlu1 %v7732_v61  ;;  %v1324_v5 = vadd.f32 %v6017_v34, %v1253_v38 }
 0x1dd   :  { %v6115_v27 = vpack.c.bf16 %v1878_v46, %v1877_v2  ;;  %v4969_v14 = vpop.f32.mrb[8].mxu0  ;;  %714 = vperm.xlu1 %5106, %v5130_v17   ;;  %v867_v17 = vadd.f32 %v803_v21, %v479_v1 }
 0x1de   :  { %v1659_v33 = vadd.f32 %v4969_v14, %v6088_v4  ;;  %v1650_v52 = vpop.f32.mrb[9].mxu0  ;;  %v663_v19 = vpop.permute.xlu1 %662  ;;  %v1388_v12 = vmax.f32 %v1324_v5, 0.0 }
 0x1df   :  { %v1651_v22 = vadd.f32 %v6088_v4, %v1650_v52  ;;  %v804_v15 = vmul.f32 %v5474_v60, %v663_v19  ;;  %v4970_v51 = vpop.f32.mrb[10].mxu0  ;;  %2791 = vmatmul.mubr.bf16.gmra.mrb[36].mxu0 %v6098_v26 }
 0x1e0   :  { %v1662_v48 = vadd.f32 %v4970_v51, %v6088_v4  ;;  %v1653_v56 = vpop.f32.mrb[11].mxu0  ;;  %2800 = vmatprep.mubr.bf16.mxu0 %v7731_v25  ;;  %v1883_v8 = vmax.f32 %v1659_v33, 0.0 }
 0x1e1   :  { %v1654_v18 = vadd.f32 %v6088_v4, %v1653_v56  ;;  %5107 = vset.pattern.permute.xlu1 %v7731_v25  ;;  %v868_v29 = vadd.f32 %v804_v15, %v480_v0  ;;  %v1881_v39 = vmax.f32 %v1651_v22, 0.0 }
 0x1e2   :  { %v1884_v41 = vmax.f32 %v1662_v48, 0.0  ;;  %389 = vperm.xlu1 %5107, %v5932_v13  }
 0x1e3   :  { %v1882_v24 = vmax.f32 %v1654_v18, 0.0  ;;  %v1043_v47 = vpop.permute.xlu1 %1042  ;;  %v1256_v2 = vadd.f32 %v1192_v3, %v868_v29 }
 0x1e4   :  { %v6140_v35 = vpack.c.bf16 %v1884_v41, %v1883_v8  ;;  %v1190_v49 = vmul.f32 %v5482_v62, %v1043_v47 }
 0x1e5   :  { %v6143_v43 = vpack.c.bf16 %v1882_v24, %v1881_v39  ;;  %v1327_v33 = vadd.f32 %v6017_v34, %v1256_v2 }
 0x1e6   :  { %v1254_v46 = vadd.f32 %v1190_v49, %v866_v54  ;;  %394 = vperm.xlu1 %5107, %v5131_v16  }
 0x1e7   :  { %2801 = vmatmul.mubr.bf16.gmra.mrb[40].mxu0 %v6115_v27  ;;  %v1047_v14 = vpop.permute.xlu1 %1046  ;;  %v1391_v57 = vmax.f32 %v1327_v33, 0.0 }
 0x1e8   :  { %v1325_v45 = vadd.f32 %v6017_v34, %v1254_v46  ;;  %v1191_v37 = vmul.f32 %v5482_v62, %v1047_v14  ;;  %2810 = vmatprep.mubr.bf16.mxu0 %v7731_v25  ;;  %v1194_v14 = vmul.f32 %v5482_v62, %v6040_v11 }
 0x1ea   :  { %v1389_v52 = vmax.f32 %v1325_v45, 0.0  ;;  %v1255_v19 = vadd.f32 %v1191_v37, %v867_v17  ;;  %5108 = vset.pattern.permute.xlu1 %v7732_v61 }
 0x1eb   :  { %726 = vperm.xlu1 %5108, %v5131_v16  }
 0x1ec   :  { %v1434_v22 = vpack.c.bf16 %v1389_v52, %v1388_v12  ;;  %v1326_v15 = vadd.f32 %v6017_v34, %v1255_v19  ;;  %v320_v51 = vpop.permute.xlu1 %319  ;;  %v5132_v52 = vld [vmem:[%s7689_s0 + $0x1c8] sm:$0xff] }
 0x1ed   :  { %v481_v19 = vmul.f32 %v5486_v63, %v320_v51 }
 0x1ee   :  { %v1390_v32 = vmax.f32 %v1326_v15, 0.0  ;;  %4995 = vmatprep.mubr.msk.bf16.mxu1 %vm1487_vm0, %v1434_v22  ;;  %v111_v22 = vld [vmem:[%s7689_s0 + $0x1d8] sm:$0xff]  ;;  %v807_v15 = vmul.f32 %v5474_v60, %v5834_v44 }
 0x1ef   :  { %5109 = vset.pattern.permute.xlu1 %v7733_v50  ;;  %2811 = vmatmul.mubr.bf16.gmra.mrb[44].mxu0 %v6112_v10 }
 0x1f0   :  { %v1435_v0 = vpack.c.bf16 %v1391_v57, %v1390_v32  ;;  %1106 = vperm.xlu1 %5109, %v5914_v6   ;;  %2820 = vmatprep.mubr.bf16.mxu0 %v7731_v25  ;;  %v6169_v6 = vld [vmem:[%s7689_s0 + $0x1c0] sm:$0xff] }
 0x1f1   :  { %v667_v48 = vpop.permute.xlu1 %666 }
 0x1f2   :  { %4996 = vmatmul.mubr.msk.bf16.gmra.mrb[4].mxu1 %vm1487_vm0, %v1435_v0  ;;  %v805_v37 = vmul.f32 %v5474_v60, %v667_v48 }
 0x1f3   :  { %v4973_v56 = vpop.f32.mrb[12].mxu0 }
 0x1f4   :  { %v1675_v3 = vadd.f32 %v4973_v56, %v6088_v4  ;;  %v1666_v18 = vpop.f32.mrb[13].mxu0  ;;  %1110 = vperm.xlu1 %5109, %v5932_v13   ;;  %v325_v13 = vpop.permute.xlu0 %324  ;;  %v869_v32 = vadd.f32 %v805_v37, %v481_v19 }
 0x1f5   :  { %v1667_v38 = vadd.f32 %v6088_v4, %v1666_v18  ;;  %v4974_v8 = vpop.f32.mrb[14].mxu0  ;;  %v671_v29 = vpop.permute.xlu1 %670  ;;  %v482_v49 = vmul.f32 %v5486_v63, %v325_v13 }
 0x1f6   :  { %v1678_v41 = vadd.f32 %v4974_v8, %v6088_v4  ;;  %v1669_v21 = vpop.f32.mrb[15].mxu0  ;;  %v1887_v24 = vmax.f32 %v1675_v3, 0.0  ;;  %v806_v2 = vmul.f32 %v5474_v60, %v671_v29 }
 0x1f7   :  { %v1670_v39 = vadd.f32 %v6088_v4, %v1669_v21  ;;  %2821 = vmatmul.mubr.bf16.gmra.mrb[48].mxu0 %v6143_v43  ;;  %v1885_v54 = vmax.f32 %v1667_v38, 0.0  ;;  %v1973_v21 = vld [vmem:[%s7694_s5 + $0x20] sm:$0xff] }
 0x1f8   :  { %v1888_v47 = vmax.f32 %v1678_v41, 0.0  ;;  %5110 = vset.pattern.permute.xlu1 %v7731_v25  ;;  %2830 = vmatprep.mubr.bf16.mxu0 %v7731_v25  ;;  %v870_v17 = vadd.f32 %v806_v2, %v482_v49  ;;  %v330_v12 = vpop.permute.xlu0 %329  ;;  %v1969_v41 = vld [vmem:[%s7694_s5] sm:$0xff] }
 0x1f9   :  { %v1886_v1 = vmax.f32 %v1670_v39, 0.0  ;;  %399 = vperm.xlu1 %5110, %v6169_v6   ;;  %v483_v57 = vmul.f32 %v5486_v63, %v330_v12  ;;  %v4852_v13 = vcombine.high %v1969_v41, %v1973_v21 }
 0x1fa   :  { %v6177_v5 = vpack.c.bf16 %v1888_v47, %v1887_v24  ;;  %v335_v46 = vpop.permute.xlu1 %334  ;;  %v1258_v33 = vadd.f32 %v1194_v14, %v870_v17  ;;  %v4851_v47 = vcombine.low %v1969_v41, %v1973_v21 }
 0x1fb   :  { %v6180_v16 = vpack.c.bf16 %v1886_v1, %v1885_v54  ;;  %v871_v3 = vadd.f32 %v807_v15, %v483_v57  ;;  %v484_v29 = vmul.f32 %v5486_v63, %v335_v46  ;;  %2395 = vmatprep.subr.bf16.mxu1 %v4852_v13  ;;  %v1977_v57 = vld [vmem:[%s7694_s5 + $0x40] sm:$0xff] }
 0x1fc   :  { %v1329_v48 = vadd.f32 %v6017_v34, %v1258_v33  ;;  %2396 = vmatpush1.bf16.msra.mxu1 %v4851_v47  ;;  %v1985_v13 = vld [vmem:[%s7694_s5 + $0x80] sm:$0xff] }
 0x1fd   :  { %5111 = vset.pattern.permute.xlu1 %v7732_v61 }
 0x1fe   :  { %730 = vperm.xlu1 %5111, %v6169_v6   ;;  %v1393_v8 = vmax.f32 %v1329_v48, 0.0 }
 0x1ff   :  { %2831 = vmatmul.mubr.bf16.gmra.mrb[52].mxu0 %v6140_v35  ;;  %v679_v45 = vpop.permute.xlu1 %678 }
 0x200   :  { %2840 = vmatprep.mubr.bf16.mxu0 %v7731_v25  ;;  %v808_v18 = vmul.f32 %v5474_v60, %v679_v45 }
 0x202   :  { %734 = vperm.xlu1 %5111, %v5132_v52   ;;  %v872_v1 = vadd.f32 %v808_v18, %v484_v29 }
 0x204   :  { %v1055_v11 = vpop.permute.xlu1 %1054 }
 0x205   :  { %v1193_v0 = vmul.f32 %v5482_v62, %v1055_v11 }
 0x206   :  { %5112 = vset.pattern.permute.xlu1 %v7731_v25 }
 0x207   :  { %v1257_v56 = vadd.f32 %v1193_v0, %v869_v32  ;;  %2841 = vmatmul.mubr.bf16.gmra.mrb[56].mxu0 %v6180_v16  ;;  %414 = vperm.xlu1 %5112, %v111_v22  }
 0x208   :  { %v1063_v51 = vpop.permute.xlu1 %1062  ;;  %2850 = vmatprep.mubr.bf16.mxu0 %v7731_v25 }
 0x209   :  { %v1328_v44 = vadd.f32 %v6017_v34, %v1257_v56  ;;  %v1195_v38 = vmul.f32 %v5482_v62, %v1063_v51 }
 0x20b   :  { %v1392_v39 = vmax.f32 %v1328_v44, 0.0  ;;  %v1259_v24 = vadd.f32 %v1195_v38, %v871_v3  ;;  %5113 = vset.pattern.permute.xlu1 %v7732_v61 }
 0x20c   :  { %742 = vperm.xlu1 %5113, %v111_v22   ;;  %v1067_v54 = vpop.permute.xlu1 %1066 }
 0x20d   :  { %v1436_v49 = vpack.c.bf16 %v1393_v8, %v1392_v39  ;;  %v1196_v2 = vmul.f32 %v5482_v62, %v1067_v54  ;;  %v1330_v46 = vadd.f32 %v6017_v34, %v1259_v24  ;;  %v1989_v54 = vld [vmem:[%s7694_s5 + $0xa0] sm:$0xff] }
 0x20f   :  { %v1260_v14 = vadd.f32 %v1196_v2, %v872_v1  ;;  %4999 = vmatprep.mubr.msk.bf16.mxu1 %vm1487_vm0, %v1436_v49  ;;  %2851 = vmatmul.mubr.bf16.gmra.mrb[60].mxu0 %v6177_v5  ;;  %v1394_v37 = vmax.f32 %v1330_v46, 0.0  ;;  %v4867_v49 = vcombine.low %v1985_v13, %v1989_v54  ;;  %v4868_v2 = vcombine.high %v1985_v13, %v1989_v54 }
 0x210   :  { %5114 = vset.pattern.permute.xlu1 %v7733_v50  ;;  %2860 = vmatprep.mubr.bf16.mxu0 %v7731_v25  ;;  %v1197_v46 = vmul.f32 %v5482_v62, %v6047_v40 }
 0x211   :  { %v1331_v17 = vadd.f32 %v6017_v34, %v1260_v14  ;;  %1118 = vperm.xlu1 %5114, %v6169_v6   ;;  %v345_v45 = vpop.permute.xlu1 %344  ;;  %v1981_v6 = vld [vmem:[%s7694_s5 + $0x60] sm:$0xff] }
 0x212   :  { %v4860_v48 = vcombine.high %v1977_v57, %v1981_v6 }
 0x213   :  { %v1395_v12 = vmax.f32 %v1331_v17, 0.0 }
 0x214   :  { %2397 = vmatprep.subr.bf16.mxu1 %v4860_v48 }
 0x215   :  { %v1437_v33 = vpack.c.bf16 %v1395_v12, %v1394_v37  ;;  %1126 = vperm.xlu1 %5114, %v5855_v53   ;;  %v4859_v53 = vcombine.low %v1977_v57, %v1981_v6  ;;  %v1993_v12 = vld [vmem:[%s7694_s5 + $0xc0] sm:$0xff] }
 0x216   :  { %v683_v52 = vpop.permute.xlu1 %682 }
 0x217   :  { %5000 = vmatmul.mubr.msk.bf16.gmra.mrb[8].mxu1 %vm1487_vm0, %v1437_v33  ;;  %v809_v24 = vmul.f32 %v5474_v60, %v683_v52  ;;  %v1997_v33 = vld [vmem:[%s7694_s5 + $0xe0] sm:$0xff] }
 0x218   :  { %v4977_v19 = vpop.f32.mrb[16].mxu0  ;;  %2398 = vmatpush1.bf16.msra.mxu1 %v4859_v53  ;;  %v4876_v40 = vcombine.high %v1993_v12, %v1997_v33 }
 0x219   :  { %v1691_v11 = vadd.f32 %v4977_v19, %v6088_v4  ;;  %v1682_v15 = vpop.f32.mrb[17].mxu0  ;;  %1130 = vperm.xlu1 %5114, %v111_v22   ;;  %v340_v22 = vpop.permute.xlu0 %339  ;;  %2399 = vmatprep.subr.bf16.mxu1 %v4868_v2  ;;  %v4875_v19 = vcombine.low %v1993_v12, %v1997_v33 }
 0x21a   :  { %v1683_v32 = vadd.f32 %v6088_v4, %v1682_v15  ;;  %v4978_v0 = vpop.f32.mrb[18].mxu0  ;;  %v485_v39 = vmul.f32 %v5486_v63, %v340_v22  ;;  %v1200_v15 = vmul.f32 %v5482_v62, %v6054_v30 }
 0x21b   :  { %v1694_v56 = vadd.f32 %v4978_v0, %v6088_v4  ;;  %v1685_v51 = vpop.f32.mrb[19].mxu0  ;;  %v350_v3 = vpop.permute.xlu1 %349  ;;  %v1891_v44 = vmax.f32 %v1691_v11, 0.0  ;;  %v810_v11 = vmul.f32 %v5474_v60, %v5849_v23  ;;  %v811_v23 = vmul.f32 %v5474_v60, %v5878_v42 }
 0x21c   :  { %v1686_v18 = vadd.f32 %v6088_v4, %v1685_v51  ;;  %v1889_v8 = vmax.f32 %v1683_v32, 0.0  ;;  %v873_v14 = vadd.f32 %v809_v24, %v485_v39  ;;  %2400 = vmatpush1.bf16.msra.mxu1 %v4867_v49  ;;  %v487_v53 = vmul.f32 %v5486_v63, %v350_v3  ;;  %v2005_v3 = vld [vmem:[%s7694_s5 + $0x120] sm:$0xff] }
 0x21d   :  { %v1892_v38 = vmax.f32 %v1694_v56, 0.0  ;;  %5117 = vset.pattern.permute.xlu1 %v7731_v25  ;;  %v6251_v1 = vpop.permute.xlu0 %364  ;;  %2401 = vmatprep.subr.bf16.mxu1 %v4876_v40 }
 0x21e   :  { %v1890_v29 = vmax.f32 %v1686_v18, 0.0  ;;  %424 = vperm.xlu1 %5117, %v5986_v55   ;;  %v1261_v57 = vadd.f32 %v1197_v46, %v873_v14  ;;  %v2001_v18 = vld [vmem:[%s7694_s5 + $0x100] sm:$0xff] }
 0x21f   :  { %v6237_v41 = vpack.c.bf16 %v1892_v38, %v1891_v44  ;;  %v355_v21 = vpop.permute.xlu1 %354  ;;  %v4883_v44 = vcombine.low %v2001_v18, %v2005_v3  ;;  %v4884_v38 = vcombine.high %v2001_v18, %v2005_v3  ;;  %v490_v18 = vmul.f32 %v5486_v63, %v6251_v1 }
 0x220   :  { %v6241_v47 = vpack.c.bf16 %v1890_v29, %v1889_v8  ;;  %v488_v52 = vmul.f32 %v5486_v63, %v355_v21  ;;  %2402 = vmatpush1.bf16.msra.mxu1 %v4875_v19  ;;  %v1332_v30 = vadd.f32 %v6017_v34, %v1261_v57  ;;  %v875_v8 = vadd.f32 %v811_v23, %v487_v53 }
 0x221   :  { %v6272_v32 = vpop.permute.xlu0 %369  ;;  %2403 = vmatprep.subr.bf16.mxu1 %v4884_v38  ;;  %v2021_v38 = vld [vmem:[%s7694_s5 + $0x1a0] sm:$0xff] }
 0x222   :  { %2861 = vmatmul.mubr.bf16.gmra.mrb[64].mxu0 %v6241_v47  ;;  %5118 = vset.pattern.permute.xlu1 %v7732_v61  ;;  %v1396_v39 = vmax.f32 %v1332_v30, 0.0 }
 0x223   :  { %746 = vperm.xlu1 %5118, %v5869_v9   ;;  %2870 = vmatprep.mubr.bf16.mxu0 %v7731_v25  ;;  %v486_v9 = vmul.f32 %v5486_v63, %v345_v45 }
 0x224   :  { %v695_v17 = vpop.permute.xlu1 %694  ;;  %2404 = vmatpush1.bf16.msra.mxu1 %v4883_v44  ;;  %v2017_v44 = vld [vmem:[%s7694_s5 + $0x180] sm:$0xff] }
 0x225   :  { %v812_v37 = vmul.f32 %v5474_v60, %v695_v17  ;;  %v874_v0 = vadd.f32 %v810_v11, %v486_v9  ;;  %v6290_v21 = vpop.permute.xlu0 %379  ;;  %v2013_v9 = vld [vmem:[%s7694_s5 + $0x160] sm:$0xff] }
 0x227   :  { %5119 = vset.pattern.permute.xlu1 %v7731_v25  ;;  %v876_v6 = vadd.f32 %v812_v37, %v488_v52 }
 0x228   :  { %429 = vperm.xlu1 %5119, %v6002_v7  }
 0x229   :  { %v1075_v45 = vpop.permute.xlu1 %1074  ;;  %v1264_v56 = vadd.f32 %v1200_v15, %v876_v6  ;;  %v6297_v37 = vpop.permute.xlu0 %404 }
 0x22a   :  { %v1198_v48 = vmul.f32 %v5482_v62, %v1075_v45  ;;  %2871 = vmatmul.mubr.bf16.gmra.mrb[68].mxu0 %v6237_v41 }
 0x22b   :  { %2880 = vmatprep.mubr.bf16.mxu0 %v7731_v25  ;;  %v1335_v24 = vadd.f32 %v6017_v34, %v1264_v56 }
 0x22c   :  { %v1262_v51 = vadd.f32 %v1198_v48, %v874_v0  ;;  %434 = vperm.xlu1 %5119, %v6036_v31  }
 0x22d   :  { %v1079_v22 = vpop.permute.xlu1 %1078  ;;  %v1399_v14 = vmax.f32 %v1335_v24, 0.0  ;;  %v2029_v24 = vld [vmem:[%s7694_s5 + $0x1e0] sm:$0xff] }
 0x22e   :  { %v1333_v42 = vadd.f32 %v6017_v34, %v1262_v51  ;;  %v1199_v29 = vmul.f32 %v5482_v62, %v1079_v22 }
 0x230   :  { %v1397_v13 = vmax.f32 %v1333_v42, 0.0  ;;  %v1263_v54 = vadd.f32 %v1199_v29, %v875_v8  ;;  %5120 = vset.pattern.permute.xlu1 %v7732_v61  ;;  %v4899_v8 = vcombine.low %v2017_v44, %v2021_v38  ;;  %v4900_v42 = vcombine.high %v2017_v44, %v2021_v38 }
 0x231   :  { %758 = vperm.xlu1 %5120, %v6036_v31   ;;  %v2009_v31 = vld [vmem:[%s7694_s5 + $0x140] sm:$0xff] }
 0x232   :  { %v1438_v49 = vpack.c.bf16 %v1397_v13, %v1396_v39  ;;  %v1334_v2 = vadd.f32 %v6017_v34, %v1263_v54  ;;  %v360_v46 = vpop.permute.xlu1 %359  ;;  %v4892_v40 = vcombine.high %v2009_v31, %v2013_v9  ;;  %v2025_v39 = vld [vmem:[%s7694_s5 + $0x1c0] sm:$0xff] }
 0x233   :  { %v4907_v54 = vcombine.low %v2025_v39, %v2029_v24 }
 0x234   :  { %v1398_v17 = vmax.f32 %v1334_v2, 0.0  ;;  %5003 = vmatprep.mubr.msk.bf16.mxu1 %vm1487_vm0, %v1438_v49  ;;  %2405 = vmatprep.subr.bf16.mxu1 %v4892_v40  ;;  %v4908_v49 = vcombine.high %v2025_v39, %v2029_v24  ;;  %v1202_v2 = vmul.f32 %v5482_v62, %v6067_v59 }
 0x235   :  { %5122 = vset.pattern.permute.xlu1 %v7733_v50  ;;  %v6310_v50 = vpop.permute.xlu0 %409 }
 0x236   :  { %v1439_v12 = vpack.c.bf16 %v1399_v14, %v1398_v17  ;;  %1138 = vperm.xlu1 %5122, %v5986_v55   ;;  %v4891_v55 = vcombine.low %v2009_v31, %v2013_v9  ;;  %v489_v17 = vmul.f32 %v5486_v63, %v360_v46 }
 0x237   :  { %v699_v33 = vpop.permute.xlu1 %698 }
 0x238   :  { %5004 = vmatmul.mubr.msk.bf16.gmra.mrb[12].mxu1 %vm1487_vm0, %v1439_v12  ;;  %v813_v14 = vmul.f32 %v5474_v60, %v699_v33  ;;  %v491_v12 = vmul.f32 %v5486_v63, %v6272_v32 }
 0x239   :  { %v4981_v61 = vpop.f32.mrb[20].mxu0  ;;  %2406 = vmatpush1.bf16.msra.mxu1 %v4891_v55  ;;  %v6317_v51 = vpop.permute.xlu0 %419 }
 0x23a   :  { %v1707_v52 = vadd.f32 %v4981_v61, %v6088_v4  ;;  %v1698_v19 = vpop.f32.mrb[21].mxu0  ;;  %1142 = vperm.xlu1 %5122, %v6002_v7   ;;  %2407 = vmatprep.subr.bf16.mxu1 %v4900_v42  ;;  %v1976_v42 = vld [vmem:[%s7694_s5 + $0x38] sm:$0xff] }
 0x23b   :  { %v1699_v11 = vadd.f32 %v6088_v4, %v1698_v19  ;;  %v4982_v15 = vpop.f32.mrb[22].mxu0  ;;  %v703_v57 = vpop.permute.xlu1 %702 }
 0x23c   :  { %v1710_v6 = vadd.f32 %v4982_v15, %v6088_v4  ;;  %v1701_v45 = vpop.f32.mrb[23].mxu0  ;;  %v1895_v53 = vmax.f32 %v1707_v52, 0.0  ;;  %v814_v3 = vmul.f32 %v5474_v60, %v703_v57  ;;  %v877_v52 = vadd.f32 %v813_v14, %v489_v17 }
 0x23d   :  { %v1702_v0 = vadd.f32 %v6088_v4, %v1701_v45  ;;  %v1893_v23 = vmax.f32 %v1699_v11, 0.0  ;;  %2408 = vmatpush1.bf16.msra.mxu1 %v4899_v8  ;;  %v707_v13 = vpop.permute.xlu0 %706 }
 0x23e   :  { %v1896_v48 = vmax.f32 %v1710_v6, 0.0  ;;  %v878_v1 = vadd.f32 %v814_v3, %v490_v18  ;;  %2409 = vmatprep.subr.bf16.mxu1 %v4908_v49  ;;  %v815_v31 = vmul.f32 %v5474_v60, %v707_v13  ;;  %v6362_v18 = vld [vmem:[%s7694_s5 + $0x30] sm:$0xff] }
 0x23f   :  { %v1894_v30 = vmax.f32 %v1702_v0, 0.0 }
 0x240   :  { %v6315_v7 = vpack.c.bf16 %v1896_v48, %v1895_v53  ;;  %v375_v56 = vpop.permute.xlu1 %374  ;;  %v1266_v61 = vadd.f32 %v1202_v2, %v878_v1  ;;  %v879_v55 = vadd.f32 %v815_v31, %v491_v12 }
 0x241   :  { %v6322_v22 = vpack.c.bf16 %v1894_v30, %v1893_v23  ;;  %2410 = vmatpush1.bf16.msra.mxu1 %v4907_v54  ;;  %v492_v57 = vmul.f32 %v5486_v63, %v375_v56  ;;  %v6357_v30 = vld [vmem:[%s7694_s5 + $0x10] sm:$0xff]  ;;  %v1972_v56 = vld [vmem:[%s7694_s5 + $0x18] sm:$0xff] }
 0x242   :  { %v1337_v59 = vadd.f32 %v6017_v34, %v1266_v61  ;;  %v4855_v38 = vcombine.low %v6357_v30, %v6362_v18  ;;  %v4856_v8 = vcombine.high %v6357_v30, %v6362_v18  ;;  %v4857_v1 = vcombine.low %v1972_v56, %v1976_v42  ;;  %v1999_v30 = vld [vmem:[%s7694_s5 + $0xf0] sm:$0xff] }
 0x243   :  { %2881 = vmatmul.mubr.bf16.gmra.mrb[72].mxu0 %v6322_v22 }
 0x244   :  { %2890 = vmatprep.mubr.bf16.mxu0 %v7731_v25  ;;  %v1401_v15 = vmax.f32 %v1337_v59, 0.0  ;;  %3101 = vmatprep.subr.bf16.mxu1 %v4856_v8 }
 0x245   :  { %v711_v29 = vpop.permute.xlu1 %710 }
 0x246   :  { %v816_v40 = vmul.f32 %v5474_v60, %v711_v29  ;;  %v4858_v29 = vcombine.high %v1972_v56, %v1976_v42 }
 0x248   :  { %v880_v53 = vadd.f32 %v816_v40, %v492_v57  ;;  %3454 = vmatprep.subr.bf16.mxu0 %v4858_v29 }
 0x249   :  { %3455 = vmatpush1.bf16.msra.mxu0 %v4857_v1  ;;  %v1208_v1 = vmul.f32 %v5482_v62, %v6083_v36 }
 0x24a   :  { %v1087_v9 = vpop.permute.xlu1 %1086 }
 0x24b   :  { %v1201_v19 = vmul.f32 %v5482_v62, %v1087_v9  ;;  %2891 = vmatmul.mubr.bf16.gmra.mrb[76].mxu0 %v6315_v7 }
 0x24c   :  { %2900 = vmatprep.mubr.bf16.mxu0 %v7731_v25 }
 0x24d   :  { %v1265_v33 = vadd.f32 %v1201_v19, %v877_v52 }
 0x24e   :  { %v1095_v46 = vpop.permute.xlu1 %1094 }
 0x24f   :  { %v1336_v32 = vadd.f32 %v6017_v34, %v1265_v33  ;;  %v1203_v11 = vmul.f32 %v5482_v62, %v1095_v46 }
 0x251   :  { %v1400_v6 = vmax.f32 %v1336_v32, 0.0  ;;  %v1267_v45 = vadd.f32 %v1203_v11, %v879_v55 }
 0x252   :  { %v1099_v0 = vpop.permute.xlu1 %1098 }
 0x253   :  { %v1440_v48 = vpack.c.bf16 %v1401_v15, %v1400_v6  ;;  %v1204_v23 = vmul.f32 %v5482_v62, %v1099_v0  ;;  %v1338_v3 = vadd.f32 %v6017_v34, %v1267_v45  ;;  %v493_v15 = vmul.f32 %v5486_v63, %v6290_v21  ;;  %v719_v45 = vpop.permute.xlu0 %718 }
 0x254   :  { %v818_v56 = vmul.f32 %v5474_v60, %v719_v45 }
 0x255   :  { %v1268_v44 = vadd.f32 %v1204_v23, %v880_v53  ;;  %5007 = vmatprep.mubr.msk.bf16.mxu1 %vm1487_vm0, %v1440_v48  ;;  %v1402_v13 = vmax.f32 %v1338_v3, 0.0  ;;  %v1205_v23 = vmul.f32 %v5482_v62, %v6075_v20 }
 0x257   :  { %v1339_v39 = vadd.f32 %v6017_v34, %v1268_v44  ;;  %v385_v24 = vpop.permute.xlu1 %384  ;;  %v723_v44 = vpop.permute.xlu0 %722 }
 0x258   :  { %v494_v21 = vmul.f32 %v5486_v63, %v385_v24 }
 0x259   :  { %v1403_v54 = vmax.f32 %v1339_v39, 0.0 }
 0x25a   :  { %v882_v39 = vadd.f32 %v818_v56, %v494_v21 }
 0x25b   :  { %v1441_v49 = vpack.c.bf16 %v1403_v54, %v1402_v13  ;;  %v819_v13 = vmul.f32 %v5474_v60, %v723_v44  ;;  %v498_v44 = vmul.f32 %v5486_v63, %v6297_v37 }
 0x25c   :  { %v715_v2 = vpop.permute.xlu1 %714 }
 0x25d   :  { %5008 = vmatmul.mubr.msk.bf16.gmra.mrb[16].mxu1 %vm1487_vm0, %v1441_v49  ;;  %v817_v57 = vmul.f32 %v5474_v60, %v715_v2 }
 0x25e   :  { %v4985_v14 = vpop.f32.mrb[24].mxu0 }
 0x25f   :  { %v1723_v17 = vadd.f32 %v4985_v14, %v6088_v4  ;;  %v1714_v12 = vpop.f32.mrb[25].mxu0  ;;  %v881_v0 = vadd.f32 %v817_v57, %v493_v15 }
 0x260   :  { %v1715_v61 = vadd.f32 %v6088_v4, %v1714_v12  ;;  %v4986_v31 = vpop.f32.mrb[26].mxu0 }
 0x261   :  { %v1726_v9 = vadd.f32 %v4986_v31, %v6088_v4  ;;  %v1717_v52 = vpop.f32.mrb[27].mxu0  ;;  %v390_v19 = vpop.permute.xlu1 %389  ;;  %v1899_v33 = vmax.f32 %v1723_v17, 0.0  ;;  %v1269_v8 = vadd.f32 %v1205_v23, %v881_v0 }
 0x262   :  { %v1718_v59 = vadd.f32 %v6088_v4, %v1717_v52  ;;  %v1897_v46 = vmax.f32 %v1715_v61, 0.0  ;;  %v495_v54 = vmul.f32 %v5486_v63, %v390_v19  ;;  %v1980_v19 = vld [vmem:[%s7694_s5 + $0x58] sm:$0xff] }
 0x263   :  { %v1900_v55 = vmax.f32 %v1726_v9, 0.0  ;;  %v1340_v24 = vadd.f32 %v6017_v34, %v1269_v8 }
 0x264   :  { %v1898_v40 = vmax.f32 %v1718_v59, 0.0  ;;  %v883_v17 = vadd.f32 %v819_v13, %v495_v54  ;;  %v1984_v59 = vld [vmem:[%s7694_s5 + $0x78] sm:$0xff] }
 0x265   :  { %v6382_v32 = vpack.c.bf16 %v1900_v55, %v1899_v33  ;;  %v395_v11 = vpop.permute.xlu1 %394  ;;  %v1404_v61 = vmax.f32 %v1340_v24, 0.0  ;;  %v6417_v55 = vld [vmem:[%s7691_s2] ss:$0 sm:$0xff] }
 0x266   :  { %v6387_v6 = vpack.c.bf16 %v1898_v40, %v1897_v46  ;;  %v496_v3 = vmul.f32 %v5486_v63, %v395_v11  ;;  %v4866_v11 = vcombine.high %v1980_v19, %v1984_v59 }
 0x268   :  { %2901 = vmatmul.mubr.bf16.gmra.mrb[80].mxu0 %v6387_v6  ;;  %3456 = vmatprep.subr.bf16.mxu0 %v4866_v11 }
 0x269   :  { %2910 = vmatprep.mubr.bf16.mxu0 %v7731_v25 }
 0x26a   :  { %v727_v53 = vpop.permute.xlu1 %726 }
 0x26b   :  { %v820_v48 = vmul.f32 %v5474_v60, %v727_v53 }
 0x26d   :  { %v884_v42 = vadd.f32 %v820_v48, %v496_v3 }
 0x26f   :  { %v1107_v29 = vpop.permute.xlu1 %1106  ;;  %v1272_v49 = vadd.f32 %v1208_v1, %v884_v42 }
 0x270   :  { %v1206_v20 = vmul.f32 %v5482_v62, %v1107_v29  ;;  %2911 = vmatmul.mubr.bf16.gmra.mrb[84].mxu0 %v6382_v32 }
 0x271   :  { %2920 = vmatprep.mubr.bf16.mxu0 %v7731_v25  ;;  %v1343_v31 = vadd.f32 %v6017_v34, %v1272_v49 }
 0x272   :  { %v1270_v2 = vadd.f32 %v1206_v20, %v882_v39  ;;  %v1210_v39 = vmul.f32 %v5482_v62, %v6094_v28  ;;  %v1988_v28 = vld [vmem:[%s7694_s5 + $0x98] sm:$0xff] }
 0x273   :  { %v1111_v14 = vpop.permute.xlu1 %1110  ;;  %v1407_v15 = vmax.f32 %v1343_v31, 0.0  ;;  %v1992_v31 = vld [vmem:[%s7694_s5 + $0xb8] sm:$0xff] }
 0x274   :  { %v1341_v36 = vadd.f32 %v6017_v34, %v1270_v2  ;;  %v1207_v12 = vmul.f32 %v5482_v62, %v1111_v14  ;;  %v4865_v34 = vcombine.low %v1980_v19, %v1984_v59  ;;  %v4874_v19 = vcombine.high %v1988_v28, %v1992_v31 }
 0x275   :  { %v499_v59 = vmul.f32 %v5486_v63, %v6310_v50 }
 0x276   :  { %v1405_v9 = vmax.f32 %v1341_v36, 0.0  ;;  %v1271_v52 = vadd.f32 %v1207_v12, %v883_v17  ;;  %3457 = vmatpush1.bf16.msra.mxu0 %v4865_v34  ;;  %v739_v12 = vpop.permute.xlu0 %738 }
 0x277   :  { %3458 = vmatprep.subr.bf16.mxu0 %v4874_v19 }
 0x278   :  { %v1442_v33 = vpack.c.bf16 %v1405_v9, %v1404_v61  ;;  %v1342_v46 = vadd.f32 %v6417_v55, %v1271_v52  ;;  %v400_v40 = vpop.permute.xlu1 %399  ;;  %v4873_v52 = vcombine.low %v1988_v28, %v1992_v31  ;;  %v7743_v31 = vld [vmem:[#allocation9_spill] sm:$0xff] }
 0x279   :  { %v497_v61 = vmul.f32 %v5486_v63, %v400_v40 }
 0x27a   :  { %v1406_v57 = vmax.f32 %v1342_v46, 0.0  ;;  %5011 = vmatprep.mubr.msk.bf16.mxu1 %vm1487_vm0, %v1442_v33  ;;  %v823_v33 = vmul.f32 %v5474_v60, %v739_v12  ;;  %3459 = vmatpush1.bf16.msra.mxu0 %v4873_v52 }
 0x27c   :  { %v1443_v45 = vpack.c.bf16 %v1407_v15, %v1406_v57  ;;  %v887_v57 = vadd.f32 %v823_v33, %v499_v59 }
 0x27d   :  { %v731_v0 = vpop.permute.xlu1 %730 }
 0x27e   :  { %5012 = vmatmul.mubr.msk.bf16.gmra.mrb[20].mxu1 %vm1487_vm0, %v1443_v45 }
 0x27f   :  { %v4989_v53 = vpop.f32.mrb[28].mxu0 }
 0x280   :  { %v1739_v48 = vadd.f32 %v4989_v53, %v6088_v4  ;;  %v1730_v23 = vpop.f32.mrb[29].mxu0 }
 0x281   :  { %v1731_v56 = vadd.f32 %v6088_v4, %v1730_v23  ;;  %v4990_v21 = vpop.f32.mrb[30].mxu0  ;;  %v735_v3 = vpop.permute.xlu1 %734 }
 0x282   :  { %v1742_v8 = vadd.f32 %v4990_v21, %v6088_v4  ;;  %v822_v42 = vmul.f32 %v5474_v60, %v735_v3  ;;  %v1733_v1 = vpop.f32.mrb[31].mxu0  ;;  %v1903_v13 = vmax.f32 %v1739_v48, 0.0 }
 0x283   :  { %v1734_v29 = vadd.f32 %v6088_v4, %v1733_v1  ;;  %v1901_v24 = vmax.f32 %v1731_v56, 0.0  ;;  %v821_v4 = vmul.f32 %v5474_v60, %v731_v0 }
 0x284   :  { %v1904_v54 = vmax.f32 %v1742_v8, 0.0  ;;  %v886_v20 = vadd.f32 %v822_v42, %v498_v44 }
 0x285   :  { %v1902_v49 = vmax.f32 %v1734_v29, 0.0  ;;  %v885_v46 = vadd.f32 %v821_v4, %v497_v61  ;;  %v2033_v61 = vld [vmem:[%s7695_s6] sm:$0xff] }
 0x286   :  { %v6431_v2 = vpack.c.bf16 %v1904_v54, %v1903_v13  ;;  %v1274_v14 = vadd.f32 %v1210_v39, %v886_v20  ;;  %v415_v17 = vpop.permute.xlu1 %414 }
 0x287   :  { %v6433_v37 = vpack.c.bf16 %v1902_v49, %v1901_v24  ;;  %v500_v48 = vmul.f32 %v5486_v63, %v415_v17  ;;  %v751_v24 = vpop.permute.xlu0 %750  ;;  %v6464_v17 = vld [vmem:[%s7693_s4] ss:$0 sm:$0xff] }
 0x288   :  { %v1345_v40 = vadd.f32 %v6417_v55, %v1274_v14 }
 0x289   :  { %2921 = vmatmul.mubr.bf16.gmra.mrb[88].mxu0 %v6433_v37 }
 0x28a   :  { %2930 = vmatprep.mubr.bf16.mxu0 %v7731_v25  ;;  %v1409_v53 = vmax.f32 %v1345_v40, 0.0 }
 0x28b   :  { %v743_v36 = vpop.permute.xlu1 %742  ;;  %v755_v33 = vpop.permute.xlu0 %754 }
 0x28c   :  { %v824_v45 = vmul.f32 %v5474_v60, %v743_v36 }
 0x28e   :  { %v888_v3 = vadd.f32 %v824_v45, %v500_v48 }
 0x290   :  { %v1119_v9 = vpop.permute.xlu1 %1118 }
 0x291   :  { %v1209_v34 = vmul.f32 %v5482_v62, %v1119_v9  ;;  %2931 = vmatmul.mubr.bf16.gmra.mrb[92].mxu0 %v6431_v2  ;;  %v2049_v9 = vsub.s32 3, %v7743_v31 }
 0x292   :  { %2940 = vmatprep.mubr.bf16.mxu0 %v7731_v25 }
 0x293   :  { %v1273_v11 = vadd.f32 %v1209_v34, %v885_v46 }
 0x294   :  { %v1127_v15 = vpop.permute.xlu1 %1126 }
 0x295   :  { %v1344_v50 = vadd.f32 %v6417_v55, %v1273_v11  ;;  %v1211_v0 = vmul.f32 %v5482_v62, %v1127_v15  ;;  %v7744_v11 = vsub.s32 2, %v7743_v31 }
 0x297   :  { %v1408_v23 = vmax.f32 %v1344_v50, 0.0  ;;  %v1275_v56 = vadd.f32 %v1211_v0, %v887_v57  ;;  %v6476_v15 = vrot.slane %v2033_v61, %v7744_v11  ;;  %v6478_v0 = vrot.slane %v2033_v61, %v2049_v9 }
 0x298   :  { %v1131_v21 = vpop.permute.xlu1 %1130 }
 0x299   :  { %v1444_v44 = vpack.c.bf16 %v1409_v53, %v1408_v23  ;;  %v1212_v8 = vmul.f32 %v5482_v62, %v1131_v21  ;;  %v1346_v42 = vadd.f32 %v6417_v55, %v1275_v56  ;;  %v1135_v21 = vpop.permute.xlu0 %1134 }
 0x29b   :  { %v1276_v1 = vadd.f32 %v1212_v8, %v888_v3  ;;  %5015 = vmatprep.mubr.msk.bf16.mxu1 %vm1487_vm0, %v1444_v44  ;;  %v1410_v13 = vmax.f32 %v1346_v42, 0.0  ;;  %v501_v8 = vmul.f32 %v5486_v63, %v6317_v51 }
 0x29d   :  { %v1347_v29 = vadd.f32 %v6417_v55, %v1276_v1  ;;  %v425_v39 = vpop.permute.xlu1 %424  ;;  %v1147_v51 = vpop.permute.xlu0 %1146 }
 0x29f   :  { %v1411_v54 = vmax.f32 %v1347_v29, 0.0 }
 0x2a1   :  { %v1445_v20 = vpack.c.bf16 %v1411_v54, %v1410_v13 }
 0x2a2   :  { %v747_v49 = vpop.permute.xlu1 %746 }
 0x2a3   :  { %5016 = vmatmul.mubr.msk.bf16.gmra.mrb[24].mxu1 %vm1487_vm0, %v1445_v20  ;;  %v825_v53 = vmul.f32 %v5474_v60, %v747_v49  ;;  %v1213_v49 = vmul.f32 %v5482_v62, %v1135_v21 }
 0x2a4   :  { %v4993_v14 = vpop.f32.mrb[0].mxu1 }
 0x2a5   :  { %v1755_v36 = vadd.f32 %v6464_v17, %v4993_v14  ;;  %v1746_v4 = vpop.f32.mrb[1].mxu1  ;;  %v889_v20 = vadd.f32 %v825_v53, %v501_v8 }
 0x2a6   :  { %v1747_v12 = vadd.f32 %v6464_v17, %v1746_v4  ;;  %v4994_v28 = vpop.f32.mrb[2].mxu1 }
 0x2a7   :  { %v1758_v52 = vadd.f32 %v6464_v17, %v4994_v28  ;;  %v1749_v19 = vpop.f32.mrb[3].mxu1  ;;  %v430_v59 = vpop.permute.xlu1 %429  ;;  %v1907_v34 = vmax.f32 %v1755_v36, 0.0  ;;  %v502_v28 = vmul.f32 %v5486_v63, %v425_v39 }
 0x2a8   :  { %v1750_v46 = vadd.f32 %v6464_v17, %v1749_v19  ;;  %v1905_v57 = vmax.f32 %v1747_v12, 0.0  ;;  %v826_v12 = vmul.f32 %v5474_v60, %v751_v24  ;;  %v1996_v19 = vld [vmem:[%s7694_s5 + $0xd8] sm:$0xff] }
 0x2a9   :  { %v1908_v40 = vmax.f32 %v1758_v52, 0.0  ;;  %v2000_v24 = vld [vmem:[%s7694_s5 + $0xf8] sm:$0xff] }
 0x2aa   :  { %v1906_v45 = vmax.f32 %v1750_v46, 0.0  ;;  %v2782_v50 = vpop.f32.mrb[32].mxu0  ;;  %v1277_v46 = vadd.f32 %v1213_v49, %v889_v20  ;;  %v4882_v53 = vcombine.high %v1996_v19, %v2000_v24 }
 0x2ab   :  { %v6481_v48 = vpack.c.bf16 %v1908_v40, %v1907_v34  ;;  %v2784_v23 = vpop.f32.mrb[33].mxu0  ;;  %v435_v56 = vpop.permute.xlu1 %434  ;;  %v2783_v42 = vadd.f32 %v2782_v50, %v6476_v15  ;;  %v1216_v34 = vmul.f32 %v5482_v62, %v1147_v51  ;;  %v4881_v50 = vcombine.low %v1996_v19, %v2000_v24 }
 0x2ac   :  { %v6483_v3 = vpack.c.bf16 %v1906_v45, %v1905_v57  ;;  %v2786_v44 = vpop.f32.mrb[34].mxu0  ;;  %v2785_v13 = vadd.f32 %v2784_v23, %v6478_v0  ;;  %v504_v9 = vmul.f32 %v5486_v63, %v435_v56  ;;  %v890_v23 = vadd.f32 %v826_v12, %v502_v28  ;;  %3460 = vmatprep.subr.bf16.mxu0 %v4882_v53 }
 0x2ad   :  { %v2787_v1 = vadd.f32 %v2786_v44, %v6476_v15  ;;  %v2788_v29 = vpop.f32.mrb[35].mxu0  ;;  %v503_v56 = vmul.f32 %v5486_v63, %v430_v59  ;;  %3461 = vmatpush1.bf16.msra.mxu0 %v4881_v50  ;;  %v827_v63 = vmul.f32 %v5474_v60, %v755_v33 }
 0x2ae   :  { %v2789_v54 = vadd.f32 %v2788_v29, %v6478_v0  ;;  %2941 = vmatmul.mubr.bf16.gmra.mrb[96].mxu0 %v6483_v3 }
 0x2af   :  { %v3841_v14 = vmax.f32 %v2783_v42, %v2787_v1  ;;  %2950 = vmatprep.mubr.bf16.mxu0 %v7731_v25 }
 0x2b0   :  { %v3854_v36 = vmax.f32 %v2785_v13, %v2789_v54  ;;  %v759_v4 = vpop.permute.xlu1 %758  ;;  %v1348_v54 = vadd.f32 %v6417_v55, %v1277_v46 }
 0x2b1   :  { %v828_v61 = vmul.f32 %v5474_v60, %v759_v4 }
 0x2b2   :  { %v2792_v52 = vpop.f32.mrb[36].mxu0 }
 0x2b3   :  { %v2793_v40 = vadd.f32 %v2792_v52, %v6476_v15  ;;  %v2794_v11 = vpop.f32.mrb[37].mxu0  ;;  %v892_v39 = vadd.f32 %v828_v61, %v504_v9  ;;  %v1412_v61 = vmax.f32 %v1348_v54, 0.0 }
 0x2b4   :  { %v2795_v57 = vadd.f32 %v2794_v11, %v6478_v0  ;;  %v2796_v45 = vpop.f32.mrb[38].mxu0 }
 0x2b5   :  { %v3842_v21 = vmax.f32 %v3841_v14, %v2793_v40  ;;  %v2797_v44 = vadd.f32 %v2796_v45, %v6476_v15  ;;  %v2798_v8 = vpop.f32.mrb[39].mxu0  ;;  %v1139_v42 = vpop.permute.xlu1 %1138  ;;  %v1280_v59 = vadd.f32 %v1216_v34, %v892_v39 }
 0x2b6   :  { %v3855_v1 = vmax.f32 %v3854_v36, %v2795_v57  ;;  %v2799_v29 = vadd.f32 %v2798_v8, %v6478_v0  ;;  %v1214_v13 = vmul.f32 %v5482_v62, %v1139_v42  ;;  %2951 = vmatmul.mubr.bf16.gmra.mrb[100].mxu0 %v6481_v48  ;;  %v891_v36 = vadd.f32 %v827_v63, %v503_v56 }
 0x2b7   :  { %v3843_v20 = vmax.f32 %v3842_v21, %v2797_v44  ;;  %2960 = vmatprep.mubr.bf16.mxu0 %v7731_v25  ;;  %v1351_v19 = vadd.f32 %v6417_v55, %v1280_v59 }
 0x2b8   :  { %v3856_v49 = vmax.f32 %v3855_v1, %v2799_v29  ;;  %v1278_v14 = vadd.f32 %v1214_v13, %v890_v23 }
 0x2b9   :  { %v1143_v4 = vpop.permute.xlu1 %1142  ;;  %v1415_v53 = vmax.f32 %v1351_v19, 0.0 }
 0x2ba   :  { %v1349_v51 = vadd.f32 %v6417_v55, %v1278_v14  ;;  %v1215_v12 = vmul.f32 %v5482_v62, %v1143_v4  ;;  %v2802_v28 = vpop.f32.mrb[40].mxu0 }
 0x2bb   :  { %v2803_v9 = vadd.f32 %v2802_v28, %v6476_v15  ;;  %v2804_v52 = vpop.f32.mrb[41].mxu0  ;;  %v1983_v28 = vld [vmem:[%s7694_s5 + $0x70] sm:$0xff] }
 0x2bc   :  { %v1413_v46 = vmax.f32 %v1349_v51, 0.0  ;;  %v1279_v40 = vadd.f32 %v1215_v12, %v891_v36  ;;  %v2805_v60 = vadd.f32 %v2804_v52, %v6478_v0  ;;  %v2806_v33 = vpop.f32.mrb[42].mxu0  ;;  %v1979_v12 = vld [vmem:[%s7694_s5 + $0x50] sm:$0xff] }
 0x2bd   :  { %v3844_v34 = vmax.f32 %v3843_v20, %v2803_v9  ;;  %v2807_v11 = vadd.f32 %v2806_v33, %v6476_v15  ;;  %v2808_v24 = vpop.f32.mrb[43].mxu0 }
 0x2be   :  { %v1446_v39 = vpack.c.bf16 %v1413_v46, %v1412_v61  ;;  %v1350_v57 = vadd.f32 %v6417_v55, %v1279_v40  ;;  %v3857_v62 = vmax.f32 %v3856_v49, %v2805_v60  ;;  %v2809_v45 = vadd.f32 %v2808_v24, %v6478_v0  ;;  %v2004_v46 = vld [vmem:[%s7694_s5 + $0x118] sm:$0xff] }
 0x2bf   :  { %v3845_v50 = vmax.f32 %v3844_v34, %v2807_v11  ;;  %v4864_v34 = vcombine.high %v1979_v12, %v1983_v28  ;;  %v2008_v11 = vld [vmem:[%s7694_s5 + $0x138] sm:$0xff] }
 0x2c0   :  { %v1414_v23 = vmax.f32 %v1350_v57, 0.0  ;;  %v3858_v56 = vmax.f32 %v3857_v62, %v2809_v45  ;;  %5019 = vmatprep.mubr.msk.bf16.mxu1 %vm1487_vm0, %v1446_v39  ;;  %v1987_v62 = vld [vmem:[%s7694_s5 + $0x90] sm:$0xff] }
 0x2c1   :  { %v1991_v45 = vld [vmem:[%s7694_s5 + $0xb0] sm:$0xff] }
 0x2c2   :  { %v1447_v21 = vpack.c.bf16 %v1415_v53, %v1414_v23  ;;  %v2812_v44 = vpop.f32.mrb[44].mxu0  ;;  %v4863_v23 = vcombine.low %v1979_v12, %v1983_v28 }
 0x2c3   :  { %v2813_v8 = vadd.f32 %v2812_v44, %v6476_v15  ;;  %v2814_v42 = vpop.f32.mrb[45].mxu0 }
 0x2c4   :  { %v2815_v1 = vadd.f32 %v2814_v42, %v6478_v0  ;;  %5020 = vmatmul.mubr.msk.bf16.gmra.mrb[28].mxu1 %vm1487_vm0, %v1447_v21  ;;  %v2816_v29 = vpop.f32.mrb[46].mxu0  ;;  %v4890_v21 = vcombine.high %v2004_v46, %v2008_v11 }
 0x2c5   :  { %v3846_v55 = vmax.f32 %v3845_v50, %v2813_v8  ;;  %v2817_v13 = vadd.f32 %v2816_v29, %v6476_v15  ;;  %v4997_v54 = vpop.f32.mrb[4].mxu1  ;;  %v2818_v20 = vpop.f32.mrb[47].mxu0  ;;  %2427 = vmatprep.mubr.bf16.mxu1 %v7731_v25 }
 0x2c6   :  { %v3859_v63 = vmax.f32 %v3858_v56, %v2815_v1  ;;  %v1771_v59 = vadd.f32 %v6464_v17, %v4997_v54  ;;  %v2819_v49 = vadd.f32 %v2818_v20, %v6478_v0  ;;  %v1762_v14 = vpop.f32.mrb[5].mxu1  ;;  %v4889_v56 = vcombine.low %v2004_v46, %v2008_v11  ;;  %3462 = vmatprep.subr.bf16.mxu0 %v4890_v21  ;;  %v1995_v20 = vld [vmem:[%s7694_s5 + $0xd0] sm:$0xff] }
 0x2c7   :  { %v6531_v4 = vmax.f32 %v3846_v55, %v2817_v13  ;;  %v1763_v36 = vadd.f32 %v6464_v17, %v1762_v14  ;;  %v4998_v51 = vpop.f32.mrb[6].mxu1  ;;  %v4872_v13 = vcombine.high %v1987_v62, %v1991_v45  ;;  %v4879_v46 = vcombine.low %v1995_v20, %v1999_v30 }
 0x2c8   :  { %v6540_v61 = vmax.f32 %v3859_v63, %v2819_v49  ;;  %v1774_v9 = vadd.f32 %v6464_v17, %v4998_v51  ;;  %v1765_v52 = vpop.f32.mrb[7].mxu1  ;;  %v1911_v40 = vmax.f32 %v1771_v59, 0.0  ;;  %3463 = vmatpush1.bf16.msra.mxu0 %v4889_v56  ;;  %v4880_v59 = vcombine.high %v1995_v20, %v1999_v30  ;;  %v2007_v51 = vld [vmem:[%s7694_s5 + $0x130] sm:$0xff] }
 0x2c9   :  { %v1766_v19 = vadd.f32 %v6464_v17, %v1765_v52  ;;  %v1909_v24 = vmax.f32 %v1763_v36, 0.0  ;;  %v2003_v36 = vld [vmem:[%s7694_s5 + $0x110] sm:$0xff] }
 0x2ca   :  { %v1912_v60 = vmax.f32 %v1774_v9, 0.0  ;;  %v2822_v33 = vpop.f32.mrb[48].mxu0 }
 0x2cb   :  { %v1910_v39 = vmax.f32 %v1766_v19, 0.0  ;;  %v2824_v57 = vpop.f32.mrb[49].mxu0  ;;  %v2823_v8 = vadd.f32 %v2822_v33, %v6476_v15  ;;  %v4888_v33 = vcombine.high %v2003_v36, %v2007_v51 }
 0x2cc   :  { %v6556_v50 = vpack.c.bf16 %v1912_v60, %v1911_v40  ;;  %2428 = vmatmul.mubr.bf16.vlgmr.msra.gmra.mrb[32].mxu1 %v6100_v58  ;;  %v2826_v53 = vpop.f32.mrb[50].mxu0  ;;  %v2825_v29 = vadd.f32 %v2824_v57, %v6478_v0 }
 0x2cd   :  { %v6559_v44 = vpack.c.bf16 %v1910_v39, %v1909_v24  ;;  %v2827_v42 = vadd.f32 %v2826_v53, %v6476_v15  ;;  %3102 = vmatpush1.bf16.msra.mxu1 %v4855_v38  ;;  %v2828_v1 = vpop.f32.mrb[51].mxu0  ;;  %2437 = vmatprep.mubr.bf16.mxu1 %v7731_v25  ;;  %v4871_v38 = vcombine.low %v1987_v62, %v1991_v45 }
 0x2ce   :  { %v2829_v55 = vadd.f32 %v2828_v1, %v6478_v0  ;;  %3103 = vmatprep.subr.bf16.mxu1 %v4864_v34  ;;  %v4887_v24 = vcombine.low %v2003_v36, %v2007_v51  ;;  %v3848_v1 = vrot.slane %v6531_v4, 4 }
 0x2cf   :  { %v3945_v54 = vmax.f32 %v2823_v8, %v2827_v42  ;;  %2961 = vmatmul.mubr.bf16.gmra.mrb[104].mxu0 %v6559_v44 }
 0x2d0   :  { %v3958_v18 = vmax.f32 %v2825_v29, %v2829_v55  ;;  %2970 = vmatprep.mubr.bf16.mxu0 %v7731_v25  ;;  %v3861_v55 = vrot.slane %v6540_v61, 4  ;;  %v3849_v20 = vmax.f32 %v6531_v4, %v3848_v1 }
 0x2d1   :  { %3104 = vmatpush1.bf16.msra.mxu1 %v4863_v23 }
 0x2d2   :  { %v2832_v63 = vpop.f32.mrb[52].mxu0  ;;  %3105 = vmatprep.subr.bf16.mxu1 %v4872_v13  ;;  %v3850_v4 = vrot.slane %v3849_v20, 2 }
 0x2d3   :  { %v2833_v49 = vadd.f32 %v2832_v63, %v6476_v15  ;;  %v2834_v14 = vpop.f32.mrb[53].mxu0 }
 0x2d4   :  { %v2835_v12 = vadd.f32 %v2834_v14, %v6478_v0  ;;  %2438 = vmatmul.mubr.bf16.gmra.mrb[36].mxu1 %v6098_v26  ;;  %v2836_v28 = vpop.f32.mrb[54].mxu0 }
 0x2d5   :  { %v3946_v9 = vmax.f32 %v3945_v54, %v2833_v49  ;;  %v2837_v52 = vadd.f32 %v2836_v28, %v6476_v15  ;;  %v2838_v19 = vpop.f32.mrb[55].mxu0  ;;  %2447 = vmatprep.mubr.bf16.mxu1 %v7731_v25  ;;  %3106 = vmatpush1.bf16.msra.mxu1 %v4871_v38  ;;  %v3862_v38 = vmax.f32 %v6540_v61, %v3861_v55 }
 0x2d6   :  { %v3959_v40 = vmax.f32 %v3958_v18, %v2835_v12  ;;  %v2839_v60 = vadd.f32 %v2838_v19, %v6478_v0  ;;  %3107 = vmatprep.subr.bf16.mxu1 %v4880_v59 }
 0x2d7   :  { %v3947_v34 = vmax.f32 %v3946_v9, %v2837_v52  ;;  %2971 = vmatmul.mubr.bf16.gmra.mrb[108].mxu0 %v6556_v50  ;;  %v3863_v9 = vrot.slane %v3862_v38, 2 }
 0x2d8   :  { %v3960_v11 = vmax.f32 %v3959_v40, %v2839_v60  ;;  %2980 = vmatprep.mubr.bf16.mxu0 %v7731_v25  ;;  %v3851_v40 = vmax.f32 %v3849_v20, %v3850_v4 }
 0x2d9   :  { %3108 = vmatpush1.bf16.msra.mxu1 %v4879_v46 }
 0x2da   :  { %v2842_v39 = vpop.f32.mrb[56].mxu0  ;;  %3109 = vmatprep.subr.bf16.mxu1 %v4888_v33 }
 0x2db   :  { %v2843_v57 = vadd.f32 %v2842_v39, %v6476_v15  ;;  %v2844_v62 = vpop.f32.mrb[57].mxu0 }
 0x2dc   :  { %v2845_v45 = vadd.f32 %v2844_v62, %v6478_v0  ;;  %2448 = vmatmul.mubr.bf16.gmra.mrb[40].mxu1 %v6115_v27  ;;  %v2846_v53 = vpop.f32.mrb[58].mxu0 }
 0x2dd   :  { %v3948_v23 = vmax.f32 %v3947_v34, %v2843_v57  ;;  %v2847_v56 = vadd.f32 %v2846_v53, %v6476_v15  ;;  %v2848_v21 = vpop.f32.mrb[59].mxu0  ;;  %2457 = vmatprep.mubr.bf16.mxu1 %v7731_v25  ;;  %3110 = vmatpush1.bf16.msra.mxu1 %v4887_v24 }
 0x2de   :  { %v3961_v8 = vmax.f32 %v3960_v11, %v2845_v45  ;;  %v2849_v42 = vadd.f32 %v2848_v21, %v6478_v0  ;;  %v3864_v11 = vmax.f32 %v3862_v38, %v3863_v9  ;;  %v3852_v21 = vrot.slane %v3851_v40, 1 }
 0x2df   :  { %v3949_v29 = vmax.f32 %v3948_v23, %v2847_v56 }
 0x2e0   :  { %v3962_v13 = vmax.f32 %v3961_v8, %v2849_v42 }
 0x2e2   :  { %v2852_v54 = vpop.f32.mrb[60].mxu0 }
 0x2e3   :  { %v2853_v30 = vadd.f32 %v2852_v54, %v6476_v15  ;;  %v2854_v18 = vpop.f32.mrb[61].mxu0 }
 0x2e4   :  { %v2855_v63 = vadd.f32 %v2854_v18, %v6478_v0  ;;  %2458 = vmatmul.mubr.bf16.gmra.mrb[44].mxu1 %v6112_v10  ;;  %v2856_v59 = vpop.f32.mrb[62].mxu0 }
 0x2e5   :  { %v3950_v49 = vmax.f32 %v3949_v29, %v2853_v30  ;;  %v2857_v14 = vadd.f32 %v2856_v59, %v6476_v15  ;;  %v2858_v36 = vpop.f32.mrb[63].mxu0  ;;  %2467 = vmatprep.mubr.bf16.mxu1 %v7731_v25  ;;  %v3865_v29 = vrot.slane %v3864_v11, 1 }
 0x2e6   :  { %v3963_v51 = vmax.f32 %v3962_v13, %v2855_v63  ;;  %v2859_v12 = vadd.f32 %v2858_v36, %v6478_v0  ;;  %v3853_v63 = vmax.f32 %v3851_v40, %v3852_v21  ;;  %v2012_v40 = vld [vmem:[%s7694_s5 + $0x158] sm:$0xff] }
 0x2e7   :  { %v3951_v28 = vmax.f32 %v3950_v49, %v2857_v14  ;;  %v3866_v49 = vmax.f32 %v3864_v11, %v3865_v29  ;;  %v2016_v11 = vld [vmem:[%s7694_s5 + $0x178] sm:$0xff] }
 0x2e8   :  { %v3964_v52 = vmax.f32 %v3963_v51, %v2859_v12 }
 0x2e9   :  { %v3952_v19 = vrot.slane %v3951_v28, 4 }
 0x2ea   :  { %v3965_v61 = vrot.slane %v3964_v52, 4  ;;  %v5001_v46 = vpop.f32.mrb[8].mxu1 }
 0x2eb   :  { %v3953_v60 = vmax.f32 %v3951_v28, %v3952_v19  ;;  %v1787_v33 = vadd.f32 %v6464_v17, %v5001_v46  ;;  %v1778_v34 = vpop.f32.mrb[9].mxu1  ;;  %v2015_v46 = vld [vmem:[%s7694_s5 + $0x170] sm:$0xff] }
 0x2ec   :  { %v3966_v24 = vmax.f32 %v3964_v52, %v3965_v61  ;;  %v1779_v39 = vadd.f32 %v6464_v17, %v1778_v34  ;;  %v5002_v57 = vpop.f32.mrb[10].mxu1  ;;  %2468 = vmatmul.mubr.bf16.gmra.mrb[48].mxu1 %v6143_v43  ;;  %v2011_v61 = vld [vmem:[%s7694_s5 + $0x150] sm:$0xff] }
 0x2ed   :  { %v3954_v62 = vrot.slane %v3953_v60, 2  ;;  %v1790_v45 = vadd.f32 %v6464_v17, %v5002_v57  ;;  %v1781_v53 = vpop.f32.mrb[11].mxu1  ;;  %2477 = vmatprep.mubr.bf16.mxu1 %v7731_v25  ;;  %v1915_v42 = vmax.f32 %v1787_v33, 0.0  ;;  %v4896_v34 = vcombine.high %v2011_v61, %v2015_v46 }
 0x2ee   :  { %v3967_v23 = vrot.slane %v3966_v24, 2  ;;  %v1782_v56 = vadd.f32 %v6464_v17, %v1781_v53  ;;  %v1913_v13 = vmax.f32 %v1779_v39, 0.0  ;;  %v4895_v39 = vcombine.low %v2011_v61, %v2015_v46 }
 0x2ef   :  { %v3955_v8 = vmax.f32 %v3953_v60, %v3954_v62  ;;  %v1916_v1 = vmax.f32 %v1790_v45, 0.0  ;;  %v4898_v57 = vcombine.high %v2012_v40, %v2016_v11  ;;  %3111 = vmatprep.subr.bf16.mxu1 %v4896_v34  ;;  %v4897_v45 = vcombine.low %v2012_v40, %v2016_v11  ;;  %v2024_v40 = vld [vmem:[%s7694_s5 + $0x1b8] sm:$0xff] }
 0x2f0   :  { %v3968_v55 = vmax.f32 %v3966_v24, %v3967_v23  ;;  %v1914_v54 = vmax.f32 %v1782_v56, 0.0  ;;  %3112 = vmatpush1.bf16.msra.mxu1 %v4895_v39 }
 0x2f1   :  { %v3956_v20 = vrot.slane %v3955_v8, 1  ;;  %v6613_v30 = vpack.c.bf16 %v1916_v1, %v1915_v42  ;;  %3464 = vmatprep.subr.bf16.mxu0 %v4898_v57 }
 0x2f2   :  { %v3969_v18 = vrot.slane %v3968_v55, 1  ;;  %v6615_v38 = vpack.c.bf16 %v1914_v54, %v1913_v13  ;;  %3465 = vmatpush1.bf16.msra.mxu0 %v4897_v45 }
 0x2f3   :  { %v3957_v59 = vmax.f32 %v3955_v8, %v3956_v20 }
 0x2f4   :  { %v3970_v14 = vmax.f32 %v3968_v55, %v3969_v18  ;;  %2478 = vmatmul.mubr.bf16.gmra.mrb[52].mxu1 %v6140_v35  ;;  %2981 = vmatmul.mubr.bf16.gmra.mrb[112].mxu0 %v6615_v38 }
 0x2f5   :  { %v6620_v36 = vsel %vm4711_vm1, %v3957_v59, %v3853_v63  ;;  %v2862_v51 = vpop.f32.mrb[64].mxu0  ;;  %2487 = vmatprep.mubr.bf16.mxu1 %v7731_v25  ;;  %2990 = vmatprep.mubr.bf16.mxu0 %v7731_v25 }
 0x2f6   :  { %v6625_v12 = vsel %vm4711_vm1, %v3970_v14, %v3866_v49  ;;  %v2864_v4 = vpop.f32.mrb[65].mxu0  ;;  %v2863_v9 = vadd.f32 %v2862_v51, %v6476_v15 }
 0x2f7   :  { %v2866_v28 = vpop.f32.mrb[66].mxu0  ;;  %v2865_v60 = vadd.f32 %v2864_v4, %v6478_v0 }
 0x2f8   :  { %v2867_v52 = vadd.f32 %v2866_v28, %v6476_v15  ;;  %v2868_v19 = vpop.f32.mrb[67].mxu0  ;;  %v2019_v28 = vld [vmem:[%s7694_s5 + $0x190] sm:$0xff] }
 0x2f9   :  { %v2869_v33 = vadd.f32 %v2868_v19, %v6478_v0 }
 0x2fa   :  { %v4049_v24 = vmax.f32 %v2863_v9, %v2867_v52  ;;  %v2023_v9 = vld [vmem:[%s7694_s5 + $0x1b0] sm:$0xff]  ;;  %v2020_v52 = vld [vmem:[%s7694_s5 + $0x198] sm:$0xff] }
 0x2fb   :  { %v4062_v62 = vmax.f32 %v2865_v60, %v2869_v33  ;;  %v4903_v61 = vcombine.low %v2019_v28, %v2023_v9  ;;  %v4904_v46 = vcombine.high %v2019_v28, %v2023_v9  ;;  %v4905_v34 = vcombine.low %v2020_v52, %v2024_v40 }
 0x2fc   :  { %2488 = vmatmul.mubr.bf16.gmra.mrb[56].mxu1 %v6180_v16  ;;  %2991 = vmatmul.mubr.bf16.gmra.mrb[116].mxu0 %v6613_v30  ;;  %v4906_v11 = vcombine.high %v2020_v52, %v2024_v40 }
 0x2fd   :  { %v2872_v53 = vpop.f32.mrb[68].mxu0  ;;  %2497 = vmatprep.mubr.bf16.mxu1 %v7731_v25  ;;  %3000 = vmatprep.mubr.bf16.mxu0 %v7731_v25 }
 0x2fe   :  { %v2873_v23 = vadd.f32 %v2872_v53, %v6476_v15  ;;  %v2874_v56 = vpop.f32.mrb[69].mxu0  ;;  %3113 = vmatprep.subr.bf16.mxu1 %v4904_v46  ;;  %3466 = vmatprep.subr.bf16.mxu0 %v4906_v11  ;;  %v2028_v11 = vld [vmem:[%s7694_s5 + $0x1d8] sm:$0xff] }
 0x2ff   :  { %v2875_v21 = vadd.f32 %v2874_v56, %v6478_v0  ;;  %v2876_v8 = vpop.f32.mrb[70].mxu0  ;;  %3114 = vmatpush1.bf16.msra.mxu1 %v4903_v61  ;;  %3467 = vmatpush1.bf16.msra.mxu0 %v4905_v34 }
 0x300   :  { %v4050_v42 = vmax.f32 %v4049_v24, %v2873_v23  ;;  %v2877_v1 = vadd.f32 %v2876_v8, %v6476_v15  ;;  %v2878_v29 = vpop.f32.mrb[71].mxu0 }
 0x301   :  { %v4063_v55 = vmax.f32 %v4062_v62, %v2875_v21  ;;  %v2879_v13 = vadd.f32 %v2878_v29, %v6478_v0 }
 0x302   :  { %v4051_v54 = vmax.f32 %v4050_v42, %v2877_v1 }
 0x303   :  { %v4064_v20 = vmax.f32 %v4063_v55, %v2879_v13 }
 0x304   :  { %2498 = vmatmul.mubr.bf16.gmra.mrb[60].mxu1 %v6177_v5 }
 0x305   :  { %2507 = vmatprep.mubr.bf16.mxu1 %v7731_v25 }
 0x30b   :  { %v5005_v18 = vpop.f32.mrb[12].mxu1 }
 0x30c   :  { %v1803_v63 = vadd.f32 %v6464_v17, %v5005_v18  ;;  %v1794_v59 = vpop.f32.mrb[13].mxu1  ;;  %2508 = vmatmul.mubr.bf16.gmra.mrb[64].mxu1 %v6241_v47 }
 0x30d   :  { %v1795_v49 = vadd.f32 %v6464_v17, %v1794_v59  ;;  %v5006_v14 = vpop.f32.mrb[14].mxu1  ;;  %2517 = vmatprep.mubr.bf16.mxu1 %v7731_v25 }
 0x30e   :  { %v1806_v51 = vadd.f32 %v6464_v17, %v5006_v14  ;;  %v1797_v4 = vpop.f32.mrb[15].mxu1  ;;  %v1919_v60 = vmax.f32 %v1803_v63, 0.0 }
 0x30f   :  { %v1798_v19 = vadd.f32 %v6464_v17, %v1797_v4  ;;  %v1917_v24 = vmax.f32 %v1795_v49, 0.0 }
 0x310   :  { %v1920_v33 = vmax.f32 %v1806_v51, 0.0 }
 0x311   :  { %v1918_v39 = vmax.f32 %v1798_v19, 0.0 }
 0x312   :  { %v6671_v57 = vpack.c.bf16 %v1920_v33, %v1919_v60 }
 0x313   :  { %v6673_v62 = vpack.c.bf16 %v1918_v39, %v1917_v24  ;;  %v2032_v24 = vld [vmem:[%s7694_s5 + $0x1f8] sm:$0xff] }
 0x314   :  { %2518 = vmatmul.mubr.bf16.gmra.mrb[68].mxu1 %v6237_v41 }
 0x315   :  { %3001 = vmatmul.mubr.bf16.gmra.mrb[120].mxu0 %v6673_v62  ;;  %2527 = vmatprep.mubr.bf16.mxu1 %v7731_v25 }
 0x316   :  { %v2882_v45 = vpop.f32.mrb[72].mxu0  ;;  %3010 = vmatprep.mubr.bf16.mxu0 %v7731_v25 }
 0x317   :  { %v2883_v53 = vadd.f32 %v2882_v45, %v6476_v15  ;;  %v2884_v23 = vpop.f32.mrb[73].mxu0  ;;  %v4914_v45 = vcombine.high %v2028_v11, %v2032_v24 }
 0x318   :  { %v2885_v56 = vadd.f32 %v2884_v23, %v6478_v0  ;;  %v2886_v21 = vpop.f32.mrb[74].mxu0  ;;  %v4913_v23 = vcombine.low %v2028_v11, %v2032_v24 }
 0x319   :  { %v4052_v8 = vmax.f32 %v4051_v54, %v2883_v53  ;;  %v2887_v42 = vadd.f32 %v2886_v21, %v6476_v15  ;;  %v2888_v1 = vpop.f32.mrb[75].mxu0  ;;  %3468 = vmatprep.subr.bf16.mxu0 %v4914_v45 }
 0x31a   :  { %v4065_v29 = vmax.f32 %v4064_v20, %v2885_v56  ;;  %v2889_v55 = vadd.f32 %v2888_v1, %v6478_v0  ;;  %3469 = vmatpush1.bf16.msra.mxu0 %v4913_v23 }
 0x31b   :  { %v4053_v13 = vmax.f32 %v4052_v8, %v2887_v42  ;;  %v2027_v8 = vld [vmem:[%s7694_s5 + $0x1d0] sm:$0xff] }
 0x31c   :  { %v4066_v18 = vmax.f32 %v4065_v29, %v2889_v55  ;;  %2528 = vmatmul.mubr.bf16.gmra.mrb[72].mxu1 %v6322_v22  ;;  %v2031_v42 = vld [vmem:[%s7694_s5 + $0x1f0] sm:$0xff] }
 0x31d   :  { %3011 = vmatmul.mubr.bf16.gmra.mrb[124].mxu0 %v6671_v57  ;;  %2537 = vmatprep.mubr.bf16.mxu1 %v7731_v25  ;;  %v4911_v29 = vcombine.low %v2027_v8, %v2031_v42  ;;  %v4912_v55 = vcombine.high %v2027_v8, %v2031_v42 }
 0x31e   :  { %v2892_v63 = vpop.f32.mrb[76].mxu0  ;;  %3020 = vmatprep.mubr.bf16.mxu0 %v7731_v25 }
 0x31f   :  { %v2893_v59 = vadd.f32 %v2892_v63, %v6476_v15  ;;  %v2894_v54 = vpop.f32.mrb[77].mxu0  ;;  %3115 = vmatprep.subr.bf16.mxu1 %v4912_v55 }
 0x320   :  { %v2895_v49 = vadd.f32 %v2894_v54, %v6478_v0  ;;  %v2896_v14 = vpop.f32.mrb[78].mxu0  ;;  %3116 = vmatpush1.bf16.msra.mxu1 %v4911_v29 }
 0x321   :  { %v4054_v20 = vmax.f32 %v4053_v13, %v2893_v59  ;;  %v2897_v51 = vadd.f32 %v2896_v14, %v6476_v15  ;;  %v2898_v4 = vpop.f32.mrb[79].mxu0 }
 0x322   :  { %v4067_v28 = vmax.f32 %v4066_v18, %v2895_v49  ;;  %v2899_v9 = vadd.f32 %v2898_v4, %v6478_v0 }
 0x323   :  { %v4055_v52 = vmax.f32 %v4054_v20, %v2897_v51 }
 0x324   :  { %v4068_v19 = vmax.f32 %v4067_v28, %v2899_v9  ;;  %2538 = vmatmul.mubr.bf16.gmra.mrb[76].mxu1 %v6315_v7 }
 0x325   :  { %v4056_v61 = vrot.slane %v4055_v52, 4  ;;  %2547 = vmatprep.mubr.bf16.mxu1 %v7731_v25 }
 0x326   :  { %v4069_v46 = vrot.slane %v4068_v19, 4 }
 0x327   :  { %v4057_v40 = vmax.f32 %v4055_v52, %v4056_v61 }
 0x328   :  { %v4070_v60 = vmax.f32 %v4068_v19, %v4069_v46 }
 0x329   :  { %v4058_v33 = vrot.slane %v4057_v40, 2 }
 0x32a   :  { %v4071_v34 = vrot.slane %v4070_v60, 2 }
 0x32b   :  { %v4059_v39 = vmax.f32 %v4057_v40, %v4058_v33 }
 0x32c   :  { %v4072_v53 = vmax.f32 %v4070_v60, %v4071_v34  ;;  %2548 = vmatmul.mubr.bf16.gmra.mrb[80].mxu1 %v6387_v6 }
 0x32d   :  { %v4060_v56 = vrot.slane %v4059_v39, 1  ;;  %2557 = vmatprep.mubr.bf16.mxu1 %v7731_v25 }
 0x32e   :  { %v4073_v21 = vrot.slane %v4072_v53, 1 }
 0x32f   :  { %v4061_v1 = vmax.f32 %v4059_v39, %v4060_v56 }
 0x330   :  { %v4074_v13 = vmax.f32 %v4072_v53, %v4073_v21  ;;  %v5009_v18 = vpop.f32.mrb[16].mxu1 }
 0x331   :  { %v6709_v63 = vsel %vm4713_vm2, %v4061_v1, %v6620_v36  ;;  %v1819_v59 = vadd.f32 %v6464_v17, %v5009_v18  ;;  %v1810_v54 = vpop.f32.mrb[17].mxu1 }
 0x332   :  { %v6714_v49 = vsel %vm4713_vm2, %v4074_v13, %v6625_v12  ;;  %v1811_v14 = vadd.f32 %v6464_v17, %v1810_v54  ;;  %v5010_v20 = vpop.f32.mrb[18].mxu1 }
 0x333   :  { %v1822_v51 = vadd.f32 %v6464_v17, %v5010_v20  ;;  %v1813_v4 = vpop.f32.mrb[19].mxu1  ;;  %v1923_v36 = vmax.f32 %v1819_v59, 0.0 }
 0x334   :  { %v1814_v28 = vadd.f32 %v6464_v17, %v1813_v4  ;;  %2558 = vmatmul.mubr.bf16.gmra.mrb[84].mxu1 %v6382_v32  ;;  %v1921_v52 = vmax.f32 %v1811_v14, 0.0 }
 0x335   :  { %v1924_v9 = vmax.f32 %v1822_v51, 0.0  ;;  %2567 = vmatprep.mubr.bf16.mxu1 %v7731_v25 }
 0x336   :  { %v1922_v19 = vmax.f32 %v1814_v28, 0.0 }
 0x337   :  { %v6721_v61 = vpack.c.bf16 %v1924_v9, %v1923_v36 }
 0x338   :  { %v6723_v12 = vpack.c.bf16 %v1922_v19, %v1921_v52 }
 0x33a   :  { %3021 = vmatmul.mubr.bf16.gmra.mrb[128].mxu0 %v6723_v12 }
 0x33b   :  { %v2902_v46 = vpop.f32.mrb[80].mxu0  ;;  %3030 = vmatprep.mubr.bf16.mxu0 %v7731_v25 }
 0x33c   :  { %2568 = vmatmul.mubr.bf16.gmra.mrb[88].mxu1 %v6433_v37  ;;  %v2904_v40 = vpop.f32.mrb[81].mxu0  ;;  %v2903_v33 = vadd.f32 %v2902_v46, %v6476_v15 }
 0x33d   :  { %v2906_v60 = vpop.f32.mrb[82].mxu0  ;;  %2577 = vmatprep.mubr.bf16.mxu1 %v7731_v25  ;;  %v2905_v24 = vadd.f32 %v2904_v40, %v6478_v0 }
 0x33e   :  { %v2907_v34 = vadd.f32 %v2906_v60, %v6476_v15  ;;  %v2908_v11 = vpop.f32.mrb[83].mxu0 }
 0x33f   :  { %v2909_v39 = vadd.f32 %v2908_v11, %v6478_v0 }
 0x340   :  { %v4153_v45 = vmax.f32 %v2903_v33, %v2907_v34 }
 0x341   :  { %v4166_v53 = vmax.f32 %v2905_v24, %v2909_v39 }
 0x342   :  { %3031 = vmatmul.mubr.bf16.gmra.mrb[132].mxu0 %v6721_v61 }
 0x343   :  { %v2912_v23 = vpop.f32.mrb[84].mxu0  ;;  %3040 = vmatprep.mubr.bf16.mxu0 %v7731_v25 }
 0x344   :  { %v2913_v56 = vadd.f32 %v2912_v23, %v6476_v15  ;;  %2578 = vmatmul.mubr.bf16.gmra.mrb[92].mxu1 %v6431_v2  ;;  %v2914_v21 = vpop.f32.mrb[85].mxu0 }
 0x345   :  { %v2915_v8 = vadd.f32 %v2914_v21, %v6478_v0  ;;  %v2916_v42 = vpop.f32.mrb[86].mxu0  ;;  %2587 = vmatprep.mubr.bf16.mxu1 %v7731_v25 }
 0x346   :  { %v4154_v1 = vmax.f32 %v4153_v45, %v2913_v56  ;;  %v2917_v29 = vadd.f32 %v2916_v42, %v6476_v15  ;;  %v2918_v55 = vpop.f32.mrb[87].mxu0 }
 0x347   :  { %v4167_v13 = vmax.f32 %v4166_v53, %v2915_v8  ;;  %v2919_v18 = vadd.f32 %v2918_v55, %v6478_v0 }
 0x348   :  { %v4155_v59 = vmax.f32 %v4154_v1, %v2917_v29 }
 0x349   :  { %v4168_v54 = vmax.f32 %v4167_v13, %v2919_v18 }
 0x34c   :  { %2588 = vmatmul.mubr.bf16.gmra.mrb[96].mxu1 %v6483_v3 }
 0x34d   :  { %2597 = vmatprep.mubr.bf16.mxu1 %v7731_v25 }
 0x351   :  { %v5013_v14 = vpop.f32.mrb[20].mxu1 }
 0x352   :  { %v1835_v20 = vadd.f32 %v6464_v17, %v5013_v14  ;;  %v1826_v51 = vpop.f32.mrb[21].mxu1 }
 0x353   :  { %v1827_v4 = vadd.f32 %v6464_v17, %v1826_v51  ;;  %v5014_v28 = vpop.f32.mrb[22].mxu1 }
 0x354   :  { %v1838_v36 = vadd.f32 %v6464_v17, %v5014_v28  ;;  %v1829_v9 = vpop.f32.mrb[23].mxu1  ;;  %2598 = vmatmul.mubr.bf16.gmra.mrb[100].mxu1 %v6481_v48  ;;  %v1927_v19 = vmax.f32 %v1835_v20, 0.0 }
 0x355   :  { %v1830_v52 = vadd.f32 %v6464_v17, %v1829_v9  ;;  %2607 = vmatprep.mubr.bf16.mxu1 %v7731_v25  ;;  %v1925_v40 = vmax.f32 %v1827_v4, 0.0 }
 0x356   :  { %v1928_v46 = vmax.f32 %v1838_v36, 0.0 }
 0x357   :  { %v1926_v60 = vmax.f32 %v1830_v52, 0.0 }
 0x358   :  { %v6749_v33 = vpack.c.bf16 %v1928_v46, %v1927_v19 }
 0x359   :  { %v6751_v34 = vpack.c.bf16 %v1926_v60, %v1925_v40 }
 0x35b   :  { %3041 = vmatmul.mubr.bf16.gmra.mrb[136].mxu0 %v6751_v34 }
 0x35c   :  { %2608 = vmatmul.mubr.bf16.gmra.mrb[104].mxu1 %v6559_v44  ;;  %v2922_v11 = vpop.f32.mrb[88].mxu0  ;;  %3050 = vmatprep.mubr.bf16.mxu0 %v7731_v25 }
 0x35d   :  { %v2923_v24 = vadd.f32 %v2922_v11, %v6476_v15  ;;  %v2924_v39 = vpop.f32.mrb[89].mxu0  ;;  %2617 = vmatprep.mubr.bf16.mxu1 %v7731_v25 }
 0x35e   :  { %v2925_v45 = vadd.f32 %v2924_v39, %v6478_v0  ;;  %v2926_v53 = vpop.f32.mrb[90].mxu0 }
 0x35f   :  { %v4156_v23 = vmax.f32 %v4155_v59, %v2923_v24  ;;  %v2927_v56 = vadd.f32 %v2926_v53, %v6476_v15  ;;  %v2928_v21 = vpop.f32.mrb[91].mxu0 }
 0x360   :  { %v4169_v8 = vmax.f32 %v4168_v54, %v2925_v45  ;;  %v2929_v42 = vadd.f32 %v2928_v21, %v6478_v0 }
 0x361   :  { %v4157_v1 = vmax.f32 %v4156_v23, %v2927_v56 }
 0x362   :  { %v4170_v29 = vmax.f32 %v4169_v8, %v2929_v42 }
 0x363   :  { %3051 = vmatmul.mubr.bf16.gmra.mrb[140].mxu0 %v6749_v33 }
 0x364   :  { %2618 = vmatmul.mubr.bf16.gmra.mrb[108].mxu1 %v6556_v50  ;;  %v2932_v55 = vpop.f32.mrb[92].mxu0  ;;  %3060 = vmatprep.mubr.bf16.mxu0 %v7731_v25 }
 0x365   :  { %v2933_v13 = vadd.f32 %v2932_v55, %v6476_v15  ;;  %v2934_v18 = vpop.f32.mrb[93].mxu0  ;;  %2627 = vmatprep.mubr.bf16.mxu1 %v7731_v25  ;;  %v5135_v55 = vld [vmem:[%s7693_s4] ss:$0 sm:$0xff] }
 0x366   :  { %v2935_v59 = vadd.f32 %v2934_v18, %v6478_v0  ;;  %v2936_v14 = vpop.f32.mrb[94].mxu0 }
 0x367   :  { %v4158_v54 = vmax.f32 %v4157_v1, %v2933_v13  ;;  %v2937_v20 = vadd.f32 %v2936_v14, %v6476_v15  ;;  %v2938_v51 = vpop.f32.mrb[95].mxu0 }
 0x368   :  { %v4171_v4 = vmax.f32 %v4170_v29, %v2935_v59  ;;  %v2939_v28 = vadd.f32 %v2938_v51, %v6478_v0 }
 0x369   :  { %v4159_v36 = vmax.f32 %v4158_v54, %v2937_v20 }
 0x36a   :  { %v4172_v9 = vmax.f32 %v4171_v4, %v2939_v28 }
 0x36b   :  { %v4160_v52 = vrot.slane %v4159_v36, 4 }
 0x36c   :  { %v4173_v19 = vrot.slane %v4172_v9, 4  ;;  %2628 = vmatmul.mubr.bf16.gmra.mrb[112].mxu1 %v6615_v38 }
 0x36d   :  { %v4161_v46 = vmax.f32 %v4159_v36, %v4160_v52  ;;  %2637 = vmatprep.mubr.bf16.mxu1 %v7731_v25 }
 0x36e   :  { %v4174_v40 = vmax.f32 %v4172_v9, %v4173_v19 }
 0x36f   :  { %v4162_v60 = vrot.slane %v4161_v46, 2 }
 0x370   :  { %v4175_v11 = vrot.slane %v4174_v40, 2 }
 0x371   :  { %v4163_v24 = vmax.f32 %v4161_v46, %v4162_v60 }
 0x372   :  { %v4176_v39 = vmax.f32 %v4174_v40, %v4175_v11 }
 0x373   :  { %v4164_v45 = vrot.slane %v4163_v24, 1 }
 0x374   :  { %v4177_v53 = vrot.slane %v4176_v39, 1  ;;  %2638 = vmatmul.mubr.bf16.gmra.mrb[116].mxu1 %v6613_v30 }
 0x375   :  { %v4165_v23 = vmax.f32 %v4163_v24, %v4164_v45  ;;  %2647 = vmatprep.mubr.bf16.mxu1 %v7731_v25 }
 0x376   :  { %v4178_v56 = vmax.f32 %v4176_v39, %v4177_v53  ;;  %v5017_v21 = vpop.f32.mrb[24].mxu1 }
 0x377   :  { %v6775_v8 = vsel %vm4715_vm3, %v4165_v23, %v6709_v63  ;;  %v1851_v42 = vadd.f32 %v6464_v17, %v5017_v21  ;;  %v1842_v1 = vpop.f32.mrb[25].mxu1 }
 0x378   :  { %v6780_v29 = vsel %vm4715_vm3, %v4178_v56, %v6714_v49  ;;  %v1843_v13 = vadd.f32 %v5135_v55, %v1842_v1  ;;  %v5018_v18 = vpop.f32.mrb[26].mxu1 }
 0x379   :  { %v1854_v59 = vadd.f32 %v5135_v55, %v5018_v18  ;;  %v1845_v14 = vpop.f32.mrb[27].mxu1  ;;  %v1931_v20 = vmax.f32 %v1851_v42, 0.0 }
 0x37a   :  { %v1846_v54 = vadd.f32 %v5135_v55, %v1845_v14  ;;  %v1929_v63 = vmax.f32 %v1843_v13, 0.0 }
 0x37b   :  { %v1932_v51 = vmax.f32 %v1854_v59, 0.0 }
 0x37c   :  { %v1930_v4 = vmax.f32 %v1846_v54, 0.0  ;;  %2648 = vmatmul.mubr.bf16.gmra.mrb[120].mxu1 %v6673_v62 }
 0x37d   :  { %v6786_v17 = vpack.c.bf16 %v1932_v51, %v1931_v20  ;;  %2657 = vmatprep.mubr.bf16.mxu1 %v7731_v25 }
 0x37e   :  { %v6789_v49 = vpack.c.bf16 %v1930_v4, %v1929_v63 }
 0x37f   :  { %7745 = vst [vmem:[#allocation8_spill] sm:$0xff] %v6786_v17 }
 0x380   :  { %3061 = vmatmul.mubr.bf16.gmra.mrb[144].mxu0 %v6789_v49 }
 0x381   :  { %v2942_v28 = vpop.f32.mrb[96].mxu0  ;;  %3070 = vmatprep.mubr.bf16.mxu0 %v7731_v25 }
 0x382   :  { %v2944_v36 = vpop.f32.mrb[97].mxu0  ;;  %v2943_v52 = vadd.f32 %v2942_v28, %v6476_v15 }
 0x383   :  { %v2946_v9 = vpop.f32.mrb[98].mxu0  ;;  %v2945_v40 = vadd.f32 %v2944_v36, %v6478_v0 }
 0x384   :  { %v2947_v19 = vadd.f32 %v2946_v9, %v6476_v15  ;;  %2658 = vmatmul.mubr.bf16.gmra.mrb[124].mxu1 %v6671_v57  ;;  %v2948_v46 = vpop.f32.mrb[99].mxu0 }
 0x385   :  { %v2949_v60 = vadd.f32 %v2948_v46, %v6478_v0  ;;  %2667 = vmatprep.mubr.bf16.mxu1 %v7731_v25 }
 0x386   :  { %v4257_v11 = vmax.f32 %v2943_v52, %v2947_v19 }
 0x387   :  { %v4270_v24 = vmax.f32 %v2945_v40, %v2949_v60 }
 0x388   :  { %3071 = vmatmul.mubr.bf16.gmra.mrb[148].mxu0 %v6786_v17 }
 0x389   :  { %v2952_v39 = vpop.f32.mrb[100].mxu0  ;;  %3080 = vmatprep.mubr.bf16.mxu0 %v7731_v25 }
 0x38a   :  { %v2953_v45 = vadd.f32 %v2952_v39, %v6476_v15  ;;  %v2954_v53 = vpop.f32.mrb[101].mxu0 }
 0x38b   :  { %v2955_v23 = vadd.f32 %v2954_v53, %v6478_v0  ;;  %v2956_v56 = vpop.f32.mrb[102].mxu0  ;;  %v7749_v53 = vsub.s32 1, %v7743_v31 }
 0x38c   :  { %v4258_v21 = vmax.f32 %v4257_v11, %v2953_v45  ;;  %v2957_v42 = vadd.f32 %v2956_v56, %v6476_v15  ;;  %2668 = vmatmul.mubr.bf16.gmra.mrb[128].mxu1 %v6723_v12  ;;  %v2958_v1 = vpop.f32.mrb[103].mxu0  ;;  %v5136_v11 = vld [vmem:[%s7695_s6] sm:$0xff] }
 0x38d   :  { %v4271_v13 = vmax.f32 %v4270_v24, %v2955_v23  ;;  %v2959_v18 = vadd.f32 %v2958_v1, %v6478_v0  ;;  %2677 = vmatprep.mubr.bf16.mxu1 %v7731_v25  ;;  %v7747_v24 = vsub.s32 0, %v7743_v31  ;;  %v6824_v23 = vrot.slane %v5136_v11, %v7749_v53 }
 0x38e   :  { %v4259_v59 = vmax.f32 %v4258_v21, %v2957_v42 }
 0x38f   :  { %v4272_v14 = vmax.f32 %v4271_v13, %v2959_v18  ;;  %v6818_v39 = vrot.slane %v5136_v11, %v7747_v24 }
 0x394   :  { %2678 = vmatmul.mubr.bf16.gmra.mrb[132].mxu1 %v6721_v61 }
 0x395   :  { %2687 = vmatprep.mubr.bf16.mxu1 %v7731_v25 }
 0x397   :  { %v5021_v54 = vpop.f32.mrb[28].mxu1 }
 0x398   :  { %v1867_v20 = vadd.f32 %v5135_v55, %v5021_v54  ;;  %v1858_v51 = vpop.f32.mrb[29].mxu1 }
 0x399   :  { %v1859_v63 = vadd.f32 %v5135_v55, %v1858_v51  ;;  %v5022_v4 = vpop.f32.mrb[30].mxu1 }
 0x39a   :  { %v1870_v28 = vadd.f32 %v5135_v55, %v5022_v4  ;;  %v1861_v36 = vpop.f32.mrb[31].mxu1  ;;  %v1935_v52 = vmax.f32 %v1867_v20, 0.0 }
 0x39b   :  { %v1862_v9 = vadd.f32 %v5135_v55, %v1861_v36  ;;  %v1933_v46 = vmax.f32 %v1859_v63, 0.0 }
 0x39c   :  { %v1936_v19 = vmax.f32 %v1870_v28, 0.0  ;;  %2688 = vmatmul.mubr.bf16.gmra.mrb[136].mxu1 %v6751_v34 }
 0x39d   :  { %v1934_v40 = vmax.f32 %v1862_v9, 0.0  ;;  %2697 = vmatprep.mubr.bf16.mxu1 %v7731_v25 }
 0x39e   :  { %v6811_v60 = vpack.c.bf16 %v1936_v19, %v1935_v52 }
 0x39f   :  { %v6820_v45 = vpack.c.bf16 %v1934_v40, %v1933_v46  ;;  %v2429_v55 = vpop.f32.mrb[32].mxu1 }
 0x3a0   :  { %7746 = vst [vmem:[#allocation11_spill] sm:$0xff] %v6811_v60  ;;  %v2431_v56 = vpop.f32.mrb[33].mxu1  ;;  %v2430_v42 = vadd.f32 %v2429_v55, %v6818_v39 }
 0x3a1   :  { %7748 = vst [vmem:[#allocation12_spill] sm:$0xff] %v6820_v45  ;;  %v2433_v21 = vpop.f32.mrb[34].mxu1  ;;  %3081 = vmatmul.mubr.bf16.gmra.mrb[152].mxu0 %v6820_v45  ;;  %v2432_v54 = vadd.f32 %v2431_v56, %v6824_v23 }
 0x3a2   :  { %v2434_v1 = vadd.f32 %v2433_v21, %v6818_v39  ;;  %v2435_v13 = vpop.f32.mrb[35].mxu1  ;;  %v2962_v18 = vpop.f32.mrb[104].mxu0  ;;  %3090 = vmatprep.mubr.bf16.mxu0 %v7731_v25 }
 0x3a3   :  { %v2436_v20 = vadd.f32 %v2435_v13, %v6824_v23  ;;  %v2963_v51 = vadd.f32 %v2962_v18, %v6476_v15  ;;  %v2964_v63 = vpop.f32.mrb[105].mxu0 }
 0x3a4   :  { %v3815_v4 = vmax.f32 %v2430_v42, %v2434_v1  ;;  %v2965_v28 = vadd.f32 %v2964_v63, %v6478_v0  ;;  %2698 = vmatmul.mubr.bf16.gmra.mrb[140].mxu1 %v6749_v33  ;;  %v2966_v36 = vpop.f32.mrb[106].mxu0 }
 0x3a5   :  { %v3828_v9 = vmax.f32 %v2432_v54, %v2436_v20  ;;  %v4260_v52 = vmax.f32 %v4259_v59, %v2963_v51  ;;  %v2967_v19 = vadd.f32 %v2966_v36, %v6476_v15  ;;  %v2968_v46 = vpop.f32.mrb[107].mxu0  ;;  %2707 = vmatprep.mubr.bf16.mxu1 %v7731_v25 }
 0x3a6   :  { %v4273_v40 = vmax.f32 %v4272_v14, %v2965_v28  ;;  %v2969_v11 = vadd.f32 %v2968_v46, %v6478_v0 }
 0x3a7   :  { %v4261_v24 = vmax.f32 %v4260_v52, %v2967_v19  ;;  %v2439_v55 = vpop.f32.mrb[36].mxu1 }
 0x3a8   :  { %v4274_v53 = vmax.f32 %v4273_v40, %v2969_v11  ;;  %v2440_v56 = vadd.f32 %v2439_v55, %v6818_v39  ;;  %v2441_v21 = vpop.f32.mrb[37].mxu1 }
 0x3a9   :  { %v2442_v42 = vadd.f32 %v2441_v21, %v6824_v23  ;;  %v2443_v1 = vpop.f32.mrb[38].mxu1  ;;  %3091 = vmatmul.mubr.bf16.gmra.mrb[156].mxu0 %v6811_v60 }
 0x3aa   :  { %v3816_v59 = vmax.f32 %v3815_v4, %v2440_v56  ;;  %v2444_v13 = vadd.f32 %v2443_v1, %v6818_v39  ;;  %v2445_v18 = vpop.f32.mrb[39].mxu1  ;;  %v2972_v54 = vpop.f32.mrb[108].mxu0  ;;  %3486 = vmatprep.mubr.bf16.mxu0 %v7731_v25 }
 0x3ab   :  { %v3829_v14 = vmax.f32 %v3828_v9, %v2442_v42  ;;  %v2446_v20 = vadd.f32 %v2445_v18, %v6824_v23  ;;  %v2973_v51 = vadd.f32 %v2972_v54, %v6476_v15  ;;  %v2974_v63 = vpop.f32.mrb[109].mxu0 }
 0x3ac   :  { %v3817_v28 = vmax.f32 %v3816_v59, %v2444_v13  ;;  %v2975_v36 = vadd.f32 %v2974_v63, %v6478_v0  ;;  %2708 = vmatmul.mubr.bf16.gmra.mrb[144].mxu1 %v6789_v49  ;;  %v2976_v52 = vpop.f32.mrb[110].mxu0 }
 0x3ad   :  { %v3830_v19 = vmax.f32 %v3829_v14, %v2446_v20  ;;  %v4262_v4 = vmax.f32 %v4261_v24, %v2973_v51  ;;  %v2977_v46 = vadd.f32 %v2976_v52, %v6476_v15  ;;  %v2978_v40 = vpop.f32.mrb[111].mxu0  ;;  %2717 = vmatprep.mubr.bf16.mxu1 %v7731_v25 }
 0x3ae   :  { %v4275_v11 = vmax.f32 %v4274_v53, %v2975_v36  ;;  %v2979_v9 = vadd.f32 %v2978_v40, %v6478_v0 }
 0x3af   :  { %v4263_v55 = vmax.f32 %v4262_v4, %v2977_v46  ;;  %v2449_v56 = vpop.f32.mrb[40].mxu1 }
 0x3b0   :  { %v4276_v21 = vmax.f32 %v4275_v11, %v2979_v9  ;;  %v2450_v42 = vadd.f32 %v2449_v56, %v6818_v39  ;;  %v2451_v1 = vpop.f32.mrb[41].mxu1 }
 0x3b1   :  { %v4264_v59 = vrot.slane %v4263_v55, 4  ;;  %v2452_v13 = vadd.f32 %v2451_v1, %v6824_v23  ;;  %v2453_v18 = vpop.f32.mrb[42].mxu1  ;;  %3487 = vmatmul.mubr.bf16.vlgmr.msra.gmra.mrb[160].mxu0 %v6100_v58 }
 0x3b2   :  { %v4277_v24 = vrot.slane %v4276_v21, 4  ;;  %v3818_v54 = vmax.f32 %v3817_v28, %v2450_v42  ;;  %v2454_v14 = vadd.f32 %v2453_v18, %v6818_v39  ;;  %v2455_v20 = vpop.f32.mrb[43].mxu1  ;;  %3496 = vmatprep.mubr.bf16.mxu0 %v7731_v25 }
 0x3b3   :  { %v4265_v53 = vmax.f32 %v4263_v55, %v4264_v59  ;;  %v3831_v51 = vmax.f32 %v3830_v19, %v2452_v13  ;;  %v2456_v63 = vadd.f32 %v2455_v20, %v6824_v23 }
 0x3b4   :  { %v4278_v36 = vmax.f32 %v4276_v21, %v4277_v24  ;;  %v3819_v52 = vmax.f32 %v3818_v54, %v2454_v14  ;;  %2718 = vmatmul.mubr.bf16.gmra.mrb[148].mxu1 %v6786_v17 }
 0x3b5   :  { %v4266_v4 = vrot.slane %v4265_v53, 2  ;;  %v3832_v46 = vmax.f32 %v3831_v51, %v2456_v63  ;;  %2727 = vmatprep.mubr.bf16.mxu1 %v7731_v25 }
 0x3b6   :  { %v4279_v40 = vrot.slane %v4278_v36, 2 }
 0x3b7   :  { %v4267_v11 = vmax.f32 %v4265_v53, %v4266_v4  ;;  %v2459_v28 = vpop.f32.mrb[44].mxu1 }
 0x3b8   :  { %v4280_v9 = vmax.f32 %v4278_v36, %v4279_v40  ;;  %v2460_v56 = vadd.f32 %v2459_v28, %v6818_v39  ;;  %v2461_v42 = vpop.f32.mrb[45].mxu1 }
 0x3b9   :  { %v4268_v1 = vrot.slane %v4267_v11, 1  ;;  %v2462_v19 = vadd.f32 %v2461_v42, %v6824_v23  ;;  %v2463_v55 = vpop.f32.mrb[46].mxu1  ;;  %3497 = vmatmul.mubr.bf16.gmra.mrb[164].mxu0 %v6098_v26 }
 0x3ba   :  { %v4281_v21 = vrot.slane %v4280_v9, 1  ;;  %v3820_v59 = vmax.f32 %v3819_v52, %v2460_v56  ;;  %v2464_v13 = vadd.f32 %v2463_v55, %v6818_v39  ;;  %v2465_v18 = vpop.f32.mrb[47].mxu1  ;;  %3506 = vmatprep.mubr.bf16.mxu0 %v7731_v25 }
 0x3bb   :  { %v4269_v24 = vmax.f32 %v4267_v11, %v4268_v1  ;;  %v3833_v54 = vmax.f32 %v3832_v46, %v2462_v19  ;;  %v2466_v14 = vadd.f32 %v2465_v18, %v6824_v23 }
 0x3bc   :  { %v4282_v20 = vmax.f32 %v4280_v9, %v4281_v21  ;;  %v6864_v53 = vmax.f32 %v3820_v59, %v2464_v13  ;;  %2728 = vmatmul.mubr.bf16.gmra.mrb[152].mxu1 %v6820_v45 }
 0x3bd   :  { %v6869_v51 = vsel %vm4717_vm4, %v4269_v24, %v6775_v8  ;;  %v6871_v63 = vmax.f32 %v3833_v54, %v2466_v14  ;;  %2737 = vmatprep.mubr.bf16.mxu1 %v7731_v25 }
 0x3be   :  { %v6876_v36 = vsel %vm4717_vm4, %v4282_v20, %v6780_v29 }
 0x3bf   :  { %v2469_v52 = vpop.f32.mrb[48].mxu1 }
 0x3c0   :  { %v2471_v4 = vpop.f32.mrb[49].mxu1  ;;  %v2470_v40 = vadd.f32 %v2469_v52, %v6818_v39 }
 0x3c1   :  { %v2473_v46 = vpop.f32.mrb[50].mxu1  ;;  %3507 = vmatmul.mubr.bf16.gmra.mrb[168].mxu0 %v6115_v27  ;;  %v2472_v8 = vadd.f32 %v2471_v4, %v6824_v23 }
 0x3c2   :  { %v2474_v11 = vadd.f32 %v2473_v46, %v6818_v39  ;;  %v2475_v28 = vpop.f32.mrb[51].mxu1  ;;  %3516 = vmatprep.mubr.bf16.mxu0 %v7731_v25 }
 0x3c3   :  { %v2476_v9 = vadd.f32 %v2475_v28, %v6824_v23 }
 0x3c4   :  { %v3919_v56 = vmax.f32 %v2470_v40, %v2474_v11  ;;  %2738 = vmatmul.mubr.bf16.gmra.mrb[156].mxu1 %v6811_v60 }
 0x3c5   :  { %v3932_v29 = vmax.f32 %v2472_v8, %v2476_v9  ;;  %3133 = vmatprep.mubr.bf16.mxu1 %v7731_v25 }
 0x3c7   :  { %v2479_v42 = vpop.f32.mrb[52].mxu1  ;;  %v2982_v1 = vpop.f32.mrb[112].mxu0 }
 0x3c8   :  { %v2480_v19 = vadd.f32 %v2479_v42, %v6818_v39  ;;  %v2481_v55 = vpop.f32.mrb[53].mxu1  ;;  %v2984_v21 = vpop.f32.mrb[113].mxu0  ;;  %v2983_v54 = vadd.f32 %v2982_v1, %v6476_v15 }
 0x3c9   :  { %v2482_v59 = vadd.f32 %v2481_v55, %v6824_v23  ;;  %v2483_v13 = vpop.f32.mrb[54].mxu1  ;;  %v2986_v18 = vpop.f32.mrb[114].mxu0  ;;  %3517 = vmatmul.mubr.bf16.gmra.mrb[172].mxu0 %v6112_v10  ;;  %v2985_v40 = vadd.f32 %v2984_v21, %v6478_v0 }
 0x3ca   :  { %v3920_v24 = vmax.f32 %v3919_v56, %v2480_v19  ;;  %v2484_v14 = vadd.f32 %v2483_v13, %v6818_v39  ;;  %v2987_v20 = vadd.f32 %v2986_v18, %v6476_v15  ;;  %v2485_v52 = vpop.f32.mrb[55].mxu1  ;;  %v2988_v4 = vpop.f32.mrb[115].mxu0  ;;  %3526 = vmatprep.mubr.bf16.mxu0 %v7731_v25 }
 0x3cb   :  { %v3933_v46 = vmax.f32 %v3932_v29, %v2482_v59  ;;  %v2486_v11 = vadd.f32 %v2485_v52, %v6824_v23  ;;  %v2989_v28 = vadd.f32 %v2988_v4, %v6478_v0 }
 0x3cc   :  { %v3921_v8 = vmax.f32 %v3920_v24, %v2484_v14  ;;  %v4361_v9 = vmax.f32 %v2983_v54, %v2987_v20  ;;  %3134 = vmatmul.mubr.bf16.vlgmr.msra.gmra.mrb[160].mxu1 %v6100_v58 }
 0x3cd   :  { %v3934_v56 = vmax.f32 %v3933_v46, %v2486_v11  ;;  %v4374_v42 = vmax.f32 %v2985_v40, %v2989_v28  ;;  %3143 = vmatprep.mubr.bf16.mxu1 %v7731_v25 }
 0x3cf   :  { %v2489_v1 = vpop.f32.mrb[56].mxu1  ;;  %v2992_v19 = vpop.f32.mrb[116].mxu0 }
 0x3d0   :  { %v2490_v55 = vadd.f32 %v2489_v1, %v6818_v39  ;;  %v2993_v29 = vadd.f32 %v2992_v19, %v6476_v15  ;;  %v2491_v59 = vpop.f32.mrb[57].mxu1  ;;  %v2994_v21 = vpop.f32.mrb[117].mxu0 }
 0x3d1   :  { %v2492_v13 = vadd.f32 %v2491_v59, %v6824_v23  ;;  %v2995_v18 = vadd.f32 %v2994_v21, %v6478_v0  ;;  %v2493_v24 = vpop.f32.mrb[58].mxu1  ;;  %v2996_v54 = vpop.f32.mrb[118].mxu0  ;;  %3527 = vmatmul.mubr.bf16.gmra.mrb[176].mxu0 %v6143_v43 }
 0x3d2   :  { %v3922_v58 = vmax.f32 %v3921_v8, %v2490_v55  ;;  %v6903_v14 = vmax.f32 %v4361_v9, %v2993_v29  ;;  %v2494_v20 = vadd.f32 %v2493_v24, %v6818_v39  ;;  %v6907_v52 = vadd.f32 %v2996_v54, %v6476_v15  ;;  %v2495_v4 = vpop.f32.mrb[59].mxu1  ;;  %v2998_v46 = vpop.f32.mrb[119].mxu0  ;;  %3536 = vmatprep.mubr.bf16.mxu0 %v7731_v25 }
 0x3d3   :  { %v3935_v40 = vmax.f32 %v3934_v56, %v2492_v13  ;;  %v6910_v11 = vmax.f32 %v4374_v42, %v2995_v18  ;;  %v2496_v28 = vadd.f32 %v2495_v4, %v6824_v23  ;;  %v6914_v1 = vadd.f32 %v2998_v46, %v6478_v0 }
 0x3d4   :  { %v3822_v8 = vrot.slane %v6864_v53, 4  ;;  %v3923_v9 = vmax.f32 %v3922_v58, %v2494_v20  ;;  %3144 = vmatmul.mubr.bf16.gmra.mrb[164].mxu1 %v6098_v26  ;;  %v3835_v55 = vrot.slane %v6871_v63, 4 }
 0x3d5   :  { %v3936_v29 = vmax.f32 %v3935_v40, %v2496_v28  ;;  %3153 = vmatprep.mubr.bf16.mxu1 %v7731_v25 }
 0x3d6   :  { %v3823_v59 = vmax.f32 %v6864_v53, %v3822_v8  ;;  %v3836_v18 = vmax.f32 %v6871_v63, %v3835_v55 }
 0x3d7   :  { %v2499_v42 = vpop.f32.mrb[60].mxu1 }
 0x3d8   :  { %v2500_v21 = vadd.f32 %v2499_v42, %v6818_v39  ;;  %v2501_v13 = vpop.f32.mrb[61].mxu1  ;;  %v3824_v53 = vrot.slane %v3823_v59, 2  ;;  %v3837_v28 = vrot.slane %v3836_v18, 2 }
 0x3d9   :  { %v2502_v24 = vadd.f32 %v2501_v13, %v6824_v23  ;;  %v2503_v54 = vpop.f32.mrb[62].mxu1  ;;  %3537 = vmatmul.mubr.bf16.gmra.mrb[180].mxu0 %v6140_v35 }
 0x3da   :  { %v3924_v26 = vmax.f32 %v3923_v9, %v2500_v21  ;;  %v2504_v58 = vadd.f32 %v2503_v54, %v6818_v39  ;;  %v2505_v20 = vpop.f32.mrb[63].mxu1  ;;  %3546 = vmatprep.mubr.bf16.mxu0 %v7731_v25  ;;  %v3825_v9 = vmax.f32 %v3823_v59, %v3824_v53  ;;  %v3838_v54 = vmax.f32 %v3836_v18, %v3837_v28 }
 0x3db   :  { %v3937_v4 = vmax.f32 %v3936_v29, %v2502_v24  ;;  %v2506_v46 = vadd.f32 %v2505_v20, %v6824_v23 }
 0x3dc   :  { %v3925_v40 = vmax.f32 %v3924_v26, %v2504_v58  ;;  %3154 = vmatmul.mubr.bf16.gmra.mrb[168].mxu1 %v6115_v27  ;;  %v3839_v53 = vrot.slane %v3838_v54, 1 }
 0x3dd   :  { %v3938_v63 = vmax.f32 %v3937_v4, %v2506_v46  ;;  %3163 = vmatprep.mubr.bf16.mxu1 %v7731_v25  ;;  %v3826_v4 = vrot.slane %v3825_v9, 1 }
 0x3de   :  { %v3926_v8 = vrot.slane %v3925_v40, 4 }
 0x3df   :  { %v3939_v55 = vrot.slane %v3938_v63, 4  ;;  %v2509_v42 = vpop.f32.mrb[64].mxu1 }
 0x3e0   :  { %v3927_v21 = vmax.f32 %v3925_v40, %v3926_v8  ;;  %v2511_v13 = vpop.f32.mrb[65].mxu1  ;;  %v2510_v24 = vadd.f32 %v2509_v42, %v6818_v39 }
 0x3e1   :  { %v3940_v56 = vmax.f32 %v3938_v63, %v3939_v55  ;;  %v2513_v19 = vpop.f32.mrb[66].mxu1  ;;  %3547 = vmatmul.mubr.bf16.gmra.mrb[184].mxu0 %v6180_v16  ;;  %v2512_v20 = vadd.f32 %v2511_v13, %v6824_v23  ;;  %v3827_v55 = vmax.f32 %v3825_v9, %v3826_v4  ;;  %v7750_v4 = vmax.f32 %v6903_v14, %v6907_v52 }
 0x3e2   :  { %v3928_v29 = vrot.slane %v3927_v21, 2  ;;  %v2514_v27 = vadd.f32 %v2513_v19, %v6818_v39  ;;  %v2515_v26 = vpop.f32.mrb[67].mxu1  ;;  %3556 = vmatprep.mubr.bf16.mxu0 %v7731_v25 }
 0x3e3   :  { %v3941_v58 = vrot.slane %v3940_v56, 2  ;;  %v2516_v59 = vadd.f32 %v2515_v26, %v6824_v23  ;;  %v3840_v26 = vmax.f32 %v3838_v54, %v3839_v53 }
 0x3e4   :  { %v3929_v46 = vmax.f32 %v3927_v21, %v3928_v29  ;;  %v4023_v18 = vmax.f32 %v2510_v24, %v2514_v27  ;;  %3164 = vmatmul.mubr.bf16.gmra.mrb[172].mxu1 %v6112_v10 }
 0x3e5   :  { %v3942_v40 = vmax.f32 %v3940_v56, %v3941_v58  ;;  %v4036_v28 = vmax.f32 %v2512_v20, %v2516_v59  ;;  %3173 = vmatprep.mubr.bf16.mxu1 %v7731_v25 }
 0x3e6   :  { %v3930_v63 = vrot.slane %v3929_v46, 1 }
 0x3e7   :  { %v3943_v19 = vrot.slane %v3942_v40, 1  ;;  %v2519_v8 = vpop.f32.mrb[68].mxu1 }
 0x3e8   :  { %v3931_v42 = vmax.f32 %v3929_v46, %v3930_v63  ;;  %v2520_v60 = vadd.f32 %v2519_v8, %v6818_v39  ;;  %v2521_v13 = vpop.f32.mrb[69].mxu1  ;;  %v3002_v45 = vpop.f32.mrb[120].mxu0 }
 0x3e9   :  { %v3944_v17 = vmax.f32 %v3942_v40, %v3943_v19  ;;  %v2522_v21 = vadd.f32 %v2521_v13, %v6824_v23  ;;  %v3003_v10 = vadd.f32 %v3002_v45, %v6476_v15  ;;  %v2523_v29 = vpop.f32.mrb[70].mxu1  ;;  %v3004_v56 = vpop.f32.mrb[121].mxu0  ;;  %3557 = vmatmul.mubr.bf16.gmra.mrb[188].mxu0 %v6177_v5 }
 0x3ea   :  { %v6947_v24 = vsel %vm4711_vm1, %v3931_v42, %v3827_v55  ;;  %v4024_v27 = vmax.f32 %v4023_v18, %v2520_v60  ;;  %v2524_v9 = vadd.f32 %v2523_v29, %v6818_v39  ;;  %v3005_v58 = vadd.f32 %v3004_v56, %v6478_v0  ;;  %v2525_v20 = vpop.f32.mrb[71].mxu1  ;;  %v3006_v59 = vpop.f32.mrb[122].mxu0  ;;  %3566 = vmatprep.mubr.bf16.mxu0 %v7731_v25 }
 0x3eb   :  { %v6953_v54 = vsel %vm4711_vm1, %v3944_v17, %v3840_v26  ;;  %v4037_v45 = vmax.f32 %v4036_v28, %v2522_v21  ;;  %v4364_v46 = vmax.f32 %v7750_v4, %v3003_v10  ;;  %v2526_v53 = vadd.f32 %v2525_v20, %v6824_v23  ;;  %v3008_v40 = vpop.f32.mrb[123].mxu0 }
 0x3ec   :  { %v4025_v60 = vmax.f32 %v4024_v27, %v2524_v9  ;;  %v7751_v18 = vmax.f32 %v6910_v11, %v6914_v1  ;;  %v3007_v19 = vadd.f32 %v3006_v59, %v6476_v15  ;;  %v3009_v8 = vadd.f32 %v3008_v40, %v6478_v0  ;;  %3174 = vmatmul.mubr.bf16.gmra.mrb[176].mxu1 %v6143_v43 }
 0x3ed   :  { %v4038_v17 = vmax.f32 %v4037_v45, %v2526_v53  ;;  %3183 = vmatprep.mubr.bf16.mxu1 %v7731_v25 }
 0x3ee   :  { %v4377_v63 = vmax.f32 %v7751_v18, %v3005_v58  ;;  %v4365_v28 = vmax.f32 %v4364_v46, %v3007_v19 }
 0x3ef   :  { %v2529_v52 = vpop.f32.mrb[72].mxu1 }
 0x3f0   :  { %v4378_v14 = vmax.f32 %v4377_v63, %v3009_v8  ;;  %v2530_v55 = vadd.f32 %v2529_v52, %v6818_v39  ;;  %v2531_v42 = vpop.f32.mrb[73].mxu1  ;;  %v3012_v13 = vpop.f32.mrb[124].mxu0 }
 0x3f1   :  { %v2532_v26 = vadd.f32 %v2531_v42, %v6824_v23  ;;  %v3013_v11 = vadd.f32 %v3012_v13, %v6476_v15  ;;  %v2533_v1 = vpop.f32.mrb[74].mxu1  ;;  %v3014_v21 = vpop.f32.mrb[125].mxu0  ;;  %3567 = vmatmul.mubr.bf16.gmra.mrb[192].mxu0 %v6241_v47 }
 0x3f2   :  { %v4026_v10 = vmax.f32 %v4025_v60, %v2530_v55  ;;  %v2534_v43 = vadd.f32 %v2533_v1, %v6818_v39  ;;  %v3015_v29 = vadd.f32 %v3014_v21, %v6478_v0  ;;  %v2535_v56 = vpop.f32.mrb[75].mxu1  ;;  %v3016_v27 = vpop.f32.mrb[126].mxu0  ;;  %3576 = vmatprep.mubr.bf16.mxu0 %v7731_v25 }
 0x3f3   :  { %v4039_v9 = vmax.f32 %v4038_v17, %v2532_v26  ;;  %v4366_v58 = vmax.f32 %v4365_v28, %v3013_v11  ;;  %v2536_v20 = vadd.f32 %v2535_v56, %v6824_v23  ;;  %v3017_v59 = vadd.f32 %v3016_v27, %v6476_v15  ;;  %v3018_v45 = vpop.f32.mrb[127].mxu0 }
 0x3f4   :  { %v4027_v4 = vmax.f32 %v4026_v10, %v2534_v43  ;;  %v4379_v46 = vmax.f32 %v4378_v14, %v3015_v29  ;;  %v3019_v53 = vadd.f32 %v3018_v45, %v6478_v0  ;;  %3184 = vmatmul.mubr.bf16.gmra.mrb[180].mxu1 %v6140_v35 }
 0x3f5   :  { %v4040_v40 = vmax.f32 %v4039_v9, %v2536_v20  ;;  %v4367_v60 = vmax.f32 %v4366_v58, %v3017_v59  ;;  %3193 = vmatprep.mubr.bf16.mxu1 %v7731_v25 }
 0x3f6   :  { %v4380_v18 = vmax.f32 %v4379_v46, %v3019_v53 }
 0x3f7   :  { %v4368_v63 = vrot.slane %v4367_v60, 4  ;;  %v2539_v19 = vpop.f32.mrb[76].mxu1 }
 0x3f8   :  { %v4381_v8 = vrot.slane %v4380_v18, 4  ;;  %v2540_v17 = vadd.f32 %v2539_v19, %v6818_v39  ;;  %v2541_v28 = vpop.f32.mrb[77].mxu1 }
 0x3f9   :  { %v4369_v52 = vmax.f32 %v4367_v60, %v4368_v63  ;;  %v2542_v55 = vadd.f32 %v2541_v28, %v6824_v23  ;;  %v2543_v42 = vpop.f32.mrb[78].mxu1  ;;  %3577 = vmatmul.mubr.bf16.gmra.mrb[196].mxu0 %v6237_v41 }
 0x3fa   :  { %v4382_v14 = vmax.f32 %v4380_v18, %v4381_v8  ;;  %v4028_v13 = vmax.f32 %v4027_v4, %v2540_v17  ;;  %v2544_v35 = vadd.f32 %v2543_v42, %v6818_v39  ;;  %v2545_v26 = vpop.f32.mrb[79].mxu1  ;;  %3586 = vmatprep.mubr.bf16.mxu0 %v7731_v25 }
 0x3fb   :  { %v4370_v11 = vrot.slane %v4369_v52, 2  ;;  %v4041_v1 = vmax.f32 %v4040_v40, %v2542_v55  ;;  %v2546_v21 = vadd.f32 %v2545_v26, %v6824_v23 }
 0x3fc   :  { %v4383_v10 = vrot.slane %v4382_v14, 2  ;;  %v4029_v43 = vmax.f32 %v4028_v13, %v2544_v35  ;;  %3194 = vmatmul.mubr.bf16.gmra.mrb[184].mxu1 %v6180_v16 }
 0x3fd   :  { %v4371_v29 = vmax.f32 %v4369_v52, %v4370_v11  ;;  %v4042_v56 = vmax.f32 %v4041_v1, %v2546_v21  ;;  %3203 = vmatprep.mubr.bf16.mxu1 %v7731_v25 }
 0x3fe   :  { %v4384_v27 = vmax.f32 %v4382_v14, %v4383_v10  ;;  %v4030_v9 = vrot.slane %v4029_v43, 4 }
 0x3ff   :  { %v4372_v58 = vrot.slane %v4371_v29, 1  ;;  %v4043_v20 = vrot.slane %v4042_v56, 4  ;;  %v2549_v59 = vpop.f32.mrb[80].mxu1 }
 0x400   :  { %v4385_v45 = vrot.slane %v4384_v27, 1  ;;  %v4031_v4 = vmax.f32 %v4029_v43, %v4030_v9  ;;  %v2551_v46 = vpop.f32.mrb[81].mxu1  ;;  %v2550_v63 = vadd.f32 %v2549_v59, %v6818_v39 }
 0x401   :  { %v4373_v53 = vmax.f32 %v4371_v29, %v4372_v58  ;;  %v4044_v40 = vmax.f32 %v4042_v56, %v4043_v20  ;;  %v2553_v60 = vpop.f32.mrb[82].mxu1  ;;  %3587 = vmatmul.mubr.bf16.gmra.mrb[200].mxu0 %v6322_v22  ;;  %v2552_v52 = vadd.f32 %v2551_v46, %v6824_v23 }
 0x402   :  { %v4386_v18 = vmax.f32 %v4384_v27, %v4385_v45  ;;  %v4032_v16 = vrot.slane %v4031_v4, 2  ;;  %v2554_v19 = vadd.f32 %v2553_v60, %v6818_v39  ;;  %v2555_v8 = vpop.f32.mrb[83].mxu1  ;;  %3596 = vmatprep.mubr.bf16.mxu0 %v7731_v25 }
 0x403   :  { %v6992_v17 = vsel %vm4719_vm5, %v4373_v53, %v6869_v51  ;;  %v4045_v28 = vrot.slane %v4044_v40, 2  ;;  %v2556_v55 = vadd.f32 %v2555_v8, %v6824_v23 }
 0x404   :  { %v6998_v42 = vsel %vm4719_vm5, %v4386_v18, %v6876_v36  ;;  %v4033_v14 = vmax.f32 %v4031_v4, %v4032_v16  ;;  %v4127_v13 = vmax.f32 %v2550_v63, %v2554_v19  ;;  %3204 = vmatmul.mubr.bf16.gmra.mrb[188].mxu1 %v6177_v5 }
 0x405   :  { %v4046_v35 = vmax.f32 %v4044_v40, %v4045_v28  ;;  %v4140_v26 = vmax.f32 %v2552_v52, %v2556_v55  ;;  %3213 = vmatprep.mubr.bf16.mxu1 %v7731_v25 }
 0x406   :  { %v4034_v11 = vrot.slane %v4033_v14, 1 }
 0x407   :  { %v4047_v51 = vrot.slane %v4046_v35, 1  ;;  %v2559_v1 = vpop.f32.mrb[84].mxu1 }
 0x408   :  { %v4035_v21 = vmax.f32 %v4033_v14, %v4034_v11  ;;  %v2560_v10 = vadd.f32 %v2559_v1, %v6818_v39  ;;  %v2561_v43 = vpop.f32.mrb[85].mxu1 }
 0x409   :  { %v4048_v29 = vmax.f32 %v4046_v35, %v4047_v51  ;;  %v2562_v56 = vadd.f32 %v2561_v43, %v6824_v23  ;;  %v2563_v36 = vpop.f32.mrb[86].mxu1  ;;  %3597 = vmatmul.mubr.bf16.gmra.mrb[204].mxu0 %v6315_v7 }
 0x40a   :  { %v7007_v5 = vsel %vm4713_vm2, %v4035_v21, %v6947_v24  ;;  %v4128_v27 = vmax.f32 %v4127_v13, %v2560_v10  ;;  %v2564_v9 = vadd.f32 %v2563_v36, %v6818_v39  ;;  %v2565_v58 = vpop.f32.mrb[87].mxu1  ;;  %3606 = vmatprep.mubr.bf16.mxu0 %v7731_v25 }
 0x40b   :  { %v7013_v20 = vsel %vm4713_vm2, %v4048_v29, %v6953_v54  ;;  %v4141_v59 = vmax.f32 %v4140_v26, %v2562_v56  ;;  %v2566_v45 = vadd.f32 %v2565_v58, %v6824_v23 }
 0x40c   :  { %v4129_v4 = vmax.f32 %v4128_v27, %v2564_v9  ;;  %3214 = vmatmul.mubr.bf16.gmra.mrb[192].mxu1 %v6241_v47 }
 0x40d   :  { %v4142_v46 = vmax.f32 %v4141_v59, %v2566_v45  ;;  %v3022_v53 = vpop.f32.mrb[128].mxu0  ;;  %3223 = vmatprep.mubr.bf16.mxu1 %v7731_v25 }
 0x40e   :  { %v3024_v24 = vpop.f32.mrb[129].mxu0  ;;  %v3023_v18 = vadd.f32 %v3022_v53, %v6476_v15 }
 0x40f   :  { %v2569_v40 = vpop.f32.mrb[88].mxu1  ;;  %v3026_v60 = vpop.f32.mrb[130].mxu0  ;;  %v3025_v8 = vadd.f32 %v3024_v24, %v6478_v0 }
 0x410   :  { %v2570_v16 = vadd.f32 %v2569_v40, %v6818_v39  ;;  %v3027_v54 = vadd.f32 %v3026_v60, %v6476_v15  ;;  %v2571_v63 = vpop.f32.mrb[89].mxu1  ;;  %v3028_v19 = vpop.f32.mrb[131].mxu0 }
 0x411   :  { %v2572_v28 = vadd.f32 %v2571_v63, %v6824_v23  ;;  %v3029_v47 = vadd.f32 %v3028_v19, %v6478_v0  ;;  %v2573_v52 = vpop.f32.mrb[90].mxu1  ;;  %3607 = vmatmul.mubr.bf16.gmra.mrb[208].mxu0 %v6387_v6 }
 0x412   :  { %v4130_v55 = vmax.f32 %v4129_v4, %v2570_v16  ;;  %v4465_v14 = vmax.f32 %v3023_v18, %v3027_v54  ;;  %v2574_v13 = vadd.f32 %v2573_v52, %v6818_v39  ;;  %v2575_v35 = vpop.f32.mrb[91].mxu1  ;;  %3616 = vmatprep.mubr.bf16.mxu0 %v7731_v25 }
 0x413   :  { %v4143_v26 = vmax.f32 %v4142_v46, %v2572_v28  ;;  %v4478_v11 = vmax.f32 %v3025_v8, %v3029_v47  ;;  %v2576_v51 = vadd.f32 %v2575_v35, %v6824_v23 }
 0x414   :  { %v4131_v1 = vmax.f32 %v4130_v55, %v2574_v13  ;;  %3224 = vmatmul.mubr.bf16.gmra.mrb[196].mxu1 %v6237_v41 }
 0x415   :  { %v4144_v21 = vmax.f32 %v4143_v26, %v2576_v51  ;;  %v3032_v10 = vpop.f32.mrb[132].mxu0  ;;  %3233 = vmatprep.mubr.bf16.mxu1 %v7731_v25 }
 0x416   :  { %v3033_v43 = vadd.f32 %v3032_v10, %v6476_v15  ;;  %v3034_v29 = vpop.f32.mrb[133].mxu0 }
 0x417   :  { %v3035_v56 = vadd.f32 %v3034_v29, %v6478_v0  ;;  %v2579_v36 = vpop.f32.mrb[92].mxu1  ;;  %v3036_v27 = vpop.f32.mrb[134].mxu0 }
 0x418   :  { %v7032_v9 = vmax.f32 %v4465_v14, %v3033_v43  ;;  %v2580_v58 = vadd.f32 %v2579_v36, %v6818_v39  ;;  %v7036_v59 = vadd.f32 %v3036_v27, %v6476_v15  ;;  %v2581_v45 = vpop.f32.mrb[93].mxu1  ;;  %v3038_v41 = vpop.f32.mrb[135].mxu0 }
 0x419   :  { %v7038_v4 = vmax.f32 %v4478_v11, %v3035_v56  ;;  %v2582_v46 = vadd.f32 %v2581_v45, %v6824_v23  ;;  %v7042_v53 = vadd.f32 %v3038_v41, %v6478_v0  ;;  %v2583_v24 = vpop.f32.mrb[94].mxu1  ;;  %3617 = vmatmul.mubr.bf16.gmra.mrb[212].mxu0 %v6382_v32 }
 0x41a   :  { %v4132_v40 = vmax.f32 %v4131_v1, %v2580_v58  ;;  %v4467_v60 = vmax.f32 %v7032_v9, %v7036_v59  ;;  %v2584_v18 = vadd.f32 %v2583_v24, %v6818_v39  ;;  %v2585_v16 = vpop.f32.mrb[95].mxu1  ;;  %3626 = vmatprep.mubr.bf16.mxu0 %v7731_v25 }
 0x41b   :  { %v4145_v54 = vmax.f32 %v4144_v21, %v2582_v46  ;;  %v4480_v63 = vmax.f32 %v7038_v4, %v7042_v53  ;;  %v2586_v19 = vadd.f32 %v2585_v16, %v6824_v23 }
 0x41c   :  { %v4133_v8 = vmax.f32 %v4132_v40, %v2584_v18  ;;  %3234 = vmatmul.mubr.bf16.gmra.mrb[200].mxu1 %v6322_v22 }
 0x41d   :  { %v4146_v28 = vmax.f32 %v4145_v54, %v2586_v19  ;;  %3243 = vmatprep.mubr.bf16.mxu1 %v7731_v25 }
 0x41e   :  { %v4134_v47 = vrot.slane %v4133_v8, 4 }
 0x41f   :  { %v4147_v52 = vrot.slane %v4146_v28, 4  ;;  %v2589_v55 = vpop.f32.mrb[96].mxu1 }
 0x420   :  { %v4135_v14 = vmax.f32 %v4133_v8, %v4134_v47  ;;  %v2591_v13 = vpop.f32.mrb[97].mxu1  ;;  %v2590_v51 = vadd.f32 %v2589_v55, %v6818_v39 }
 0x421   :  { %v4148_v35 = vmax.f32 %v4146_v28, %v4147_v52  ;;  %v2593_v26 = vpop.f32.mrb[98].mxu1  ;;  %3627 = vmatmul.mubr.bf16.gmra.mrb[216].mxu0 %v6433_v37  ;;  %v2592_v10 = vadd.f32 %v2591_v13, %v6824_v23 }
 0x422   :  { %v4136_v11 = vrot.slane %v4135_v14, 2  ;;  %v2594_v1 = vadd.f32 %v2593_v26, %v6818_v39  ;;  %v2595_v21 = vpop.f32.mrb[99].mxu1  ;;  %3636 = vmatprep.mubr.bf16.mxu0 %v7731_v25 }
 0x423   :  { %v4149_v22 = vrot.slane %v4148_v35, 2  ;;  %v2596_v43 = vadd.f32 %v2595_v21, %v6824_v23 }
 0x424   :  { %v4137_v29 = vmax.f32 %v4135_v14, %v4136_v11  ;;  %v4231_v56 = vmax.f32 %v2590_v51, %v2594_v1  ;;  %3244 = vmatmul.mubr.bf16.gmra.mrb[204].mxu1 %v6315_v7 }
 0x425   :  { %v4150_v36 = vmax.f32 %v4148_v35, %v4149_v22  ;;  %v4244_v27 = vmax.f32 %v2592_v10, %v2596_v43  ;;  %3253 = vmatprep.mubr.bf16.mxu1 %v7731_v25 }
 0x426   :  { %v4138_v58 = vrot.slane %v4137_v29, 1 }
 0x427   :  { %v4151_v45 = vrot.slane %v4150_v36, 1  ;;  %v2599_v41 = vpop.f32.mrb[100].mxu1 }
 0x428   :  { %v4139_v46 = vmax.f32 %v4137_v29, %v4138_v58  ;;  %v2600_v24 = vadd.f32 %v2599_v41, %v6818_v39  ;;  %v2601_v40 = vpop.f32.mrb[101].mxu1 }
 0x429   :  { %v4152_v18 = vmax.f32 %v4150_v36, %v4151_v45  ;;  %v2602_v16 = vadd.f32 %v2601_v40, %v6824_v23  ;;  %v2603_v54 = vpop.f32.mrb[102].mxu1  ;;  %3637 = vmatmul.mubr.bf16.gmra.mrb[220].mxu0 %v6431_v2 }
 0x42a   :  { %v7067_v7 = vsel %vm4715_vm3, %v4139_v46, %v7007_v5  ;;  %v4232_v19 = vmax.f32 %v4231_v56, %v2600_v24  ;;  %v2604_v8 = vadd.f32 %v2603_v54, %v6818_v39  ;;  %v2605_v28 = vpop.f32.mrb[103].mxu1  ;;  %3646 = vmatprep.mubr.bf16.mxu0 %v7731_v25 }
 0x42b   :  { %v7073_v47 = vsel %vm4715_vm3, %v4152_v18, %v7013_v20  ;;  %v4245_v52 = vmax.f32 %v4244_v27, %v2602_v16  ;;  %v2606_v55 = vadd.f32 %v2605_v28, %v6824_v23 }
 0x42c   :  { %v4233_v14 = vmax.f32 %v4232_v19, %v2604_v8  ;;  %3254 = vmatmul.mubr.bf16.gmra.mrb[208].mxu1 %v6387_v6 }
 0x42d   :  { %v4246_v13 = vmax.f32 %v4245_v52, %v2606_v55  ;;  %3263 = vmatprep.mubr.bf16.mxu1 %v7731_v25 }
 0x42e   :  { %v3042_v5 = vpop.f32.mrb[136].mxu0 }
 0x42f   :  { %v3043_v35 = vadd.f32 %v3042_v5, %v6476_v15  ;;  %v2609_v26 = vpop.f32.mrb[104].mxu1  ;;  %v3044_v11 = vpop.f32.mrb[137].mxu0 }
 0x430   :  { %v2610_v51 = vadd.f32 %v2609_v26, %v6818_v39  ;;  %v3045_v1 = vadd.f32 %v3044_v11, %v6478_v0  ;;  %v2611_v20 = vpop.f32.mrb[105].mxu1  ;;  %v3046_v21 = vpop.f32.mrb[138].mxu0 }
 0x431   :  { %v4468_v22 = vmax.f32 %v4467_v60, %v3043_v35  ;;  %v2612_v6 = vadd.f32 %v2611_v20, %v6824_v23  ;;  %v3047_v10 = vadd.f32 %v3046_v21, %v6476_v15  ;;  %v2613_v43 = vpop.f32.mrb[106].mxu1  ;;  %v3048_v29 = vpop.f32.mrb[139].mxu0  ;;  %3647 = vmatmul.mubr.bf16.gmra.mrb[224].mxu0 %v6483_v3 }
 0x432   :  { %v4234_v56 = vmax.f32 %v4233_v14, %v2610_v51  ;;  %v4481_v36 = vmax.f32 %v4480_v63, %v3045_v1  ;;  %v2614_v27 = vadd.f32 %v2613_v43, %v6818_v39  ;;  %v3049_v58 = vadd.f32 %v3048_v29, %v6478_v0  ;;  %v2615_v45 = vpop.f32.mrb[107].mxu1  ;;  %3656 = vmatprep.mubr.bf16.mxu0 %v7731_v25 }
 0x433   :  { %v4247_v9 = vmax.f32 %v4246_v13, %v2612_v6  ;;  %v4469_v59 = vmax.f32 %v4468_v22, %v3047_v10  ;;  %v2616_v60 = vadd.f32 %v2615_v45, %v6824_v23 }
 0x434   :  { %v4235_v41 = vmax.f32 %v4234_v56, %v2614_v27  ;;  %v4482_v46 = vmax.f32 %v4481_v36, %v3049_v58  ;;  %3264 = vmatmul.mubr.bf16.gmra.mrb[212].mxu1 %v6382_v32 }
 0x435   :  { %v4248_v24 = vmax.f32 %v4247_v9, %v2616_v60  ;;  %3273 = vmatprep.mubr.bf16.mxu1 %v7731_v25 }
 0x436   :  { %v3052_v4 = vpop.f32.mrb[140].mxu0 }
 0x437   :  { %v3053_v53 = vadd.f32 %v3052_v4, %v6476_v15  ;;  %v2619_v63 = vpop.f32.mrb[108].mxu1  ;;  %v3054_v40 = vpop.f32.mrb[141].mxu0 }
 0x438   :  { %v2620_v18 = vadd.f32 %v2619_v63, %v6818_v39  ;;  %v3055_v16 = vadd.f32 %v3054_v40, %v6478_v0  ;;  %v2621_v54 = vpop.f32.mrb[109].mxu1  ;;  %v3056_v19 = vpop.f32.mrb[142].mxu0 }
 0x439   :  { %v4470_v8 = vmax.f32 %v4469_v59, %v3053_v53  ;;  %v2622_v28 = vadd.f32 %v2621_v54, %v6824_v23  ;;  %v3057_v52 = vadd.f32 %v3056_v19, %v6476_v15  ;;  %v2623_v32 = vpop.f32.mrb[110].mxu1  ;;  %v3058_v55 = vpop.f32.mrb[143].mxu0  ;;  %3657 = vmatmul.mubr.bf16.gmra.mrb[228].mxu0 %v6481_v48 }
 0x43a   :  { %v4236_v14 = vmax.f32 %v4235_v41, %v2620_v18  ;;  %v4483_v13 = vmax.f32 %v4482_v46, %v3055_v16  ;;  %v2624_v5 = vadd.f32 %v2623_v32, %v6818_v39  ;;  %v3059_v35 = vadd.f32 %v3058_v55, %v6478_v0  ;;  %v2625_v26 = vpop.f32.mrb[111].mxu1  ;;  %3666 = vmatprep.mubr.bf16.mxu0 %v7731_v25 }
 0x43b   :  { %v4249_v11 = vmax.f32 %v4248_v24, %v2622_v28  ;;  %v4471_v51 = vmax.f32 %v4470_v8, %v3057_v52  ;;  %v2626_v1 = vadd.f32 %v2625_v26, %v6824_v23 }
 0x43c   :  { %v4237_v20 = vmax.f32 %v4236_v14, %v2624_v5  ;;  %v4484_v21 = vmax.f32 %v4483_v13, %v3059_v35  ;;  %3274 = vmatmul.mubr.bf16.gmra.mrb[216].mxu1 %v6433_v37 }
 0x43d   :  { %v4472_v22 = vrot.slane %v4471_v51, 4  ;;  %v4250_v6 = vmax.f32 %v4249_v11, %v2626_v1  ;;  %3283 = vmatprep.mubr.bf16.mxu1 %v7731_v25 }
 0x43e   :  { %v4238_v10 = vrot.slane %v4237_v20, 4  ;;  %v4485_v43 = vrot.slane %v4484_v21, 4 }
 0x43f   :  { %v4473_v29 = vmax.f32 %v4471_v51, %v4472_v22  ;;  %v4251_v56 = vrot.slane %v4250_v6, 4  ;;  %v2629_v36 = vpop.f32.mrb[112].mxu1 }
 0x440   :  { %v4239_v27 = vmax.f32 %v4237_v20, %v4238_v10  ;;  %v4486_v58 = vmax.f32 %v4484_v21, %v4485_v43  ;;  %v2631_v45 = vpop.f32.mrb[113].mxu1  ;;  %v2630_v37 = vadd.f32 %v2629_v36, %v6818_v39 }
 0x441   :  { %v4474_v9 = vrot.slane %v4473_v29, 2  ;;  %v4252_v59 = vmax.f32 %v4250_v6, %v4251_v56  ;;  %v2633_v60 = vpop.f32.mrb[114].mxu1  ;;  %3667 = vmatmul.mubr.bf16.gmra.mrb[232].mxu0 %v6559_v44  ;;  %v2632_v40 = vadd.f32 %v2631_v45, %v6824_v23 }
 0x442   :  { %v4240_v41 = vrot.slane %v4239_v27, 2  ;;  %v4487_v46 = vrot.slane %v4486_v58, 2  ;;  %v2634_v24 = vadd.f32 %v2633_v60, %v6818_v39  ;;  %v2635_v4 = vpop.f32.mrb[115].mxu1  ;;  %3676 = vmatprep.mubr.bf16.mxu0 %v7731_v25 }
 0x443   :  { %v4475_v53 = vmax.f32 %v4473_v29, %v4474_v9  ;;  %v4253_v63 = vrot.slane %v4252_v59, 2  ;;  %v2636_v18 = vadd.f32 %v2635_v4, %v6824_v23 }
 0x444   :  { %v4241_v16 = vmax.f32 %v4239_v27, %v4240_v41  ;;  %v4488_v54 = vmax.f32 %v4486_v58, %v4487_v46  ;;  %v4335_v19 = vmax.f32 %v2630_v37, %v2634_v24  ;;  %3284 = vmatmul.mubr.bf16.gmra.mrb[220].mxu1 %v6431_v2 }
 0x445   :  { %v4476_v8 = vrot.slane %v4475_v53, 1  ;;  %v4254_v28 = vmax.f32 %v4252_v59, %v4253_v63  ;;  %v4348_v52 = vmax.f32 %v2632_v40, %v2636_v18  ;;  %3293 = vmatprep.mubr.bf16.mxu1 %v7731_v25 }
 0x446   :  { %v4242_v32 = vrot.slane %v4241_v16, 1  ;;  %v4489_v55 = vrot.slane %v4488_v54, 1 }
 0x447   :  { %v4477_v14 = vmax.f32 %v4475_v53, %v4476_v8  ;;  %v4255_v13 = vrot.slane %v4254_v28, 1  ;;  %v2639_v5 = vpop.f32.mrb[116].mxu1 }
 0x448   :  { %v4243_v35 = vmax.f32 %v4241_v16, %v4242_v32  ;;  %v4490_v26 = vmax.f32 %v4488_v54, %v4489_v55  ;;  %v2640_v11 = vadd.f32 %v2639_v5, %v6818_v39  ;;  %v2641_v51 = vpop.f32.mrb[117].mxu1 }
 0x449   :  { %v7119_v1 = vsel %vm4721_vm6, %v4477_v14, %v6992_v17  ;;  %v4256_v2 = vmax.f32 %v4254_v28, %v4255_v13  ;;  %v2642_v20 = vadd.f32 %v2641_v51, %v6824_v23  ;;  %v2643_v21 = vpop.f32.mrb[118].mxu1  ;;  %3677 = vmatmul.mubr.bf16.gmra.mrb[236].mxu0 %v6556_v50 }
 0x44a   :  { %v7125_v22 = vsel %vm4717_vm4, %v4243_v35, %v7067_v7  ;;  %v7129_v6 = vsel %vm4721_vm6, %v4490_v26, %v6998_v42  ;;  %v4336_v10 = vmax.f32 %v4335_v19, %v2640_v11  ;;  %v2644_v43 = vadd.f32 %v2643_v21, %v6818_v39  ;;  %v2645_v29 = vpop.f32.mrb[119].mxu1  ;;  %3686 = vmatprep.mubr.bf16.mxu0 %v7731_v25 }
 0x44b   :  { %v7135_v17 = vsel %vm4717_vm4, %v4256_v2, %v7073_v47  ;;  %v4349_v56 = vmax.f32 %v4348_v52, %v2642_v20  ;;  %v2646_v36 = vadd.f32 %v2645_v29, %v6824_v23 }
 0x44c   :  { %v4337_v27 = vmax.f32 %v4336_v10, %v2644_v43  ;;  %3294 = vmatmul.mubr.bf16.gmra.mrb[224].mxu1 %v6483_v3 }
 0x44d   :  { %v4350_v7 = vmax.f32 %v4349_v56, %v2646_v36  ;;  %3303 = vmatprep.mubr.bf16.mxu1 %v7731_v25 }
 0x44f   :  { %v2649_v42 = vpop.f32.mrb[120].mxu1 }
 0x450   :  { %v2650_v58 = vadd.f32 %v2649_v42, %v6818_v39  ;;  %v2651_v45 = vpop.f32.mrb[121].mxu1 }
 0x451   :  { %v2652_v9 = vadd.f32 %v2651_v45, %v6824_v23  ;;  %v2653_v59 = vpop.f32.mrb[122].mxu1  ;;  %3687 = vmatmul.mubr.bf16.gmra.mrb[240].mxu0 %v6615_v38 }
 0x452   :  { %v4338_v47 = vmax.f32 %v4337_v27, %v2650_v58  ;;  %v2654_v60 = vadd.f32 %v2653_v59, %v6818_v39  ;;  %v2655_v41 = vpop.f32.mrb[123].mxu1  ;;  %3696 = vmatprep.mubr.bf16.mxu0 %v7731_v25 }
 0x453   :  { %v4351_v46 = vmax.f32 %v4350_v7, %v2652_v9  ;;  %v2656_v3 = vadd.f32 %v2655_v41, %v6824_v23  ;;  %v3062_v37 = vpop.f32.mrb[144].mxu0 }
 0x454   :  { %v4339_v24 = vmax.f32 %v4338_v47, %v2654_v60  ;;  %v3064_v4 = vpop.f32.mrb[145].mxu0  ;;  %3304 = vmatmul.mubr.bf16.gmra.mrb[228].mxu1 %v6481_v48  ;;  %v3063_v40 = vadd.f32 %v3062_v37, %v6476_v15 }
 0x455   :  { %v4352_v53 = vmax.f32 %v4351_v46, %v2656_v3  ;;  %v3066_v63 = vpop.f32.mrb[146].mxu0  ;;  %3313 = vmatprep.mubr.bf16.mxu1 %v7731_v25  ;;  %v3065_v54 = vadd.f32 %v3064_v4, %v6478_v0 }
 0x456   :  { %v3067_v18 = vadd.f32 %v3066_v63, %v6476_v15  ;;  %v3068_v16 = vpop.f32.mrb[147].mxu0 }
 0x457   :  { %v3069_v19 = vadd.f32 %v3068_v16, %v6478_v0  ;;  %v2659_v8 = vpop.f32.mrb[124].mxu1 }
 0x458   :  { %v4569_v28 = vmax.f32 %v3063_v40, %v3067_v18  ;;  %v2660_v52 = vadd.f32 %v2659_v8, %v6818_v39  ;;  %v2661_v32 = vpop.f32.mrb[125].mxu1 }
 0x459   :  { %v4582_v55 = vmax.f32 %v3065_v54, %v3069_v19  ;;  %v2662_v48 = vadd.f32 %v2661_v32, %v6824_v23  ;;  %v2663_v14 = vpop.f32.mrb[126].mxu1  ;;  %3697 = vmatmul.mubr.bf16.gmra.mrb[244].mxu0 %v6613_v30 }
 0x45a   :  { %v4340_v13 = vmax.f32 %v4339_v24, %v2660_v52  ;;  %v2664_v5 = vadd.f32 %v2663_v14, %v6818_v39  ;;  %v2665_v35 = vpop.f32.mrb[127].mxu1  ;;  %3706 = vmatprep.mubr.bf16.mxu0 %v7731_v25 }
 0x45b   :  { %v4353_v26 = vmax.f32 %v4352_v53, %v2662_v48  ;;  %v2666_v11 = vadd.f32 %v2665_v35, %v6824_v23  ;;  %v3072_v51 = vpop.f32.mrb[148].mxu0 }
 0x45c   :  { %v4341_v2 = vmax.f32 %v4340_v13, %v2664_v5  ;;  %v3073_v20 = vadd.f32 %v3072_v51, %v6476_v15  ;;  %v3074_v21 = vpop.f32.mrb[149].mxu0  ;;  %3314 = vmatmul.mubr.bf16.gmra.mrb[232].mxu1 %v6559_v44 }
 0x45d   :  { %v4354_v10 = vmax.f32 %v4353_v26, %v2666_v11  ;;  %v3075_v43 = vadd.f32 %v3074_v21, %v6478_v0  ;;  %v3076_v29 = vpop.f32.mrb[150].mxu0  ;;  %3323 = vmatprep.mubr.bf16.mxu1 %v7731_v25 }
 0x45e   :  { %v4342_v56 = vrot.slane %v4341_v2, 4  ;;  %v7162_v36 = vmax.f32 %v4569_v28, %v3073_v20  ;;  %v7165_v27 = vadd.f32 %v3076_v29, %v6476_v15  ;;  %v3078_v7 = vpop.f32.mrb[151].mxu0 }
 0x45f   :  { %v4355_v42 = vrot.slane %v4354_v10, 4  ;;  %v7167_v58 = vmax.f32 %v4582_v55, %v3075_v43  ;;  %v7170_v45 = vadd.f32 %v3078_v7, %v6478_v0  ;;  %v2669_v44 = vpop.f32.mrb[128].mxu1 }
 0x460   :  { %v4343_v9 = vmax.f32 %v4341_v2, %v4342_v56  ;;  %v4571_v59 = vmax.f32 %v7162_v36, %v7165_v27  ;;  %v2671_v47 = vpop.f32.mrb[129].mxu1  ;;  %v2670_v37 = vadd.f32 %v2669_v44, %v6818_v39 }
 0x461   :  { %v4356_v60 = vmax.f32 %v4354_v10, %v4355_v42  ;;  %v4584_v41 = vmax.f32 %v7167_v58, %v7170_v45  ;;  %v2673_v46 = vpop.f32.mrb[130].mxu1  ;;  %3707 = vmatmul.mubr.bf16.gmra.mrb[248].mxu0 %v6673_v62  ;;  %v2672_v63 = vadd.f32 %v2671_v47, %v6824_v23 }
 0x462   :  { %v4344_v3 = vrot.slane %v4343_v9, 2  ;;  %v2674_v24 = vadd.f32 %v2673_v46, %v6818_v39  ;;  %v2675_v4 = vpop.f32.mrb[131].mxu1  ;;  %3716 = vmatprep.mubr.bf16.mxu0 %v7731_v25 }
 0x463   :  { %v4357_v53 = vrot.slane %v4356_v60, 2  ;;  %v2676_v40 = vadd.f32 %v2675_v4, %v6824_v23 }
 0x464   :  { %v4345_v18 = vmax.f32 %v4343_v9, %v4344_v3  ;;  %v4439_v16 = vmax.f32 %v2670_v37, %v2674_v24  ;;  %3324 = vmatmul.mubr.bf16.gmra.mrb[236].mxu1 %v6556_v50 }
 0x465   :  { %v4358_v54 = vmax.f32 %v4356_v60, %v4357_v53  ;;  %v4452_v19 = vmax.f32 %v2672_v63, %v2676_v40  ;;  %3333 = vmatprep.mubr.bf16.mxu1 %v7731_v25 }
 0x466   :  { %v4346_v8 = vrot.slane %v4345_v18, 1 }
 0x467   :  { %v4359_v28 = vrot.slane %v4358_v54, 1  ;;  %v2679_v52 = vpop.f32.mrb[132].mxu1 }
 0x468   :  { %v4347_v32 = vmax.f32 %v4345_v18, %v4346_v8  ;;  %v2680_v55 = vadd.f32 %v2679_v52, %v6818_v39  ;;  %v2681_v48 = vpop.f32.mrb[133].mxu1 }
 0x469   :  { %v4360_v14 = vmax.f32 %v4358_v54, %v4359_v28  ;;  %v2682_v13 = vadd.f32 %v2681_v48, %v6824_v23  ;;  %v2683_v5 = vpop.f32.mrb[134].mxu1  ;;  %3717 = vmatmul.mubr.bf16.gmra.mrb[252].mxu0 %v6671_v57 }
 0x46a   :  { %v7189_v50 = vsel %vm4719_vm5, %v4347_v32, %v7125_v22  ;;  %v4440_v35 = vmax.f32 %v4439_v16, %v2680_v55  ;;  %v2684_v26 = vadd.f32 %v2683_v5, %v6818_v39  ;;  %v2685_v11 = vpop.f32.mrb[135].mxu1  ;;  %3726 = vmatprep.mubr.bf16.mxu0 %v7731_v25  ;;  %v2061_v5 = vsub.s32 6, %v7743_v31 }
 0x46b   :  { %v7195_v51 = vsel %vm4719_vm5, %v4360_v14, %v7135_v17  ;;  %v4453_v2 = vmax.f32 %v4452_v19, %v2682_v13  ;;  %v2686_v20 = vadd.f32 %v2685_v11, %v6824_v23 }
 0x46c   :  { %v4441_v21 = vmax.f32 %v4440_v35, %v2684_v26  ;;  %3334 = vmatmul.mubr.bf16.gmra.mrb[240].mxu1 %v6615_v38  ;;  %v2065_v35 = vsub.s32 7, %v7743_v31 }
 0x46d   :  { %v4454_v10 = vmax.f32 %v4453_v2, %v2686_v20  ;;  %3343 = vmatprep.mubr.bf16.mxu1 %v7731_v25 }
 0x46f   :  { %v2689_v22 = vpop.f32.mrb[136].mxu1 }
 0x470   :  { %v2690_v43 = vadd.f32 %v2689_v22, %v6818_v39  ;;  %v2691_v29 = vpop.f32.mrb[137].mxu1 }
 0x471   :  { %v2692_v56 = vadd.f32 %v2691_v29, %v6824_v23  ;;  %v2693_v7 = vpop.f32.mrb[138].mxu1  ;;  %3727 = vmatmul.mubr.bf16.gmra.mrb[0].mxu0 %v6723_v12 }
 0x472   :  { %v4442_v17 = vmax.f32 %v4441_v21, %v2690_v43  ;;  %v2694_v42 = vadd.f32 %v2693_v7, %v6818_v39  ;;  %v2695_v44 = vpop.f32.mrb[139].mxu1  ;;  %3736 = vmatprep.mubr.bf16.mxu0 %v7731_v25 }
 0x473   :  { %v4455_v9 = vmax.f32 %v4454_v10, %v2692_v56  ;;  %v2696_v38 = vadd.f32 %v2695_v44, %v6824_v23 }
 0x474   :  { %v4443_v47 = vmax.f32 %v4442_v17, %v2694_v42  ;;  %v3082_v60 = vpop.f32.mrb[152].mxu0  ;;  %3344 = vmatmul.mubr.bf16.gmra.mrb[244].mxu1 %v6613_v30 }
 0x475   :  { %v4456_v46 = vmax.f32 %v4455_v9, %v2696_v38  ;;  %v3083_v3 = vadd.f32 %v3082_v60, %v6476_v15  ;;  %v3084_v37 = vpop.f32.mrb[153].mxu0  ;;  %3353 = vmatprep.mubr.bf16.mxu1 %v7731_v25  ;;  %v7236_v9 = vld [vmem:[%s7695_s6] sm:$0xff]  ;;  %s5190_s6 = smov [#allocation5]  }
 0x476   :  { %v3085_v24 = vadd.f32 %v3084_v37, %v6478_v0  ;;  %v3086_v4 = vpop.f32.mrb[154].mxu0  ;;  %v7239_v38 = vrot.slane %v7236_v9, %v2061_v5  ;;  %s4804_s21 = sshll.u32 %s5190_s6, 4  ;;  %s4805_s21 = int_to_ptr.vmem [resolvable:$true] %s4804_s21 }
 0x477   :  { %v4572_v53 = vmax.f32 %v4571_v59, %v3083_v3  ;;  %v3087_v63 = vadd.f32 %v3086_v4, %v6476_v15  ;;  %v2699_v40 = vpop.f32.mrb[140].mxu1  ;;  %v3088_v18 = vpop.f32.mrb[155].mxu0  ;;  %s5160_s0 = scalar_lea.vmem %s4805_s21, 1024  ;;  %p5165_p9 = scmp.lt.s32.totalorder %s4805_s21, %s4805_s21 }
 0x478   :  { %v4585_v30 = vmax.f32 %v4584_v41, %v3085_v24  ;;  %v2700_v16 = vadd.f32 %v2699_v40, %v6818_v39  ;;  %v3089_v54 = vadd.f32 %v3088_v18, %v6478_v0  ;;  %v2701_v19 = vpop.f32.mrb[141].mxu1  ;;  %p5161_p8 = scmp.ne.s32.totalorder %s4805_s21, %s5160_s0  ;;  %p5166_p10 = scmp.lt.s32.totalorder %s5160_s0, %s5160_s0 }
 0x479   :  { %v4573_v8 = vmax.f32 %v4572_v53, %v3087_v63  ;;  %v2702_v28 = vadd.f32 %v2701_v19, %v6824_v23  ;;  %v2703_v52 = vpop.f32.mrb[142].mxu1  ;;  %3737 = vmatmul.mubr.bf16.gmra.mrb[4].mxu0 %v6721_v61 }
 0x47a   :  { %v4444_v36 = vmax.f32 %v4443_v47, %v2700_v16  ;;  %v4586_v27 = vmax.f32 %v4585_v30, %v3089_v54  ;;  %v2704_v59 = vadd.f32 %v2703_v52, %v6818_v39  ;;  %v2705_v32 = vpop.f32.mrb[143].mxu1  ;;  %3746 = vmatprep.mubr.bf16.mxu0 %v7731_v25  ;;  %p5167_p11 = por %p5166_p10, %p5165_p9 }
 0x47b   :  { %v4457_v58 = vmax.f32 %v4456_v46, %v2702_v28  ;;  %v2706_v45 = vadd.f32 %v2705_v32, %v6824_v23 }
 0x47c   :  { %v4445_v41 = vmax.f32 %v4444_v36, %v2704_v59  ;;  %v3092_v55 = vpop.f32.mrb[156].mxu0  ;;  %3354 = vmatmul.mubr.bf16.gmra.mrb[248].mxu1 %v6673_v62  ;;  %p5168_p12 = pnand %p5167_p11, %p5161_p8 }
 0x47d   :  { %v4458_v48 = vmax.f32 %v4457_v58, %v2706_v45  ;;  %v3093_v14 = vadd.f32 %v3092_v55, %v6476_v15  ;;  %v3094_v13 = vpop.f32.mrb[157].mxu0  ;;  %3363 = vmatprep.mubr.bf16.mxu1 %v7731_v25 }
 0x47e   :  { %v4446_v26 = vrot.slane %v4445_v41, 4  ;;  %v3095_v11 = vadd.f32 %v3094_v13, %v6478_v0  ;;  %v3096_v2 = vpop.f32.mrb[158].mxu0 }
 0x47f   :  { %v4459_v20 = vrot.slane %v4458_v48, 4  ;;  %v4574_v21 = vmax.f32 %v4573_v8, %v3093_v14  ;;  %v3097_v10 = vadd.f32 %v3096_v2, %v6476_v15  ;;  %v2709_v22 = vpop.f32.mrb[144].mxu1  ;;  %v3098_v62 = vpop.f32.mrb[159].mxu0  ;;  %v7242_v15 = vrot.slane %v7236_v9, %v2065_v35 }
 0x480   :  { %v4447_v43 = vmax.f32 %v4445_v41, %v4446_v26  ;;  %v4587_v29 = vmax.f32 %v4586_v27, %v3095_v11  ;;  %v3099_v56 = vadd.f32 %v3098_v62, %v6478_v0  ;;  %v2711_v7 = vpop.f32.mrb[145].mxu1  ;;  %v2710_v0 = vadd.f32 %v2709_v22, %v6818_v39 }
 0x481   :  { %v4460_v17 = vmax.f32 %v4458_v48, %v4459_v20  ;;  %v4575_v42 = vmax.f32 %v4574_v21, %v3097_v10  ;;  %v2713_v44 = vpop.f32.mrb[146].mxu1  ;;  %3747 = vmatmul.mubr.bf16.gmra.mrb[8].mxu0 %v6751_v34  ;;  %v2712_v4 = vadd.f32 %v2711_v7, %v6824_v23 }
 0x482   :  { %v4448_v47 = vrot.slane %v4447_v43, 2  ;;  %v4588_v60 = vmax.f32 %v4587_v29, %v3099_v56  ;;  %v2714_v46 = vadd.f32 %v2713_v44, %v6818_v39  ;;  %v2715_v3 = vpop.f32.mrb[147].mxu1  ;;  %3756 = vmatprep.mubr.bf16.mxu0 %v7731_v25 }
 0x483   :  { %v4461_v37 = vrot.slane %v4460_v17, 2  ;;  %v4576_v24 = vrot.slane %v4575_v42, 4  ;;  %v2716_v53 = vadd.f32 %v2715_v3, %v6824_v23 }
 0x484   :  { %v4449_v63 = vmax.f32 %v4447_v43, %v4448_v47  ;;  %v4589_v40 = vrot.slane %v4588_v60, 4  ;;  %v4543_v18 = vmax.f32 %v2710_v0, %v2714_v46  ;;  %3364 = vmatmul.mubr.bf16.gmra.mrb[252].mxu1 %v6671_v57  ;;  %v3488_v30 = vpop.f32.mrb[160].mxu0 }
 0x485   :  { %v4462_v16 = vmax.f32 %v4460_v17, %v4461_v37  ;;  %v4577_v54 = vmax.f32 %v4575_v42, %v4576_v24  ;;  %v4556_v19 = vmax.f32 %v2712_v4, %v2716_v53  ;;  %v3490_v8 = vpop.f32.mrb[161].mxu0  ;;  %3373 = vmatprep.mubr.bf16.mxu1 %v7731_v25  ;;  %v3489_v36 = vadd.f32 %v3488_v30, %v7239_v38 }
 0x486   :  { %v4450_v28 = vrot.slane %v4449_v63, 1  ;;  %v4590_v52 = vmax.f32 %v4588_v60, %v4589_v40  ;;  %v3492_v27 = vpop.f32.mrb[162].mxu0  ;;  %v3491_v58 = vadd.f32 %v3490_v8, %v7242_v15 }
 0x487   :  { %v4463_v59 = vrot.slane %v4462_v16, 1  ;;  %v4578_v32 = vrot.slane %v4577_v54, 2  ;;  %v3493_v45 = vadd.f32 %v3492_v27, %v7239_v38  ;;  %v2719_v41 = vpop.f32.mrb[148].mxu1  ;;  %v3494_v57 = vpop.f32.mrb[163].mxu0 }
 0x488   :  { %v4451_v55 = vmax.f32 %v4449_v63, %v4450_v28  ;;  %v4591_v48 = vrot.slane %v4590_v52, 2  ;;  %v2720_v14 = vadd.f32 %v2719_v41, %v6818_v39  ;;  %v3495_v13 = vadd.f32 %v3494_v57, %v7242_v15  ;;  %v2721_v5 = vpop.f32.mrb[149].mxu1 }
 0x489   :  { %v4464_v35 = vmax.f32 %v4462_v16, %v4463_v59  ;;  %v4579_v26 = vmax.f32 %v4577_v54, %v4578_v32  ;;  %v3893_v11 = vmax.f32 %v3489_v36, %v3493_v45  ;;  %v2722_v2 = vadd.f32 %v2721_v5, %v6824_v23  ;;  %v2723_v20 = vpop.f32.mrb[150].mxu1  ;;  %3757 = vmatmul.mubr.bf16.gmra.mrb[12].mxu0 %v6749_v33 }
 0x48a   :  { %v7260_v21 = vsel %vm4721_vm6, %v4451_v55, %v7189_v50  ;;  %v4592_v10 = vmax.f32 %v4590_v52, %v4591_v48  ;;  %v4544_v22 = vmax.f32 %v4543_v18, %v2720_v14  ;;  %v3906_v62 = vmax.f32 %v3491_v58, %v3495_v13  ;;  %v2725_v43 = vpop.f32.mrb[151].mxu1  ;;  %3766 = vmatprep.mubr.bf16.mxu0 %v7731_v25 }
 0x48b   :  { %v7265_v29 = vsel %vm4721_vm6, %v4464_v35, %v7195_v51  ;;  %v4580_v56 = vrot.slane %v4579_v26, 1  ;;  %v4557_v7 = vmax.f32 %v4556_v19, %v2722_v2  ;;  %v2724_v17 = vadd.f32 %v2723_v20, %v6818_v39 }
 0x48c   :  { %v4593_v42 = vrot.slane %v4592_v10, 1  ;;  %v2726_v44 = vadd.f32 %v2725_v43, %v6824_v23  ;;  %3374 = vmatmul.mubr.bf16.gmra.mrb[0].mxu1 %v6723_v12  ;;  %v3498_v50 = vpop.f32.mrb[164].mxu0  ;;  %v7752_v43 = vld [vmem:[#allocation8_spill] sm:$0xff] }
 0x48d   :  { %v4581_v47 = vmax.f32 %v4579_v26, %v4580_v56  ;;  %v4545_v0 = vmax.f32 %v4544_v22, %v2724_v17  ;;  %v3499_v60 = vadd.f32 %v3498_v50, %v7239_v38  ;;  %v3500_v46 = vpop.f32.mrb[165].mxu0  ;;  %3383 = vmatprep.mubr.bf16.mxu1 %v7731_v25 }
 0x48e   :  { %v4594_v51 = vmax.f32 %v4592_v10, %v4593_v42  ;;  %v4558_v3 = vmax.f32 %v4557_v7, %v2726_v44  ;;  %v3501_v37 = vadd.f32 %v3500_v46, %v7242_v15  ;;  %v3502_v24 = vpop.f32.mrb[166].mxu0  ;;  %v2053_v44 = vsub.s32 4, %v7743_v31 }
 0x48f   :  { %v4738_v4 = vsel %vm4723_vm7, %v4581_v47, %v7119_v1  ;;  %v3894_v53 = vmax.f32 %v3893_v11, %v3499_v60  ;;  %v3503_v63 = vadd.f32 %v3502_v24, %v7239_v38  ;;  %v2729_v12 = vpop.f32.mrb[152].mxu1  ;;  %v3504_v40 = vpop.f32.mrb[167].mxu0 }
 0x490   :  { %v4745_v18 = vsel %vm4723_vm7, %v4594_v51, %v7129_v6  ;;  %v3907_v30 = vmax.f32 %v3906_v62, %v3501_v37  ;;  %v2730_v16 = vadd.f32 %v2729_v12, %v6818_v39  ;;  %v2731_v54 = vpop.f32.mrb[153].mxu1  ;;  %v3505_v8 = vadd.f32 %v3504_v40, %v7242_v15  ;;  %4792 = vst [vmem:[#allocation5 + $0x10] sm:$0xff] %v4738_v4 }
 0x491   :  { %v3895_v19 = vmax.f32 %v3894_v53, %v3503_v63  ;;  %v2732_v28 = vadd.f32 %v2731_v54, %v6824_v23  ;;  %v2733_v52 = vpop.f32.mrb[154].mxu1  ;;  %3767 = vmatmul.mubr.bf16.gmra.mrb[16].mxu0 %v6789_v49  ;;  %4793 = vst [vmem:[#allocation5 + $0x18] sm:$0xff] %v4745_v18  ;;  %v7304_v53 = vrot.slane %v7236_v9, %v2053_v44  ;;  %v7754_v44 = vld [vmem:[#allocation11_spill] sm:$0xff] }
 0x492   :  { %v4546_v1 = vmax.f32 %v4545_v0, %v2730_v16  ;;  %v2734_v36 = vadd.f32 %v2733_v52, %v6818_v39  ;;  %v2735_v27 = vpop.f32.mrb[155].mxu1  ;;  %3776 = vmatprep.mubr.bf16.mxu0 %v7731_v25  ;;  %v3908_v6 = vmax.f32 %v3907_v30, %v3505_v8  ;;  %v2057_v0 = vsub.s32 5, %v7743_v31  ;;  %v7753_v52 = vld [vmem:[#allocation12_spill] sm:$0xff] }
 0x493   :  { %v4559_v59 = vmax.f32 %v4558_v3, %v2732_v28  ;;  %v2736_v32 = vadd.f32 %v2735_v27, %v6824_v23 }
 0x494   :  { %v4547_v58 = vmax.f32 %v4546_v1, %v2734_v36  ;;  %3384 = vmatmul.mubr.bf16.gmra.mrb[4].mxu1 %v6721_v61  ;;  %v3508_v45 = vpop.f32.mrb[168].mxu0  ;;  %v7308_v40 = vrot.slane %v7236_v9, %v2057_v0 }
 0x495   :  { %v4560_v41 = vmax.f32 %v4559_v59, %v2736_v32  ;;  %v3509_v57 = vadd.f32 %v3508_v45, %v7239_v38  ;;  %v3510_v55 = vpop.f32.mrb[169].mxu0  ;;  %3393 = vmatprep.mubr.bf16.mxu1 %v7731_v25 }
 0x496   :  { %v3511_v48 = vadd.f32 %v3510_v55, %v7242_v15  ;;  %v3512_v14 = vpop.f32.mrb[170].mxu0 }
 0x497   :  { %v3896_v13 = vmax.f32 %v3895_v19, %v3509_v57  ;;  %v3513_v5 = vadd.f32 %v3512_v14, %v7239_v38  ;;  %v2739_v35 = vpop.f32.mrb[156].mxu1  ;;  %v3514_v26 = vpop.f32.mrb[171].mxu0 }
 0x498   :  { %v3909_v11 = vmax.f32 %v3908_v6, %v3511_v48  ;;  %v2740_v2 = vadd.f32 %v2739_v35, %v6818_v39  ;;  %v3515_v61 = vadd.f32 %v3514_v26, %v7242_v15  ;;  %v2741_v20 = vpop.f32.mrb[157].mxu1 }
 0x499   :  { %v3897_v10 = vmax.f32 %v3896_v13, %v3513_v5  ;;  %v2742_v22 = vadd.f32 %v2741_v20, %v6824_v23  ;;  %v2743_v62 = vpop.f32.mrb[158].mxu1  ;;  %3777 = vmatmul.mubr.bf16.gmra.mrb[20].mxu0 %v7752_v43 }
 0x49a   :  { %v4548_v56 = vmax.f32 %v4547_v58, %v2740_v2  ;;  %v3910_v7 = vmax.f32 %v3909_v11, %v3515_v61  ;;  %v2744_v17 = vadd.f32 %v2743_v62, %v6818_v39  ;;  %v2745_v42 = vpop.f32.mrb[159].mxu1  ;;  %3786 = vmatprep.mubr.bf16.mxu0 %v7731_v25 }
 0x49b   :  { %v4561_v50 = vmax.f32 %v4560_v41, %v2742_v22  ;;  %v2746_v47 = vadd.f32 %v2745_v42, %v6824_v23 }
 0x49c   :  { %v4549_v60 = vmax.f32 %v4548_v56, %v2744_v17  ;;  %3394 = vmatmul.mubr.bf16.gmra.mrb[8].mxu1 %v6751_v34  ;;  %v3518_v46 = vpop.f32.mrb[172].mxu0 }
 0x49d   :  { %v4562_v51 = vmax.f32 %v4561_v50, %v2746_v47  ;;  %v3519_v3 = vadd.f32 %v3518_v46, %v7239_v38  ;;  %v3520_v37 = vpop.f32.mrb[173].mxu0  ;;  %3403 = vmatprep.mubr.bf16.mxu1 %v7731_v25 }
 0x49e   :  { %v4550_v39 = vrot.slane %v4549_v60, 4  ;;  %v3521_v24 = vadd.f32 %v3520_v37, %v7242_v15  ;;  %v3522_v4 = vpop.f32.mrb[174].mxu0 }
 0x49f   :  { %v4563_v23 = vrot.slane %v4562_v51, 4  ;;  %v3898_v63 = vmax.f32 %v3897_v10, %v3519_v3  ;;  %v3523_v31 = vadd.f32 %v3522_v4, %v7239_v38  ;;  %v3135_v12 = vpop.f32.mrb[160].mxu1  ;;  %v3524_v34 = vpop.f32.mrb[175].mxu0 }
 0x4a0   :  { %v4551_v18 = vmax.f32 %v4549_v60, %v4550_v39  ;;  %v3911_v30 = vmax.f32 %v3910_v7, %v3521_v24  ;;  %v3525_v16 = vadd.f32 %v3524_v34, %v7242_v15  ;;  %v3137_v54 = vpop.f32.mrb[161].mxu1  ;;  %v3136_v36 = vadd.f32 %v3135_v12, %v7304_v53 }
 0x4a1   :  { %v4564_v19 = vmax.f32 %v4562_v51, %v4563_v23  ;;  %v7311_v8 = vmax.f32 %v3898_v63, %v3523_v31  ;;  %v3139_v28 = vpop.f32.mrb[162].mxu1  ;;  %3787 = vmatmul.mubr.bf16.gmra.mrb[24].mxu0 %v7753_v52  ;;  %v3138_v32 = vadd.f32 %v3137_v54, %v7308_v40 }
 0x4a2   :  { %v4552_v1 = vrot.slane %v4551_v18, 2  ;;  %v7315_v27 = vmax.f32 %v3911_v30, %v3525_v16  ;;  %v3140_v6 = vadd.f32 %v3139_v28, %v7304_v53  ;;  %v3141_v9 = vpop.f32.mrb[163].mxu1  ;;  %3796 = vmatprep.mubr.bf16.mxu0 %v7731_v25 }
 0x4a3   :  { %v4565_v59 = vrot.slane %v4564_v19, 2  ;;  %v3142_v58 = vadd.f32 %v3141_v9, %v7308_v40 }
 0x4a4   :  { %v4553_v45 = vmax.f32 %v4551_v18, %v4552_v1  ;;  %v3867_v41 = vmax.f32 %v3136_v36, %v3140_v6  ;;  %3404 = vmatmul.mubr.bf16.gmra.mrb[12].mxu1 %v6749_v33  ;;  %v3528_v57 = vpop.f32.mrb[176].mxu0 }
 0x4a5   :  { %v4566_v55 = vmax.f32 %v4564_v19, %v4565_v59  ;;  %v3880_v48 = vmax.f32 %v3138_v32, %v3142_v58  ;;  %v3530_v14 = vpop.f32.mrb[177].mxu0  ;;  %3413 = vmatprep.mubr.bf16.mxu1 %v7731_v25  ;;  %v3529_v26 = vadd.f32 %v3528_v57, %v7239_v38 }
 0x4a6   :  { %v4554_v13 = vrot.slane %v4553_v45, 1  ;;  %v3532_v5 = vpop.f32.mrb[178].mxu0  ;;  %v3531_v10 = vadd.f32 %v3530_v14, %v7242_v15 }
 0x4a7   :  { %v4567_v35 = vrot.slane %v4566_v55, 1  ;;  %v3533_v11 = vadd.f32 %v3532_v5, %v7239_v38  ;;  %v3145_v2 = vpop.f32.mrb[164].mxu1  ;;  %v3534_v61 = vpop.f32.mrb[179].mxu0  ;;  %v3900_v5 = vrot.slane %v7311_v8, 4 }
 0x4a8   :  { %v4555_v20 = vmax.f32 %v4553_v45, %v4554_v13  ;;  %v3146_v33 = vadd.f32 %v3145_v2, %v7304_v53  ;;  %v3535_v22 = vadd.f32 %v3534_v61, %v7242_v15  ;;  %v3147_v62 = vpop.f32.mrb[165].mxu1 }
 0x4a9   :  { %v4568_v56 = vmax.f32 %v4566_v55, %v4567_v35  ;;  %v3997_v7 = vmax.f32 %v3529_v26, %v3533_v11  ;;  %v3148_v17 = vadd.f32 %v3147_v62, %v7308_v40  ;;  %v3149_v42 = vpop.f32.mrb[166].mxu1  ;;  %3797 = vmatmul.mubr.bf16.gmra.mrb[28].mxu0 %v7754_v44 }
 0x4aa   :  { %v4724_v50 = vsel %vm4723_vm7, %v4555_v20, %v7260_v21  ;;  %v3868_v47 = vmax.f32 %v3867_v41, %v3146_v33  ;;  %v4010_v0 = vmax.f32 %v3531_v10, %v3535_v22  ;;  %v3151_v60 = vpop.f32.mrb[167].mxu1  ;;  %v3150_v3 = vadd.f32 %v3149_v42, %v7304_v53 }
 0x4ab   :  { %v4731_v46 = vsel %vm4723_vm7, %v4568_v56, %v7265_v29  ;;  %v3881_v51 = vmax.f32 %v3880_v48, %v3148_v17  ;;  %v3152_v37 = vadd.f32 %v3151_v60, %v7308_v40  ;;  %4790 = vst [vmem:[#allocation5] sm:$0xff] %v4724_v50  ;;  %v3913_v33 = vrot.slane %v7315_v27, 4 }
 0x4ac   :  { %3414 = vmatmul.mubr.bf16.gmra.mrb[16].mxu1 %v6789_v49  ;;  %v3538_v39 = vpop.f32.mrb[180].mxu0  ;;  %4791 = vst [vmem:[#allocation5 + $0x8] sm:$0xff] %v4731_v46  ;;  %v3869_v21 = vmax.f32 %v3868_v47, %v3150_v3  ;;  %v3901_v47 = vmax.f32 %v7311_v8, %v3900_v5 }
 0x4ad   :  { %v3539_v24 = vadd.f32 %v3538_v39, %v7239_v38  ;;  %v3540_v4 = vpop.f32.mrb[181].mxu0  ;;  %3423 = vmatprep.mubr.bf16.mxu1 %v7731_v25  ;;  %v3882_v23 = vmax.f32 %v3881_v51, %v3152_v37  ;;  %v3914_v3 = vmax.f32 %v7315_v27, %v3913_v33 }
 0x4ae   :  { %v3541_v63 = vadd.f32 %v3540_v4, %v7242_v15  ;;  %v3542_v29 = vpop.f32.mrb[182].mxu0 }
 0x4af   :  { %v3998_v31 = vmax.f32 %v3997_v7, %v3539_v24  ;;  %v3543_v12 = vadd.f32 %v3542_v29, %v7239_v38  ;;  %v3155_v34 = vpop.f32.mrb[168].mxu1  ;;  %v3544_v18 = vpop.f32.mrb[183].mxu0 }
 0x4b0   :  { %v4011_v30 = vmax.f32 %v4010_v0, %v3541_v63  ;;  %v3156_v49 = vadd.f32 %v3155_v34, %v7304_v53  ;;  %v3545_v16 = vadd.f32 %v3544_v18, %v7242_v15  ;;  %v3157_v54 = vpop.f32.mrb[169].mxu1  ;;  %v3915_v34 = vrot.slane %v3914_v3, 2 }
 0x4b1   :  { %v3999_v19 = vmax.f32 %v3998_v31, %v3543_v12  ;;  %v3158_v28 = vadd.f32 %v3157_v54, %v7308_v40  ;;  %v3159_v1 = vpop.f32.mrb[170].mxu1 }
 0x4b2   :  { %v3870_v36 = vmax.f32 %v3869_v21, %v3156_v49  ;;  %v4012_v6 = vmax.f32 %v4011_v30, %v3545_v16  ;;  %v3160_v9 = vadd.f32 %v3159_v1, %v7304_v53  ;;  %v3161_v59 = vpop.f32.mrb[171].mxu1  ;;  %v3902_v21 = vrot.slane %v3901_v47, 2 }
 0x4b3   :  { %v3883_v32 = vmax.f32 %v3882_v23, %v3158_v28  ;;  %v3162_v58 = vadd.f32 %v3161_v59, %v7308_v40 }
 0x4b4   :  { %v3871_v45 = vmax.f32 %v3870_v36, %v3160_v9  ;;  %3424 = vmatmul.mubr.bf16.gmra.mrb[20].mxu1 %v7752_v43  ;;  %v3548_v41 = vpop.f32.mrb[184].mxu0 }
 0x4b5   :  { %v3884_v57 = vmax.f32 %v3883_v32, %v3162_v58  ;;  %v3549_v55 = vadd.f32 %v3548_v41, %v7239_v38  ;;  %v3550_v48 = vpop.f32.mrb[185].mxu0  ;;  %3433 = vmatprep.mubr.bf16.mxu1 %v7731_v25  ;;  %v3916_v32 = vmax.f32 %v3914_v3, %v3915_v34 }
 0x4b6   :  { %v3551_v14 = vadd.f32 %v3550_v48, %v7242_v15  ;;  %v3552_v13 = vpop.f32.mrb[186].mxu0 }
 0x4b7   :  { %v4000_v35 = vmax.f32 %v3999_v19, %v3549_v55  ;;  %v3553_v26 = vadd.f32 %v3552_v13, %v7239_v38  ;;  %v3165_v11 = vpop.f32.mrb[172].mxu1  ;;  %v3554_v2 = vpop.f32.mrb[187].mxu0  ;;  %v3903_v19 = vmax.f32 %v3901_v47, %v3902_v21 }
 0x4b8   :  { %v4013_v61 = vmax.f32 %v4012_v6, %v3551_v14  ;;  %v3166_v43 = vadd.f32 %v3165_v11, %v7304_v53  ;;  %v3555_v20 = vadd.f32 %v3554_v2, %v7242_v15  ;;  %v3167_v10 = vpop.f32.mrb[173].mxu1 }
 0x4b9   :  { %v4001_v22 = vmax.f32 %v4000_v35, %v3553_v26  ;;  %v3168_v62 = vadd.f32 %v3167_v10, %v7308_v40  ;;  %v3169_v56 = vpop.f32.mrb[174].mxu1  ;;  %v3904_v48 = vrot.slane %v3903_v19, 1 }
 0x4ba   :  { %v3872_v7 = vmax.f32 %v3871_v45, %v3166_v43  ;;  %v4014_v17 = vmax.f32 %v4013_v61, %v3555_v20  ;;  %v3170_v42 = vadd.f32 %v3169_v56, %v7304_v53  ;;  %v3171_v50 = vpop.f32.mrb[175].mxu1  ;;  %v3917_v20 = vrot.slane %v3916_v32, 1 }
 0x4bb   :  { %v3885_v0 = vmax.f32 %v3884_v57, %v3168_v62  ;;  %v3172_v60 = vadd.f32 %v3171_v50, %v7308_v40 }
 0x4bc   :  { %v7359_v46 = vmax.f32 %v3872_v7, %v3170_v42  ;;  %3434 = vmatmul.mubr.bf16.gmra.mrb[24].mxu1 %v7753_v52  ;;  %v3558_v51 = vpop.f32.mrb[188].mxu0 }
 0x4bd   :  { %v7363_v37 = vmax.f32 %v3885_v0, %v3172_v60  ;;  %v3559_v39 = vadd.f32 %v3558_v51, %v7239_v38  ;;  %v3560_v24 = vpop.f32.mrb[189].mxu0  ;;  %3443 = vmatprep.mubr.bf16.mxu1 %v7731_v25 }
 0x4be   :  { %v3561_v4 = vadd.f32 %v3560_v24, %v7242_v15  ;;  %v3562_v8 = vpop.f32.mrb[190].mxu0  ;;  %v3905_v24 = vmax.f32 %v3903_v19, %v3904_v48 }
 0x4bf   :  { %v4002_v23 = vmax.f32 %v4001_v22, %v3559_v39  ;;  %v3563_v63 = vadd.f32 %v3562_v8, %v7239_v38  ;;  %v3175_v29 = vpop.f32.mrb[176].mxu1  ;;  %v3564_v31 = vpop.f32.mrb[191].mxu0 }
 0x4c0   :  { %v4015_v52 = vmax.f32 %v4014_v17, %v3561_v4  ;;  %v3565_v12 = vadd.f32 %v3564_v31, %v7242_v15  ;;  %v3177_v27 = vpop.f32.mrb[177].mxu1  ;;  %v3176_v49 = vadd.f32 %v3175_v29, %v7304_v53 }
 0x4c1   :  { %v4003_v18 = vmax.f32 %v4002_v23, %v3563_v63  ;;  %v3179_v30 = vpop.f32.mrb[178].mxu1  ;;  %v3178_v1 = vadd.f32 %v3177_v27, %v7308_v40  ;;  %v3918_v63 = vmax.f32 %v3916_v32, %v3917_v20 }
 0x4c2   :  { %v4016_v16 = vmax.f32 %v4015_v52, %v3565_v12  ;;  %v3180_v25 = vadd.f32 %v3179_v30, %v7304_v53  ;;  %v3181_v54 = vpop.f32.mrb[179].mxu1 }
 0x4c3   :  { %v4004_v28 = vrot.slane %v4003_v18, 4  ;;  %v3182_v36 = vadd.f32 %v3181_v54, %v7308_v40 }
 0x4c4   :  { %v4017_v6 = vrot.slane %v4016_v16, 4  ;;  %v3971_v9 = vmax.f32 %v3176_v49, %v3180_v25  ;;  %3444 = vmatmul.mubr.bf16.gmra.mrb[28].mxu1 %v7754_v44  ;;  %v3568_v59 = vpop.f32.mrb[192].mxu0 }
 0x4c5   :  { %v4005_v58 = vmax.f32 %v4003_v18, %v4004_v28  ;;  %v3984_v45 = vmax.f32 %v3178_v1, %v3182_v36  ;;  %v3570_v41 = vpop.f32.mrb[193].mxu0  ;;  %v3569_v13 = vadd.f32 %v3568_v59, %v7239_v38  ;;  %v3874_v28 = vrot.slane %v7359_v46, 4 }
 0x4c6   :  { %v4018_v57 = vmax.f32 %v4016_v16, %v4017_v6  ;;  %v3572_v55 = vpop.f32.mrb[194].mxu0  ;;  %v3571_v2 = vadd.f32 %v3570_v41, %v7242_v15  ;;  %v3887_v1 = vrot.slane %v7363_v37, 4 }
 0x4c7   :  { %v4006_v14 = vrot.slane %v4005_v58, 2  ;;  %v3573_v5 = vadd.f32 %v3572_v55, %v7239_v38  ;;  %v3185_v35 = vpop.f32.mrb[180].mxu1  ;;  %v3574_v26 = vpop.f32.mrb[195].mxu0 }
 0x4c8   :  { %v4019_v11 = vrot.slane %v4018_v57, 2  ;;  %v3186_v44 = vadd.f32 %v3185_v35, %v7304_v53  ;;  %v3575_v61 = vadd.f32 %v3574_v26, %v7242_v15  ;;  %v3187_v43 = vpop.f32.mrb[181].mxu1 }
 0x4c9   :  { %v4007_v10 = vmax.f32 %v4005_v58, %v4006_v14  ;;  %v4101_v33 = vmax.f32 %v3569_v13, %v3573_v5  ;;  %v3188_v22 = vadd.f32 %v3187_v43, %v7308_v40  ;;  %v3189_v62 = vpop.f32.mrb[182].mxu1  ;;  %v3875_v14 = vmax.f32 %v7359_v46, %v3874_v28 }
 0x4ca   :  { %v4020_v56 = vmax.f32 %v4018_v57, %v4019_v11  ;;  %v3972_v7 = vmax.f32 %v3971_v9, %v3186_v44  ;;  %v4114_v17 = vmax.f32 %v3571_v2, %v3575_v61  ;;  %v3190_v42 = vadd.f32 %v3189_v62, %v7304_v53  ;;  %v3191_v50 = vpop.f32.mrb[183].mxu1 }
 0x4cb   :  { %v4008_v47 = vrot.slane %v4007_v10, 1  ;;  %v3985_v0 = vmax.f32 %v3984_v45, %v3188_v22  ;;  %v3192_v60 = vadd.f32 %v3191_v50, %v7308_v40  ;;  %v3888_v13 = vmax.f32 %v7363_v37, %v3887_v1 }
 0x4cc   :  { %v4021_v51 = vrot.slane %v4020_v56, 1  ;;  %v3973_v3 = vmax.f32 %v3972_v7, %v3190_v42  ;;  %v3578_v39 = vpop.f32.mrb[196].mxu0  ;;  %v3876_v62 = vrot.slane %v3875_v14, 2 }
 0x4cd   :  { %v4009_v4 = vmax.f32 %v4007_v10, %v4008_v47  ;;  %v3986_v8 = vmax.f32 %v3985_v0, %v3192_v60  ;;  %v3579_v21 = vadd.f32 %v3578_v39, %v7239_v38  ;;  %v3580_v23 = vpop.f32.mrb[197].mxu0  ;;  %v3889_v37 = vrot.slane %v3888_v13, 2 }
 0x4ce   :  { %v4022_v29 = vmax.f32 %v4020_v56, %v4021_v51  ;;  %v3581_v31 = vadd.f32 %v3580_v23, %v7242_v15  ;;  %v3582_v52 = vpop.f32.mrb[198].mxu0 }
 0x4cf   :  { %v7386_v12 = vsel %vm4711_vm1, %v4009_v4, %v3905_v24  ;;  %v4102_v27 = vmax.f32 %v4101_v33, %v3579_v21  ;;  %v3583_v34 = vadd.f32 %v3582_v52, %v7239_v38  ;;  %v3195_v18 = vpop.f32.mrb[184].mxu1  ;;  %v3584_v30 = vpop.f32.mrb[199].mxu0  ;;  %v3877_v24 = vmax.f32 %v3875_v14, %v3876_v62 }
 0x4d0   :  { %v7390_v49 = vsel %vm4711_vm1, %v4022_v29, %v3918_v63  ;;  %v4115_v16 = vmax.f32 %v4114_v17, %v3581_v31  ;;  %v3196_v25 = vadd.f32 %v3195_v18, %v7304_v53  ;;  %v3585_v54 = vadd.f32 %v3584_v30, %v7242_v15  ;;  %v3197_v19 = vpop.f32.mrb[185].mxu1 }
 0x4d1   :  { %v4103_v36 = vmax.f32 %v4102_v27, %v3583_v34  ;;  %v3198_v6 = vadd.f32 %v3197_v19, %v7308_v40  ;;  %v3199_v9 = vpop.f32.mrb[186].mxu1  ;;  %v3890_v4 = vmax.f32 %v3888_v13, %v3889_v37  ;;  %v3878_v28 = vrot.slane %v3877_v24, 1 }
 0x4d2   :  { %v3974_v59 = vmax.f32 %v3973_v3, %v3196_v25  ;;  %v4116_v32 = vmax.f32 %v4115_v16, %v3585_v54  ;;  %v3200_v58 = vadd.f32 %v3199_v9, %v7304_v53  ;;  %v3201_v45 = vpop.f32.mrb[187].mxu1 }
 0x4d3   :  { %v3987_v41 = vmax.f32 %v3986_v8, %v3198_v6  ;;  %v3202_v57 = vadd.f32 %v3201_v45, %v7308_v40  ;;  %v3891_v1 = vrot.slane %v3890_v4, 1 }
 0x4d4   :  { %v3975_v55 = vmax.f32 %v3974_v59, %v3200_v58  ;;  %v3588_v48 = vpop.f32.mrb[200].mxu0 }
 0x4d5   :  { %v3988_v5 = vmax.f32 %v3987_v41, %v3202_v57  ;;  %v3589_v35 = vadd.f32 %v3588_v48, %v7239_v38  ;;  %v3590_v26 = vpop.f32.mrb[201].mxu0 }
 0x4d6   :  { %v3591_v11 = vadd.f32 %v3590_v26, %v7242_v15  ;;  %v3592_v2 = vpop.f32.mrb[202].mxu0 }
 0x4d7   :  { %v4104_v44 = vmax.f32 %v4103_v36, %v3589_v35  ;;  %v3593_v61 = vadd.f32 %v3592_v2, %v7239_v38  ;;  %v3205_v43 = vpop.f32.mrb[188].mxu1  ;;  %v3594_v20 = vpop.f32.mrb[203].mxu0 }
 0x4d8   :  { %v4117_v10 = vmax.f32 %v4116_v32, %v3591_v11  ;;  %v3206_v33 = vadd.f32 %v3205_v43, %v7304_v53  ;;  %v3595_v22 = vadd.f32 %v3594_v20, %v7242_v15  ;;  %v3207_v46 = vpop.f32.mrb[189].mxu1  ;;  %v3879_v11 = vmax.f32 %v3877_v24, %v3878_v28 }
 0x4d9   :  { %v4105_v56 = vmax.f32 %v4104_v44, %v3593_v61  ;;  %v3208_v7 = vadd.f32 %v3207_v46, %v7308_v40  ;;  %v3209_v17 = vpop.f32.mrb[190].mxu1  ;;  %v3892_v20 = vmax.f32 %v3890_v4, %v3891_v1 }
 0x4da   :  { %v3976_v42 = vmax.f32 %v3975_v55, %v3206_v33  ;;  %v4118_v50 = vmax.f32 %v4117_v10, %v3595_v22  ;;  %v3210_v47 = vadd.f32 %v3209_v17, %v7304_v53  ;;  %v3211_v0 = vpop.f32.mrb[191].mxu1 }
 0x4db   :  { %v3989_v60 = vmax.f32 %v3988_v5, %v3208_v7  ;;  %v3212_v51 = vadd.f32 %v3211_v0, %v7308_v40 }
 0x4dc   :  { %v3977_v3 = vmax.f32 %v3976_v42, %v3210_v47  ;;  %v3598_v39 = vpop.f32.mrb[204].mxu0 }
 0x4dd   :  { %v3990_v8 = vmax.f32 %v3989_v60, %v3212_v51  ;;  %v3599_v21 = vadd.f32 %v3598_v39, %v7239_v38  ;;  %v3600_v23 = vpop.f32.mrb[205].mxu0 }
 0x4de   :  { %v3978_v63 = vrot.slane %v3977_v3, 4  ;;  %v3601_v29 = vadd.f32 %v3600_v23, %v7242_v15  ;;  %v3602_v31 = vpop.f32.mrb[206].mxu0 }
 0x4df   :  { %v3991_v52 = vrot.slane %v3990_v8, 4  ;;  %v4106_v27 = vmax.f32 %v4105_v56, %v3599_v21  ;;  %v3603_v34 = vadd.f32 %v3602_v31, %v7239_v38  ;;  %v3215_v18 = vpop.f32.mrb[192].mxu1  ;;  %v3604_v30 = vpop.f32.mrb[207].mxu0 }
 0x4e0   :  { %v3979_v16 = vmax.f32 %v3977_v3, %v3978_v63  ;;  %v4119_v25 = vmax.f32 %v4118_v50, %v3601_v29  ;;  %v3605_v54 = vadd.f32 %v3604_v30, %v7242_v15  ;;  %v3217_v19 = vpop.f32.mrb[193].mxu1  ;;  %v3216_v32 = vadd.f32 %v3215_v18, %v7304_v53 }
 0x4e1   :  { %v3992_v36 = vmax.f32 %v3990_v8, %v3991_v52  ;;  %v4107_v6 = vmax.f32 %v4106_v27, %v3603_v34  ;;  %v3219_v9 = vpop.f32.mrb[194].mxu1  ;;  %v3218_v48 = vadd.f32 %v3217_v19, %v7308_v40 }
 0x4e2   :  { %v3980_v59 = vrot.slane %v3979_v16, 2  ;;  %v4120_v58 = vmax.f32 %v4119_v25, %v3605_v54  ;;  %v3220_v45 = vadd.f32 %v3219_v9, %v7304_v53  ;;  %v3221_v41 = vpop.f32.mrb[195].mxu1 }
 0x4e3   :  { %v3993_v57 = vrot.slane %v3992_v36, 2  ;;  %v4108_v55 = vrot.slane %v4107_v6, 4  ;;  %v3222_v14 = vadd.f32 %v3221_v41, %v7308_v40 }
 0x4e4   :  { %v3981_v13 = vmax.f32 %v3979_v16, %v3980_v59  ;;  %v4121_v5 = vrot.slane %v4120_v58, 4  ;;  %v4075_v35 = vmax.f32 %v3216_v32, %v3220_v45  ;;  %v3608_v26 = vpop.f32.mrb[208].mxu0 }
 0x4e5   :  { %v3994_v2 = vmax.f32 %v3992_v36, %v3993_v57  ;;  %v4109_v44 = vmax.f32 %v4107_v6, %v4108_v55  ;;  %v4088_v61 = vmax.f32 %v3218_v48, %v3222_v14  ;;  %v3610_v43 = vpop.f32.mrb[209].mxu0  ;;  %v3609_v22 = vadd.f32 %v3608_v26, %v7239_v38 }
 0x4e6   :  { %v3982_v10 = vrot.slane %v3981_v13, 1  ;;  %v4122_v33 = vmax.f32 %v4120_v58, %v4121_v5  ;;  %v3612_v46 = vpop.f32.mrb[210].mxu0  ;;  %v3611_v56 = vadd.f32 %v3610_v43, %v7242_v15 }
 0x4e7   :  { %v3995_v62 = vrot.slane %v3994_v2, 1  ;;  %v4110_v37 = vrot.slane %v4109_v44, 2  ;;  %v3613_v7 = vadd.f32 %v3612_v46, %v7239_v38  ;;  %v3225_v17 = vpop.f32.mrb[196].mxu1  ;;  %v3614_v42 = vpop.f32.mrb[211].mxu0 }
 0x4e8   :  { %v3983_v50 = vmax.f32 %v3981_v13, %v3982_v10  ;;  %v4123_v47 = vrot.slane %v4122_v33, 2  ;;  %v3226_v0 = vadd.f32 %v3225_v17, %v7304_v53  ;;  %v3615_v60 = vadd.f32 %v3614_v42, %v7242_v15  ;;  %v3227_v51 = vpop.f32.mrb[197].mxu1 }
 0x4e9   :  { %v3996_v3 = vmax.f32 %v3994_v2, %v3995_v62  ;;  %v4111_v39 = vmax.f32 %v4109_v44, %v4110_v37  ;;  %v4205_v24 = vmax.f32 %v3609_v22, %v3613_v7  ;;  %v3228_v4 = vadd.f32 %v3227_v51, %v7308_v40  ;;  %v3229_v8 = vpop.f32.mrb[198].mxu1 }
 0x4ea   :  { %v7424_v21 = vsel %vm4711_vm1, %v3983_v50, %v3879_v11  ;;  %v4124_v23 = vmax.f32 %v4122_v33, %v4123_v47  ;;  %v4076_v63 = vmax.f32 %v4075_v35, %v3226_v0  ;;  %v4218_v29 = vmax.f32 %v3611_v56, %v3615_v60  ;;  %v3231_v31 = vpop.f32.mrb[199].mxu1 }
 0x4eb   :  { %v7427_v52 = vsel %vm4711_vm1, %v3996_v3, %v3892_v20  ;;  %v4112_v27 = vrot.slane %v4111_v39, 1  ;;  %v4089_v34 = vmax.f32 %v4088_v61, %v3228_v4  ;;  %v3230_v18 = vadd.f32 %v3229_v8, %v7304_v53 }
 0x4ec   :  { %v4125_v30 = vrot.slane %v4124_v23, 1  ;;  %v3232_v16 = vadd.f32 %v3231_v31, %v7308_v40  ;;  %v3618_v25 = vpop.f32.mrb[212].mxu0 }
 0x4ed   :  { %v4113_v54 = vmax.f32 %v4111_v39, %v4112_v27  ;;  %v4077_v19 = vmax.f32 %v4076_v63, %v3230_v18  ;;  %v3619_v28 = vadd.f32 %v3618_v25, %v7239_v38  ;;  %v3620_v1 = vpop.f32.mrb[213].mxu0 }
 0x4ee   :  { %v4126_v36 = vmax.f32 %v4124_v23, %v4125_v30  ;;  %v4090_v6 = vmax.f32 %v4089_v34, %v3232_v16  ;;  %v3621_v9 = vadd.f32 %v3620_v1, %v7242_v15  ;;  %v3622_v59 = vpop.f32.mrb[214].mxu0 }
 0x4ef   :  { %v7435_v32 = vsel %vm4713_vm2, %v4113_v54, %v7386_v12  ;;  %v4206_v58 = vmax.f32 %v4205_v24, %v3619_v28  ;;  %v3623_v45 = vadd.f32 %v3622_v59, %v7239_v38  ;;  %v3235_v41 = vpop.f32.mrb[200].mxu1  ;;  %v3624_v57 = vpop.f32.mrb[215].mxu0 }
 0x4f0   :  { %v7440_v55 = vsel %vm4713_vm2, %v4126_v36, %v7390_v49  ;;  %v4219_v48 = vmax.f32 %v4218_v29, %v3621_v9  ;;  %v3236_v14 = vadd.f32 %v3235_v41, %v7304_v53  ;;  %v3625_v13 = vadd.f32 %v3624_v57, %v7242_v15  ;;  %v3237_v5 = vpop.f32.mrb[201].mxu1 }
 0x4f1   :  { %v4207_v35 = vmax.f32 %v4206_v58, %v3623_v45  ;;  %v3238_v26 = vadd.f32 %v3237_v5, %v7308_v40  ;;  %v3239_v12 = vpop.f32.mrb[202].mxu1 }
 0x4f2   :  { %v4078_v11 = vmax.f32 %v4077_v19, %v3236_v14  ;;  %v4220_v2 = vmax.f32 %v4219_v48, %v3625_v13  ;;  %v3240_v44 = vadd.f32 %v3239_v12, %v7304_v53  ;;  %v3241_v61 = vpop.f32.mrb[203].mxu1 }
 0x4f3   :  { %v4091_v43 = vmax.f32 %v4090_v6, %v3238_v26  ;;  %v3242_v20 = vadd.f32 %v3241_v61, %v7308_v40 }
 0x4f4   :  { %v4079_v49 = vmax.f32 %v4078_v11, %v3240_v44  ;;  %v3628_v10 = vpop.f32.mrb[216].mxu0 }
 0x4f5   :  { %v4092_v33 = vmax.f32 %v4091_v43, %v3242_v20  ;;  %v3629_v22 = vadd.f32 %v3628_v10, %v7239_v38  ;;  %v3630_v46 = vpop.f32.mrb[217].mxu0 }
 0x4f6   :  { %v3631_v62 = vadd.f32 %v3630_v46, %v7242_v15  ;;  %v3632_v37 = vpop.f32.mrb[218].mxu0 }
 0x4f7   :  { %v4208_v56 = vmax.f32 %v4207_v35, %v3629_v22  ;;  %v3633_v7 = vadd.f32 %v3632_v37, %v7239_v38  ;;  %v3245_v17 = vpop.f32.mrb[204].mxu1  ;;  %v3634_v42 = vpop.f32.mrb[219].mxu0 }
 0x4f8   :  { %v4221_v50 = vmax.f32 %v4220_v2, %v3631_v62  ;;  %v3246_v47 = vadd.f32 %v3245_v17, %v7304_v53  ;;  %v3635_v0 = vadd.f32 %v3634_v42, %v7242_v15  ;;  %v3247_v60 = vpop.f32.mrb[205].mxu1 }
 0x4f9   :  { %v4209_v51 = vmax.f32 %v4208_v56, %v3633_v7  ;;  %v3248_v3 = vadd.f32 %v3247_v60, %v7308_v40  ;;  %v3249_v39 = vpop.f32.mrb[206].mxu1 }
 0x4fa   :  { %v4080_v24 = vmax.f32 %v4079_v49, %v3246_v47  ;;  %v4222_v4 = vmax.f32 %v4221_v50, %v3635_v0  ;;  %v3250_v8 = vadd.f32 %v3249_v39, %v7304_v53  ;;  %v3251_v23 = vpop.f32.mrb[207].mxu1 }
 0x4fb   :  { %v4093_v63 = vmax.f32 %v4092_v33, %v3248_v3  ;;  %v3252_v29 = vadd.f32 %v3251_v23, %v7308_v40 }
 0x4fc   :  { %v4081_v31 = vmax.f32 %v4080_v24, %v3250_v8  ;;  %v3638_v27 = vpop.f32.mrb[220].mxu0 }
 0x4fd   :  { %v4094_v34 = vmax.f32 %v4093_v63, %v3252_v29  ;;  %v3639_v18 = vadd.f32 %v3638_v27, %v7239_v38  ;;  %v3640_v30 = vpop.f32.mrb[221].mxu0 }
 0x4fe   :  { %v4082_v16 = vrot.slane %v4081_v31, 4  ;;  %v3641_v25 = vadd.f32 %v3640_v30, %v7242_v15  ;;  %v3642_v54 = vpop.f32.mrb[222].mxu0 }
 0x4ff   :  { %v4095_v19 = vrot.slane %v4094_v34, 4  ;;  %v4210_v28 = vmax.f32 %v4209_v51, %v3639_v18  ;;  %v3643_v1 = vadd.f32 %v3642_v54, %v7239_v38  ;;  %v3255_v36 = vpop.f32.mrb[208].mxu1  ;;  %v3644_v6 = vpop.f32.mrb[223].mxu0 }
 0x500   :  { %v4083_v9 = vmax.f32 %v4081_v31, %v4082_v16  ;;  %v4223_v59 = vmax.f32 %v4222_v4, %v3641_v25  ;;  %v3645_v58 = vadd.f32 %v3644_v6, %v7242_v15  ;;  %v3257_v45 = vpop.f32.mrb[209].mxu1  ;;  %v3256_v13 = vadd.f32 %v3255_v36, %v7304_v53 }
 0x501   :  { %v4096_v41 = vmax.f32 %v4094_v34, %v4095_v19  ;;  %v4211_v57 = vmax.f32 %v4210_v28, %v3643_v1  ;;  %v3259_v48 = vpop.f32.mrb[210].mxu1  ;;  %v3258_v2 = vadd.f32 %v3257_v45, %v7308_v40 }
 0x502   :  { %v4084_v14 = vrot.slane %v4083_v9, 2  ;;  %v4224_v5 = vmax.f32 %v4223_v59, %v3645_v58  ;;  %v3260_v35 = vadd.f32 %v3259_v48, %v7304_v53  ;;  %v3261_v26 = vpop.f32.mrb[211].mxu1 }
 0x503   :  { %v4097_v12 = vrot.slane %v4096_v41, 2  ;;  %v4212_v11 = vrot.slane %v4211_v57, 4  ;;  %v3262_v44 = vadd.f32 %v3261_v26, %v7308_v40 }
 0x504   :  { %v4085_v61 = vmax.f32 %v4083_v9, %v4084_v14  ;;  %v4225_v43 = vrot.slane %v4224_v5, 4  ;;  %v4179_v20 = vmax.f32 %v3256_v13, %v3260_v35  ;;  %v3648_v49 = vpop.f32.mrb[224].mxu0 }
 0x505   :  { %v4098_v10 = vmax.f32 %v4096_v41, %v4097_v12  ;;  %v4213_v33 = vmax.f32 %v4211_v57, %v4212_v11  ;;  %v4192_v22 = vmax.f32 %v3258_v2, %v3262_v44  ;;  %v3650_v46 = vpop.f32.mrb[225].mxu0  ;;  %v3649_v56 = vadd.f32 %v3648_v49, %v7239_v38 }
 0x506   :  { %v4086_v62 = vrot.slane %v4085_v61, 1  ;;  %v4226_v37 = vmax.f32 %v4224_v5, %v4225_v43  ;;  %v3652_v7 = vpop.f32.mrb[226].mxu0  ;;  %v3651_v50 = vadd.f32 %v3650_v46, %v7242_v15 }
 0x507   :  { %v4099_v17 = vrot.slane %v4098_v10, 1  ;;  %v4214_v42 = vrot.slane %v4213_v33, 2  ;;  %v3653_v47 = vadd.f32 %v3652_v7, %v7239_v38  ;;  %v3265_v0 = vpop.f32.mrb[212].mxu1  ;;  %v3654_v60 = vpop.f32.mrb[227].mxu0 }
 0x508   :  { %v4087_v51 = vmax.f32 %v4085_v61, %v4086_v62  ;;  %v4227_v3 = vrot.slane %v4226_v37, 2  ;;  %v3266_v39 = vadd.f32 %v3265_v0, %v7304_v53  ;;  %v3655_v24 = vadd.f32 %v3654_v60, %v7242_v15  ;;  %v3267_v4 = vpop.f32.mrb[213].mxu1 }
 0x509   :  { %v4100_v8 = vmax.f32 %v4098_v10, %v4099_v17  ;;  %v4215_v23 = vmax.f32 %v4213_v33, %v4214_v42  ;;  %v4309_v63 = vmax.f32 %v3649_v56, %v3653_v47  ;;  %v3268_v29 = vadd.f32 %v3267_v4, %v7308_v40  ;;  %v3269_v31 = vpop.f32.mrb[214].mxu1 }
 0x50a   :  { %v7471_v27 = vsel %vm4713_vm2, %v4087_v51, %v7424_v21  ;;  %v4228_v34 = vmax.f32 %v4226_v37, %v4227_v3  ;;  %v4180_v18 = vmax.f32 %v4179_v20, %v3266_v39  ;;  %v4322_v30 = vmax.f32 %v3651_v50, %v3655_v24  ;;  %v3271_v16 = vpop.f32.mrb[215].mxu1 }
 0x50b   :  { %v7475_v25 = vsel %vm4713_vm2, %v4100_v8, %v7427_v52  ;;  %v4216_v54 = vrot.slane %v4215_v23, 1  ;;  %v4193_v19 = vmax.f32 %v4192_v22, %v3268_v29  ;;  %v3270_v28 = vadd.f32 %v3269_v31, %v7304_v53 }
 0x50c   :  { %v4229_v1 = vrot.slane %v4228_v34, 1  ;;  %v3272_v36 = vadd.f32 %v3271_v16, %v7308_v40  ;;  %v3658_v6 = vpop.f32.mrb[228].mxu0 }
 0x50d   :  { %v4217_v9 = vmax.f32 %v4215_v23, %v4216_v54  ;;  %v4181_v59 = vmax.f32 %v4180_v18, %v3270_v28  ;;  %v3659_v21 = vadd.f32 %v3658_v6, %v7239_v38  ;;  %v3660_v58 = vpop.f32.mrb[229].mxu0 }
 0x50e   :  { %v4230_v45 = vmax.f32 %v4228_v34, %v4229_v1  ;;  %v4194_v41 = vmax.f32 %v4193_v19, %v3272_v36  ;;  %v3661_v57 = vadd.f32 %v3660_v58, %v7242_v15  ;;  %v3662_v48 = vpop.f32.mrb[230].mxu0 }
 0x50f   :  { %v7483_v52 = vsel %vm4715_vm3, %v4217_v9, %v7435_v32  ;;  %v4310_v14 = vmax.f32 %v4309_v63, %v3659_v21  ;;  %v3663_v13 = vadd.f32 %v3662_v48, %v7239_v38  ;;  %v3275_v5 = vpop.f32.mrb[216].mxu1  ;;  %v3664_v35 = vpop.f32.mrb[231].mxu0 }
 0x510   :  { %v7488_v26 = vsel %vm4715_vm3, %v4230_v45, %v7440_v55  ;;  %v4323_v12 = vmax.f32 %v4322_v30, %v3661_v57  ;;  %v3276_v11 = vadd.f32 %v3275_v5, %v7304_v53  ;;  %v3665_v2 = vadd.f32 %v3664_v35, %v7242_v15  ;;  %v3277_v44 = vpop.f32.mrb[217].mxu1 }
 0x511   :  { %v4311_v61 = vmax.f32 %v4310_v14, %v3663_v13  ;;  %v3278_v43 = vadd.f32 %v3277_v44, %v7308_v40  ;;  %v3279_v32 = vpop.f32.mrb[218].mxu1 }
 0x512   :  { %v4182_v20 = vmax.f32 %v4181_v59, %v3276_v11  ;;  %v4324_v49 = vmax.f32 %v4323_v12, %v3665_v2  ;;  %v3280_v10 = vadd.f32 %v3279_v32, %v7304_v53  ;;  %v3281_v33 = vpop.f32.mrb[219].mxu1 }
 0x513   :  { %v4195_v22 = vmax.f32 %v4194_v41, %v3278_v43  ;;  %v3282_v46 = vadd.f32 %v3281_v33, %v7308_v40 }
 0x514   :  { %v4183_v55 = vmax.f32 %v4182_v20, %v3280_v10  ;;  %v3668_v62 = vpop.f32.mrb[232].mxu0 }
 0x515   :  { %v4196_v37 = vmax.f32 %v4195_v22, %v3282_v46  ;;  %v3669_v56 = vadd.f32 %v3668_v62, %v7239_v38  ;;  %v3670_v7 = vpop.f32.mrb[233].mxu0 }
 0x516   :  { %v3671_v17 = vadd.f32 %v3670_v7, %v7242_v15  ;;  %v3672_v42 = vpop.f32.mrb[234].mxu0 }
 0x517   :  { %v4312_v50 = vmax.f32 %v4311_v61, %v3669_v56  ;;  %v3673_v47 = vadd.f32 %v3672_v42, %v7239_v38  ;;  %v3285_v0 = vpop.f32.mrb[220].mxu1  ;;  %v3674_v60 = vpop.f32.mrb[235].mxu0 }
 0x518   :  { %v4325_v51 = vmax.f32 %v4324_v49, %v3671_v17  ;;  %v3286_v3 = vadd.f32 %v3285_v0, %v7304_v53  ;;  %v3675_v39 = vadd.f32 %v3674_v60, %v7242_v15  ;;  %v3287_v24 = vpop.f32.mrb[221].mxu1 }
 0x519   :  { %v4313_v4 = vmax.f32 %v4312_v50, %v3673_v47  ;;  %v3288_v8 = vadd.f32 %v3287_v24, %v7308_v40  ;;  %v3289_v23 = vpop.f32.mrb[222].mxu1 }
 0x51a   :  { %v4184_v63 = vmax.f32 %v4183_v55, %v3286_v3  ;;  %v4326_v29 = vmax.f32 %v4325_v51, %v3675_v39  ;;  %v3290_v31 = vadd.f32 %v3289_v23, %v7304_v53  ;;  %v3291_v34 = vpop.f32.mrb[223].mxu1 }
 0x51b   :  { %v4197_v18 = vmax.f32 %v4196_v37, %v3288_v8  ;;  %v3292_v30 = vadd.f32 %v3291_v34, %v7308_v40 }
 0x51c   :  { %v4185_v16 = vmax.f32 %v4184_v63, %v3290_v31  ;;  %v3678_v54 = vpop.f32.mrb[236].mxu0 }
 0x51d   :  { %v4198_v19 = vmax.f32 %v4197_v18, %v3292_v30  ;;  %v3679_v28 = vadd.f32 %v3678_v54, %v7239_v38  ;;  %v3680_v1 = vpop.f32.mrb[237].mxu0 }
 0x51e   :  { %v4186_v36 = vrot.slane %v4185_v16, 4  ;;  %v3681_v6 = vadd.f32 %v3680_v1, %v7242_v15  ;;  %v3682_v9 = vpop.f32.mrb[238].mxu0 }
 0x51f   :  { %v4199_v59 = vrot.slane %v4198_v19, 4  ;;  %v4314_v21 = vmax.f32 %v4313_v4, %v3679_v28  ;;  %v3683_v58 = vadd.f32 %v3682_v9, %v7239_v38  ;;  %v3295_v45 = vpop.f32.mrb[224].mxu1  ;;  %v3684_v41 = vpop.f32.mrb[239].mxu0 }
 0x520   :  { %v4187_v57 = vmax.f32 %v4185_v16, %v4186_v36  ;;  %v4327_v48 = vmax.f32 %v4326_v29, %v3681_v6  ;;  %v3685_v14 = vadd.f32 %v3684_v41, %v7242_v15  ;;  %v3297_v13 = vpop.f32.mrb[225].mxu1  ;;  %v3296_v2 = vadd.f32 %v3295_v45, %v7304_v53 }
 0x521   :  { %v4200_v5 = vmax.f32 %v4198_v19, %v4199_v59  ;;  %v4315_v35 = vmax.f32 %v4314_v21, %v3683_v58  ;;  %v3299_v12 = vpop.f32.mrb[226].mxu1  ;;  %v3298_v49 = vadd.f32 %v3297_v13, %v7308_v40 }
 0x522   :  { %v4188_v11 = vrot.slane %v4187_v57, 2  ;;  %v4328_v44 = vmax.f32 %v4327_v48, %v3685_v14  ;;  %v3300_v61 = vadd.f32 %v3299_v12, %v7304_v53  ;;  %v3301_v43 = vpop.f32.mrb[227].mxu1 }
 0x523   :  { %v4201_v32 = vrot.slane %v4200_v5, 2  ;;  %v4316_v20 = vrot.slane %v4315_v35, 4  ;;  %v3302_v10 = vadd.f32 %v3301_v43, %v7308_v40 }
 0x524   :  { %v4189_v33 = vmax.f32 %v4187_v57, %v4188_v11  ;;  %v4329_v22 = vrot.slane %v4328_v44, 4  ;;  %v4283_v46 = vmax.f32 %v3296_v2, %v3300_v61  ;;  %v3688_v55 = vpop.f32.mrb[240].mxu0 }
 0x525   :  { %v4202_v62 = vmax.f32 %v4200_v5, %v4201_v32  ;;  %v4317_v37 = vmax.f32 %v4315_v35, %v4316_v20  ;;  %v4296_v56 = vmax.f32 %v3298_v49, %v3302_v10  ;;  %v3690_v7 = vpop.f32.mrb[241].mxu0  ;;  %v3689_v50 = vadd.f32 %v3688_v55, %v7239_v38 }
 0x526   :  { %v4190_v17 = vrot.slane %v4189_v33, 1  ;;  %v4330_v42 = vmax.f32 %v4328_v44, %v4329_v22  ;;  %v3692_v47 = vpop.f32.mrb[242].mxu0  ;;  %v3691_v51 = vadd.f32 %v3690_v7, %v7242_v15 }
 0x527   :  { %v4203_v0 = vrot.slane %v4202_v62, 1  ;;  %v4318_v60 = vrot.slane %v4317_v37, 2  ;;  %v3693_v3 = vadd.f32 %v3692_v47, %v7239_v38  ;;  %v3305_v39 = vpop.f32.mrb[228].mxu1  ;;  %v3694_v24 = vpop.f32.mrb[243].mxu0 }
 0x528   :  { %v4191_v4 = vmax.f32 %v4189_v33, %v4190_v17  ;;  %v4331_v8 = vrot.slane %v4330_v42, 2  ;;  %v3306_v23 = vadd.f32 %v3305_v39, %v7304_v53  ;;  %v3695_v63 = vadd.f32 %v3694_v24, %v7242_v15  ;;  %v3307_v29 = vpop.f32.mrb[229].mxu1 }
 0x529   :  { %v4204_v31 = vmax.f32 %v4202_v62, %v4203_v0  ;;  %v4319_v34 = vmax.f32 %v4317_v37, %v4318_v60  ;;  %v4413_v18 = vmax.f32 %v3689_v50, %v3693_v3  ;;  %v3308_v30 = vadd.f32 %v3307_v29, %v7308_v40  ;;  %v3309_v16 = vpop.f32.mrb[230].mxu1 }
 0x52a   :  { %v7519_v54 = vsel %vm4715_vm3, %v4191_v4, %v7471_v27  ;;  %v4332_v19 = vmax.f32 %v4330_v42, %v4331_v8  ;;  %v4284_v28 = vmax.f32 %v4283_v46, %v3306_v23  ;;  %v4426_v1 = vmax.f32 %v3691_v51, %v3695_v63  ;;  %v3311_v36 = vpop.f32.mrb[231].mxu1 }
 0x52b   :  { %v7523_v6 = vsel %vm4715_vm3, %v4204_v31, %v7475_v25  ;;  %v4320_v9 = vrot.slane %v4319_v34, 1  ;;  %v4297_v59 = vmax.f32 %v4296_v56, %v3308_v30  ;;  %v3310_v21 = vadd.f32 %v3309_v16, %v7304_v53 }
 0x52c   :  { %v4333_v58 = vrot.slane %v4332_v19, 1  ;;  %v3312_v45 = vadd.f32 %v3311_v36, %v7308_v40  ;;  %v3698_v41 = vpop.f32.mrb[244].mxu0 }
 0x52d   :  { %v4321_v57 = vmax.f32 %v4319_v34, %v4320_v9  ;;  %v4285_v48 = vmax.f32 %v4284_v28, %v3310_v21  ;;  %v3699_v27 = vadd.f32 %v3698_v41, %v7239_v38  ;;  %v3700_v14 = vpop.f32.mrb[245].mxu0 }
 0x52e   :  { %v4334_v13 = vmax.f32 %v4332_v19, %v4333_v58  ;;  %v4298_v5 = vmax.f32 %v4297_v59, %v3312_v45  ;;  %v3701_v35 = vadd.f32 %v3700_v14, %v7242_v15  ;;  %v3702_v12 = vpop.f32.mrb[246].mxu0 }
 0x52f   :  { %v7531_v25 = vsel %vm4717_vm4, %v4321_v57, %v7483_v52  ;;  %v4414_v11 = vmax.f32 %v4413_v18, %v3699_v27  ;;  %v3703_v2 = vadd.f32 %v3702_v12, %v7239_v38  ;;  %v3315_v44 = vpop.f32.mrb[232].mxu1  ;;  %v3704_v61 = vpop.f32.mrb[247].mxu0 }
 0x530   :  { %v7536_v43 = vsel %vm4717_vm4, %v4334_v13, %v7488_v26  ;;  %v4427_v32 = vmax.f32 %v4426_v1, %v3701_v35  ;;  %v3316_v20 = vadd.f32 %v3315_v44, %v7304_v53  ;;  %v3705_v49 = vadd.f32 %v3704_v61, %v7242_v15  ;;  %v3317_v10 = vpop.f32.mrb[233].mxu1 }
 0x531   :  { %v4415_v33 = vmax.f32 %v4414_v11, %v3703_v2  ;;  %v3318_v22 = vadd.f32 %v3317_v10, %v7308_v40  ;;  %v3319_v52 = vpop.f32.mrb[234].mxu1 }
 0x532   :  { %v4286_v46 = vmax.f32 %v4285_v48, %v3316_v20  ;;  %v4428_v55 = vmax.f32 %v4427_v32, %v3705_v49  ;;  %v3320_v62 = vadd.f32 %v3319_v52, %v7304_v53  ;;  %v3321_v37 = vpop.f32.mrb[235].mxu1 }
 0x533   :  { %v4299_v56 = vmax.f32 %v4298_v5, %v3318_v22  ;;  %v3322_v7 = vadd.f32 %v3321_v37, %v7308_v40 }
 0x534   :  { %v4287_v26 = vmax.f32 %v4286_v46, %v3320_v62  ;;  %v3708_v17 = vpop.f32.mrb[248].mxu0 }
 0x535   :  { %v4300_v42 = vmax.f32 %v4299_v56, %v3322_v7  ;;  %v3709_v50 = vadd.f32 %v3708_v17, %v7239_v38  ;;  %v3710_v47 = vpop.f32.mrb[249].mxu0 }
 0x536   :  { %v3711_v0 = vadd.f32 %v3710_v47, %v7242_v15  ;;  %v3712_v60 = vpop.f32.mrb[250].mxu0 }
 0x537   :  { %v4416_v51 = vmax.f32 %v4415_v33, %v3709_v50  ;;  %v3713_v3 = vadd.f32 %v3712_v60, %v7239_v38  ;;  %v3325_v39 = vpop.f32.mrb[236].mxu1  ;;  %v3714_v24 = vpop.f32.mrb[251].mxu0 }
 0x538   :  { %v4429_v4 = vmax.f32 %v4428_v55, %v3711_v0  ;;  %v3326_v8 = vadd.f32 %v3325_v39, %v7304_v53  ;;  %v3715_v23 = vadd.f32 %v3714_v24, %v7242_v15  ;;  %v3327_v63 = vpop.f32.mrb[237].mxu1 }
 0x539   :  { %v4417_v29 = vmax.f32 %v4416_v51, %v3713_v3  ;;  %v3328_v31 = vadd.f32 %v3327_v63, %v7308_v40  ;;  %v3329_v34 = vpop.f32.mrb[238].mxu1 }
 0x53a   :  { %v4288_v18 = vmax.f32 %v4287_v26, %v3326_v8  ;;  %v4430_v30 = vmax.f32 %v4429_v4, %v3715_v23  ;;  %v3330_v16 = vadd.f32 %v3329_v34, %v7304_v53  ;;  %v3331_v19 = vpop.f32.mrb[239].mxu1 }
 0x53b   :  { %v4301_v28 = vmax.f32 %v4300_v42, %v3328_v31  ;;  %v3332_v1 = vadd.f32 %v3331_v19, %v7308_v40 }
 0x53c   :  { %v4289_v36 = vmax.f32 %v4288_v18, %v3330_v16  ;;  %v3718_v9 = vpop.f32.mrb[252].mxu0 }
 0x53d   :  { %v4302_v59 = vmax.f32 %v4301_v28, %v3332_v1  ;;  %v3719_v21 = vadd.f32 %v3718_v9, %v7239_v38  ;;  %v3720_v58 = vpop.f32.mrb[253].mxu0 }
 0x53e   :  { %v4290_v45 = vrot.slane %v4289_v36, 4  ;;  %v3721_v41 = vadd.f32 %v3720_v58, %v7242_v15  ;;  %v3722_v57 = vpop.f32.mrb[254].mxu0 }
 0x53f   :  { %v4303_v48 = vrot.slane %v4302_v59, 4  ;;  %v4418_v27 = vmax.f32 %v4417_v29, %v3719_v21  ;;  %v3723_v14 = vadd.f32 %v3722_v57, %v7239_v38  ;;  %v3335_v13 = vpop.f32.mrb[240].mxu1  ;;  %v3724_v5 = vpop.f32.mrb[255].mxu0 }
 0x540   :  { %v4291_v35 = vmax.f32 %v4289_v36, %v4290_v45  ;;  %v4431_v12 = vmax.f32 %v4430_v30, %v3721_v41  ;;  %v3725_v11 = vadd.f32 %v3724_v5, %v7242_v15  ;;  %v3337_v2 = vpop.f32.mrb[241].mxu1  ;;  %v3336_v49 = vadd.f32 %v3335_v13, %v7304_v53 }
 0x541   :  { %v4304_v44 = vmax.f32 %v4302_v59, %v4303_v48  ;;  %v4419_v61 = vmax.f32 %v4418_v27, %v3723_v14  ;;  %v3339_v32 = vpop.f32.mrb[242].mxu1  ;;  %v3338_v55 = vadd.f32 %v3337_v2, %v7308_v40 }
 0x542   :  { %v4292_v20 = vrot.slane %v4291_v35, 2  ;;  %v4432_v10 = vmax.f32 %v4431_v12, %v3725_v11  ;;  %v3340_v33 = vadd.f32 %v3339_v32, %v7304_v53  ;;  %v3341_v22 = vpop.f32.mrb[243].mxu1 }
 0x543   :  { %v4305_v52 = vrot.slane %v4304_v44, 2  ;;  %v4420_v46 = vrot.slane %v4419_v61, 4  ;;  %v3342_v62 = vadd.f32 %v3341_v22, %v7308_v40 }
 0x544   :  { %v4293_v37 = vmax.f32 %v4291_v35, %v4292_v20  ;;  %v4433_v56 = vrot.slane %v4432_v10, 4  ;;  %v4387_v7 = vmax.f32 %v3336_v49, %v3340_v33  ;;  %v3728_v26 = vpop.f32.mrb[0].mxu0 }
 0x545   :  { %v4306_v17 = vmax.f32 %v4304_v44, %v4305_v52  ;;  %v4421_v42 = vmax.f32 %v4419_v61, %v4420_v46  ;;  %v4400_v50 = vmax.f32 %v3338_v55, %v3342_v62  ;;  %v3730_v47 = vpop.f32.mrb[1].mxu0  ;;  %v3729_v51 = vadd.f32 %v3728_v26, %v7239_v38 }
 0x546   :  { %v4294_v0 = vrot.slane %v4293_v37, 1  ;;  %v4434_v60 = vmax.f32 %v4432_v10, %v4433_v56  ;;  %v3732_v3 = vpop.f32.mrb[2].mxu0  ;;  %v3731_v4 = vadd.f32 %v3730_v47, %v7242_v15 }
 0x547   :  { %v4307_v39 = vrot.slane %v4306_v17, 1  ;;  %v4422_v24 = vrot.slane %v4421_v42, 2  ;;  %v3733_v8 = vadd.f32 %v3732_v3, %v7239_v38  ;;  %v3345_v23 = vpop.f32.mrb[244].mxu1  ;;  %v3734_v63 = vpop.f32.mrb[3].mxu0 }
 0x548   :  { %v4295_v29 = vmax.f32 %v4293_v37, %v4294_v0  ;;  %v4435_v31 = vrot.slane %v4434_v60, 2  ;;  %v3346_v34 = vadd.f32 %v3345_v23, %v7304_v53  ;;  %v3735_v18 = vadd.f32 %v3734_v63, %v7242_v15  ;;  %v3347_v30 = vpop.f32.mrb[245].mxu1 }
 0x549   :  { %v4308_v16 = vmax.f32 %v4306_v17, %v4307_v39  ;;  %v4423_v19 = vmax.f32 %v4421_v42, %v4422_v24  ;;  %v4517_v28 = vmax.f32 %v3729_v51, %v3733_v8  ;;  %v3348_v1 = vadd.f32 %v3347_v30, %v7308_v40  ;;  %v3349_v36 = vpop.f32.mrb[246].mxu1 }
 0x54a   :  { %v7567_v9 = vsel %vm4717_vm4, %v4295_v29, %v7519_v54  ;;  %v4436_v59 = vmax.f32 %v4434_v60, %v4435_v31  ;;  %v4388_v21 = vmax.f32 %v4387_v7, %v3346_v34  ;;  %v4530_v58 = vmax.f32 %v3731_v4, %v3735_v18  ;;  %v3351_v45 = vpop.f32.mrb[247].mxu1 }
 0x54b   :  { %v7571_v41 = vsel %vm4717_vm4, %v4308_v16, %v7523_v6  ;;  %v4424_v57 = vrot.slane %v4423_v19, 1  ;;  %v4401_v48 = vmax.f32 %v4400_v50, %v3348_v1  ;;  %v3350_v27 = vadd.f32 %v3349_v36, %v7304_v53 }
 0x54c   :  { %v4437_v14 = vrot.slane %v4436_v59, 1  ;;  %v3352_v13 = vadd.f32 %v3351_v45, %v7308_v40  ;;  %v3738_v5 = vpop.f32.mrb[4].mxu0 }
 0x54d   :  { %v4425_v35 = vmax.f32 %v4423_v19, %v4424_v57  ;;  %v4389_v12 = vmax.f32 %v4388_v21, %v3350_v27  ;;  %v3739_v54 = vadd.f32 %v3738_v5, %v7239_v38  ;;  %v3740_v11 = vpop.f32.mrb[5].mxu0 }
 0x54e   :  { %v4438_v2 = vmax.f32 %v4436_v59, %v4437_v14  ;;  %v4402_v44 = vmax.f32 %v4401_v48, %v3352_v13  ;;  %v3741_v61 = vadd.f32 %v3740_v11, %v7242_v15  ;;  %v3742_v32 = vpop.f32.mrb[6].mxu0 }
 0x54f   :  { %v7579_v6 = vsel %vm4719_vm5, %v4425_v35, %v7531_v25  ;;  %v4518_v20 = vmax.f32 %v4517_v28, %v3739_v54  ;;  %v3743_v49 = vadd.f32 %v3742_v32, %v7239_v38  ;;  %v3355_v10 = vpop.f32.mrb[248].mxu1  ;;  %v3744_v33 = vpop.f32.mrb[7].mxu0 }
 0x550   :  { %v7584_v22 = vsel %vm4719_vm5, %v4438_v2, %v7536_v43  ;;  %v4531_v52 = vmax.f32 %v4530_v58, %v3741_v61  ;;  %v3356_v46 = vadd.f32 %v3355_v10, %v7304_v53  ;;  %v3745_v55 = vadd.f32 %v3744_v33, %v7242_v15  ;;  %v3357_v62 = vpop.f32.mrb[249].mxu1 }
 0x551   :  { %v4519_v37 = vmax.f32 %v4518_v20, %v3743_v49  ;;  %v3358_v56 = vadd.f32 %v3357_v62, %v7308_v40  ;;  %v3359_v25 = vpop.f32.mrb[250].mxu1 }
 0x552   :  { %v4390_v7 = vmax.f32 %v4389_v12, %v3356_v46  ;;  %v4532_v26 = vmax.f32 %v4531_v52, %v3745_v55  ;;  %v3360_v17 = vadd.f32 %v3359_v25, %v7304_v53  ;;  %v3361_v42 = vpop.f32.mrb[251].mxu1 }
 0x553   :  { %v4403_v50 = vmax.f32 %v4402_v44, %v3358_v56  ;;  %v3362_v47 = vadd.f32 %v3361_v42, %v7308_v40 }
 0x554   :  { %v4391_v43 = vmax.f32 %v4390_v7, %v3360_v17  ;;  %v3748_v0 = vpop.f32.mrb[8].mxu0 }
 0x555   :  { %v4404_v60 = vmax.f32 %v4403_v50, %v3362_v47  ;;  %v3749_v51 = vadd.f32 %v3748_v0, %v7239_v38  ;;  %v3750_v3 = vpop.f32.mrb[9].mxu0 }
 0x556   :  { %v3751_v39 = vadd.f32 %v3750_v3, %v7242_v15  ;;  %v3752_v24 = vpop.f32.mrb[10].mxu0 }
 0x557   :  { %v4520_v4 = vmax.f32 %v4519_v37, %v3749_v51  ;;  %v3753_v8 = vadd.f32 %v3752_v24, %v7239_v38  ;;  %v3365_v23 = vpop.f32.mrb[252].mxu1  ;;  %v3754_v63 = vpop.f32.mrb[11].mxu0 }
 0x558   :  { %v4533_v29 = vmax.f32 %v4532_v26, %v3751_v39  ;;  %v3366_v31 = vadd.f32 %v3365_v23, %v7304_v53  ;;  %v3755_v34 = vadd.f32 %v3754_v63, %v7242_v15  ;;  %v3367_v18 = vpop.f32.mrb[253].mxu1 }
 0x559   :  { %v4521_v30 = vmax.f32 %v4520_v4, %v3753_v8  ;;  %v3368_v16 = vadd.f32 %v3367_v18, %v7308_v40  ;;  %v3369_v19 = vpop.f32.mrb[254].mxu1 }
 0x55a   :  { %v4392_v28 = vmax.f32 %v4391_v43, %v3366_v31  ;;  %v4534_v1 = vmax.f32 %v4533_v29, %v3755_v34  ;;  %v3370_v36 = vadd.f32 %v3369_v19, %v7304_v53  ;;  %v3371_v59 = vpop.f32.mrb[255].mxu1 }
 0x55b   :  { %v4405_v21 = vmax.f32 %v4404_v60, %v3368_v16  ;;  %v3372_v58 = vadd.f32 %v3371_v59, %v7308_v40 }
 0x55c   :  { %v4393_v45 = vmax.f32 %v4392_v28, %v3370_v36  ;;  %v3758_v57 = vpop.f32.mrb[12].mxu0 }
 0x55d   :  { %v4406_v48 = vmax.f32 %v4405_v21, %v3372_v58  ;;  %v3759_v27 = vadd.f32 %v3758_v57, %v7239_v38  ;;  %v3760_v14 = vpop.f32.mrb[13].mxu0 }
 0x55e   :  { %v4394_v13 = vrot.slane %v4393_v45, 4  ;;  %v3761_v5 = vadd.f32 %v3760_v14, %v7242_v15  ;;  %v3762_v35 = vpop.f32.mrb[14].mxu0 }
 0x55f   :  { %v4407_v12 = vrot.slane %v4406_v48, 4  ;;  %v4522_v54 = vmax.f32 %v4521_v30, %v3759_v27  ;;  %v3763_v11 = vadd.f32 %v3762_v35, %v7239_v38  ;;  %v3375_v2 = vpop.f32.mrb[0].mxu1  ;;  %v3764_v44 = vpop.f32.mrb[15].mxu0 }
 0x560   :  { %v4395_v61 = vmax.f32 %v4393_v45, %v4394_v13  ;;  %v4535_v32 = vmax.f32 %v4534_v1, %v3761_v5  ;;  %v3765_v20 = vadd.f32 %v3764_v44, %v7242_v15  ;;  %v3377_v49 = vpop.f32.mrb[1].mxu1  ;;  %v3376_v55 = vadd.f32 %v3375_v2, %v7304_v53 }
 0x561   :  { %v4408_v10 = vmax.f32 %v4406_v48, %v4407_v12  ;;  %v4523_v33 = vmax.f32 %v4522_v54, %v3763_v11  ;;  %v3379_v52 = vpop.f32.mrb[2].mxu1  ;;  %v3378_v26 = vadd.f32 %v3377_v49, %v7308_v40 }
 0x562   :  { %v4396_v46 = vrot.slane %v4395_v61, 2  ;;  %v4536_v62 = vmax.f32 %v4535_v32, %v3765_v20  ;;  %v3380_v37 = vadd.f32 %v3379_v52, %v7304_v53  ;;  %v3381_v56 = vpop.f32.mrb[3].mxu1 }
 0x563   :  { %v4409_v25 = vrot.slane %v4408_v10, 2  ;;  %v4524_v7 = vrot.slane %v4523_v33, 4  ;;  %v3382_v17 = vadd.f32 %v3381_v56, %v7308_v40 }
 0x564   :  { %v4397_v42 = vmax.f32 %v4395_v61, %v4396_v46  ;;  %v4537_v50 = vrot.slane %v4536_v62, 4  ;;  %v4491_v47 = vmax.f32 %v3376_v55, %v3380_v37  ;;  %v3768_v43 = vpop.f32.mrb[16].mxu0 }
 0x565   :  { %v4410_v0 = vmax.f32 %v4408_v10, %v4409_v25  ;;  %v4525_v60 = vmax.f32 %v4523_v33, %v4524_v7  ;;  %v4504_v51 = vmax.f32 %v3378_v26, %v3382_v17  ;;  %v3770_v3 = vpop.f32.mrb[17].mxu0  ;;  %v3769_v4 = vadd.f32 %v3768_v43, %v7239_v38 }
 0x566   :  { %v4398_v39 = vrot.slane %v4397_v42, 1  ;;  %v4538_v24 = vmax.f32 %v4536_v62, %v4537_v50  ;;  %v3772_v8 = vpop.f32.mrb[18].mxu0  ;;  %v3771_v29 = vadd.f32 %v3770_v3, %v7242_v15 }
 0x567   :  { %v4411_v23 = vrot.slane %v4410_v0, 1  ;;  %v4526_v63 = vrot.slane %v4525_v60, 2  ;;  %v3773_v31 = vadd.f32 %v3772_v8, %v7239_v38  ;;  %v3385_v34 = vpop.f32.mrb[4].mxu1  ;;  %v3774_v18 = vpop.f32.mrb[19].mxu0 }
 0x568   :  { %v4399_v30 = vmax.f32 %v4397_v42, %v4398_v39  ;;  %v4539_v16 = vrot.slane %v4538_v24, 2  ;;  %v3386_v19 = vadd.f32 %v3385_v34, %v7304_v53  ;;  %v3775_v28 = vadd.f32 %v3774_v18, %v7242_v15  ;;  %v3387_v1 = vpop.f32.mrb[5].mxu1 }
 0x569   :  { %v4412_v36 = vmax.f32 %v4410_v0, %v4411_v23  ;;  %v4527_v59 = vmax.f32 %v4525_v60, %v4526_v63  ;;  %v4621_v21 = vmax.f32 %v3769_v4, %v3773_v31  ;;  %v3388_v58 = vadd.f32 %v3387_v1, %v7308_v40  ;;  %v3389_v45 = vpop.f32.mrb[6].mxu1 }
 0x56a   :  { %v7615_v57 = vsel %vm4719_vm5, %v4399_v30, %v7567_v9  ;;  %v4540_v48 = vmax.f32 %v4538_v24, %v4539_v16  ;;  %v4492_v27 = vmax.f32 %v4491_v47, %v3386_v19  ;;  %v4634_v14 = vmax.f32 %v3771_v29, %v3775_v28  ;;  %v3391_v13 = vpop.f32.mrb[7].mxu1 }
 0x56b   :  { %v7619_v5 = vsel %vm4719_vm5, %v4412_v36, %v7571_v41  ;;  %v4528_v35 = vrot.slane %v4527_v59, 1  ;;  %v4505_v12 = vmax.f32 %v4504_v51, %v3388_v58  ;;  %v3390_v54 = vadd.f32 %v3389_v45, %v7304_v53 }
 0x56c   :  { %v4541_v11 = vrot.slane %v4540_v48, 1  ;;  %v3392_v2 = vadd.f32 %v3391_v13, %v7308_v40  ;;  %v3778_v44 = vpop.f32.mrb[20].mxu0 }
 0x56d   :  { %v4529_v61 = vmax.f32 %v4527_v59, %v4528_v35  ;;  %v4493_v32 = vmax.f32 %v4492_v27, %v3390_v54  ;;  %v3779_v9 = vadd.f32 %v3778_v44, %v7239_v38  ;;  %v3780_v20 = vpop.f32.mrb[21].mxu0 }
 0x56e   :  { %v4542_v49 = vmax.f32 %v4540_v48, %v4541_v11  ;;  %v4506_v10 = vmax.f32 %v4505_v12, %v3392_v2  ;;  %v3781_v33 = vadd.f32 %v3780_v20, %v7242_v15  ;;  %v3782_v52 = vpop.f32.mrb[22].mxu0 }
 0x56f   :  { %v7627_v41 = vsel %vm4721_vm6, %v4529_v61, %v7579_v6  ;;  %v4622_v46 = vmax.f32 %v4621_v21, %v3779_v9  ;;  %v3783_v55 = vadd.f32 %v3782_v52, %v7239_v38  ;;  %v3395_v62 = vpop.f32.mrb[8].mxu1  ;;  %v3784_v37 = vpop.f32.mrb[23].mxu0 }
 0x570   :  { %v7632_v56 = vsel %vm4721_vm6, %v4542_v49, %v7584_v22  ;;  %v4635_v25 = vmax.f32 %v4634_v14, %v3781_v33  ;;  %v3396_v7 = vadd.f32 %v3395_v62, %v7304_v53  ;;  %v3785_v26 = vadd.f32 %v3784_v37, %v7242_v15  ;;  %v3397_v17 = vpop.f32.mrb[9].mxu1 }
 0x571   :  { %v4623_v42 = vmax.f32 %v4622_v46, %v3783_v55  ;;  %v3398_v50 = vadd.f32 %v3397_v17, %v7308_v40  ;;  %v3399_v6 = vpop.f32.mrb[10].mxu1 }
 0x572   :  { %v4494_v47 = vmax.f32 %v4493_v32, %v3396_v7  ;;  %v4636_v43 = vmax.f32 %v4635_v25, %v3785_v26  ;;  %v3400_v0 = vadd.f32 %v3399_v6, %v7304_v53  ;;  %v3401_v60 = vpop.f32.mrb[11].mxu1 }
 0x573   :  { %v4507_v51 = vmax.f32 %v4506_v10, %v3398_v50  ;;  %v3402_v3 = vadd.f32 %v3401_v60, %v7308_v40 }
 0x574   :  { %v4495_v22 = vmax.f32 %v4494_v47, %v3400_v0  ;;  %v3788_v39 = vpop.f32.mrb[24].mxu0 }
 0x575   :  { %v4508_v24 = vmax.f32 %v4507_v51, %v3402_v3  ;;  %v3789_v4 = vadd.f32 %v3788_v39, %v7239_v38  ;;  %v3790_v8 = vpop.f32.mrb[25].mxu0 }
 0x576   :  { %v3791_v23 = vadd.f32 %v3790_v8, %v7242_v15  ;;  %v3792_v63 = vpop.f32.mrb[26].mxu0 }
 0x577   :  { %v4624_v29 = vmax.f32 %v4623_v42, %v3789_v4  ;;  %v3793_v31 = vadd.f32 %v3792_v63, %v7239_v38  ;;  %v3405_v34 = vpop.f32.mrb[12].mxu1  ;;  %v3794_v18 = vpop.f32.mrb[27].mxu0 }
 0x578   :  { %v4637_v30 = vmax.f32 %v4636_v43, %v3791_v23  ;;  %v3406_v16 = vadd.f32 %v3405_v34, %v7304_v53  ;;  %v3795_v19 = vadd.f32 %v3794_v18, %v7242_v15  ;;  %v3407_v28 = vpop.f32.mrb[13].mxu1 }
 0x579   :  { %v4625_v1 = vmax.f32 %v4624_v29, %v3793_v31  ;;  %v3408_v36 = vadd.f32 %v3407_v28, %v7308_v40  ;;  %v3409_v59 = vpop.f32.mrb[14].mxu1 }
 0x57a   :  { %v4496_v21 = vmax.f32 %v4495_v22, %v3406_v16  ;;  %v4638_v58 = vmax.f32 %v4637_v30, %v3795_v19  ;;  %v3410_v45 = vadd.f32 %v3409_v59, %v7304_v53  ;;  %v3411_v48 = vpop.f32.mrb[15].mxu1 }
 0x57b   :  { %v4509_v27 = vmax.f32 %v4508_v24, %v3408_v36  ;;  %v3412_v14 = vadd.f32 %v3411_v48, %v7308_v40 }
 0x57c   :  { %v4497_v13 = vmax.f32 %v4496_v21, %v3410_v45  ;;  %v3798_v35 = vpop.f32.mrb[28].mxu0 }
 0x57d   :  { %v4510_v12 = vmax.f32 %v4509_v27, %v3412_v14  ;;  %v3799_v54 = vadd.f32 %v3798_v35, %v7239_v38  ;;  %v3800_v11 = vpop.f32.mrb[29].mxu0 }
 0x57e   :  { %v4498_v2 = vrot.slane %v4497_v13, 4  ;;  %v3801_v44 = vadd.f32 %v3800_v11, %v7242_v15  ;;  %v3802_v61 = vpop.f32.mrb[30].mxu0 }
 0x57f   :  { %v4511_v32 = vrot.slane %v4510_v12, 4  ;;  %v4626_v9 = vmax.f32 %v4625_v1, %v3799_v54  ;;  %v3803_v20 = vadd.f32 %v3802_v61, %v7239_v38  ;;  %v3415_v49 = vpop.f32.mrb[16].mxu1  ;;  %v3804_v10 = vpop.f32.mrb[31].mxu0 }
 0x580   :  { %v4499_v33 = vmax.f32 %v4497_v13, %v4498_v2  ;;  %v4639_v52 = vmax.f32 %v4638_v58, %v3801_v44  ;;  %v3805_v46 = vadd.f32 %v3804_v10, %v7242_v15  ;;  %v3417_v55 = vpop.f32.mrb[17].mxu1  ;;  %v3416_v26 = vadd.f32 %v3415_v49, %v7304_v53 }
 0x581   :  { %v4512_v62 = vmax.f32 %v4510_v12, %v4511_v32  ;;  %v4627_v37 = vmax.f32 %v4626_v9, %v3803_v20  ;;  %v3419_v25 = vpop.f32.mrb[18].mxu1  ;;  %v3418_v38 = vadd.f32 %v3417_v55, %v7308_v40 }
 0x582   :  { %v4500_v7 = vrot.slane %v4499_v33, 2  ;;  %v4640_v17 = vmax.f32 %v4639_v52, %v3805_v46  ;;  %v3420_v42 = vadd.f32 %v3419_v25, %v7304_v53  ;;  %v3421_v50 = vpop.f32.mrb[19].mxu1 }
 0x583   :  { %v4513_v6 = vrot.slane %v4512_v62, 2  ;;  %v4628_v47 = vrot.slane %v4627_v37, 4  ;;  %v3422_v43 = vadd.f32 %v3421_v50, %v7308_v40 }
 0x584   :  { %v4501_v0 = vmax.f32 %v4499_v33, %v4500_v7  ;;  %v4641_v60 = vrot.slane %v4640_v17, 4  ;;  %v4595_v15 = vmax.f32 %v3416_v26, %v3420_v42 }
 0x585   :  { %v4514_v51 = vmax.f32 %v4512_v62, %v4513_v6  ;;  %v4629_v3 = vmax.f32 %v4627_v37, %v4628_v47  ;;  %v4608_v22 = vmax.f32 %v3418_v38, %v3422_v43 }
 0x586   :  { %v4502_v39 = vrot.slane %v4501_v0, 1  ;;  %v4642_v24 = vmax.f32 %v4640_v17, %v4641_v60 }
 0x587   :  { %v4515_v4 = vrot.slane %v4514_v51, 1  ;;  %v4630_v8 = vrot.slane %v4629_v3, 2  ;;  %v3425_v23 = vpop.f32.mrb[20].mxu1 }
 0x588   :  { %v4503_v63 = vmax.f32 %v4501_v0, %v4502_v39  ;;  %v4643_v29 = vrot.slane %v4642_v24, 2  ;;  %v3426_v31 = vadd.f32 %v3425_v23, %v7304_v53  ;;  %v3427_v34 = vpop.f32.mrb[21].mxu1 }
 0x589   :  { %v4516_v18 = vmax.f32 %v4514_v51, %v4515_v4  ;;  %v4631_v30 = vmax.f32 %v4629_v3, %v4630_v8  ;;  %v3428_v16 = vadd.f32 %v3427_v34, %v7308_v40  ;;  %v3429_v19 = vpop.f32.mrb[22].mxu1 }
 0x58a   :  { %v4751_v28 = vsel %vm4721_vm6, %v4503_v63, %v7615_v57  ;;  %v4644_v1 = vmax.f32 %v4642_v24, %v4643_v29  ;;  %v4596_v36 = vmax.f32 %v4595_v15, %v3426_v31  ;;  %v3430_v59 = vadd.f32 %v3429_v19, %v7304_v53  ;;  %v3431_v21 = vpop.f32.mrb[23].mxu1 }
 0x58b   :  { %v4758_v58 = vsel %vm4721_vm6, %v4516_v18, %v7619_v5  ;;  %v4632_v45 = vrot.slane %v4631_v30, 1  ;;  %v4609_v48 = vmax.f32 %v4608_v22, %v3428_v16  ;;  %v3432_v27 = vadd.f32 %v3431_v21, %v7308_v40 }
 0x58c   :  { %v4645_v14 = vrot.slane %v4644_v1, 1  ;;  %v4597_v13 = vmax.f32 %v4596_v36, %v3430_v59 }
 0x58d   :  { %v4633_v35 = vmax.f32 %v4631_v30, %v4632_v45  ;;  %v4610_v12 = vmax.f32 %v4609_v48, %v3432_v27 }
 0x58e   :  { %v4646_v54 = vmax.f32 %v4644_v1, %v4645_v14 }
 0x58f   :  { %v4766_v57 = vsel %vm4723_vm7, %v4633_v35, %v7627_v41  ;;  %v3435_v11 = vpop.f32.mrb[24].mxu1 }
 0x590   :  { %v4773_v2 = vsel %vm4723_vm7, %v4646_v54, %v7632_v56  ;;  %v3436_v44 = vadd.f32 %v3435_v11, %v7304_v53  ;;  %v3437_v61 = vpop.f32.mrb[25].mxu1  ;;  %4796 = vst [vmem:[#allocation5 + $0x30] sm:$0xff] %v4766_v57 }
 0x591   :  { %v3438_v5 = vadd.f32 %v3437_v61, %v7308_v40  ;;  %v3439_v32 = vpop.f32.mrb[26].mxu1  ;;  %4797 = vst [vmem:[#allocation5 + $0x38] sm:$0xff] %v4773_v2 }
 0x592   :  { %v4598_v9 = vmax.f32 %v4597_v13, %v3436_v44  ;;  %v3440_v20 = vadd.f32 %v3439_v32, %v7304_v53  ;;  %v3441_v49 = vpop.f32.mrb[27].mxu1 }
 0x593   :  { %v4611_v10 = vmax.f32 %v4610_v12, %v3438_v5  ;;  %v3442_v33 = vadd.f32 %v3441_v49, %v7308_v40 }
 0x594   :  { %v4599_v41 = vmax.f32 %v4598_v9, %v3440_v20 }
 0x595   :  { %v4612_v52 = vmax.f32 %v4611_v10, %v3442_v33 }
 0x597   :  { %v3445_v46 = vpop.f32.mrb[28].mxu1 }
 0x598   :  { %v3446_v56 = vadd.f32 %v3445_v46, %v7304_v53  ;;  %v3447_v55 = vpop.f32.mrb[29].mxu1 }
 0x599   :  { %v3448_v62 = vadd.f32 %v3447_v55, %v7308_v40  ;;  %v3449_v37 = vpop.f32.mrb[30].mxu1 }
 0x59a   :  { %v4600_v25 = vmax.f32 %v4599_v41, %v3446_v56  ;;  %v3450_v7 = vadd.f32 %v3449_v37, %v7304_v53  ;;  %v3451_v26 = vpop.f32.mrb[31].mxu1 }
 0x59b   :  { %v4613_v17 = vmax.f32 %v4612_v52, %v3448_v62  ;;  %v3452_v42 = vadd.f32 %v3451_v26, %v7308_v40 }
 0x59c   :  { %v4601_v50 = vmax.f32 %v4600_v25, %v3450_v7 }
 0x59d   :  { %v4614_v6 = vmax.f32 %v4613_v17, %v3452_v42 }
 0x59e   :  { %v4602_v47 = vrot.slane %v4601_v50, 4 }
 0x59f   :  { %v4615_v38 = vrot.slane %v4614_v6, 4 }
 0x5a0   :  { %v4603_v43 = vmax.f32 %v4601_v50, %v4602_v47 }
 0x5a1   :  { %v4616_v0 = vmax.f32 %v4614_v6, %v4615_v38 }
 0x5a2   :  { %v4604_v60 = vrot.slane %v4603_v43, 2 }
 0x5a3   :  { %v4617_v15 = vrot.slane %v4616_v0, 2 }
 0x5a4   :  { %v4605_v51 = vmax.f32 %v4603_v43, %v4604_v60 }
 0x5a5   :  { %v4618_v3 = vmax.f32 %v4616_v0, %v4617_v15 }
 0x5a6   :  { %v4606_v22 = vrot.slane %v4605_v51, 1 }
 0x5a7   :  { %v4619_v39 = vrot.slane %v4618_v3, 1 }
 0x5a8   :  { %v4607_v24 = vmax.f32 %v4605_v51, %v4606_v22 }
 0x5a9   :  { %v4620_v4 = vmax.f32 %v4618_v3, %v4619_v39 }
 0x5aa   :  { %v4752_v53 = vsel %vm4723_vm7, %v4607_v24, %v4751_v28 }
 0x5ab   :  { %v4759_v40 = vsel %vm4723_vm7, %v4620_v4, %v4758_v58  ;;  %4794 = vst [vmem:[#allocation5 + $0x20] sm:$0xff] %v4752_v53 }
 0x5ac   :  { %4795 = vst [vmem:[#allocation5 + $0x28] sm:$0xff] %v4759_v40 }
 0x5ad   :  { %5171 = shalt.err (!%p5168_p12)
}
 0x5ae   :  { %s5172_s24 = scalar_lea.hbm %s7696_s7, 1024 }
 0x5af   :  { %p5173_p13 = scmp.ne.s32.totalorder %s7696_s7, %s5172_s24  ;;  %p5176_p0 = scmp.lt.u32.totalorder %s5172_s24, %s7696_s7 }
 0x5b1   :  { %p5178_p1 = pnand %p5176_p0, %p5173_p13 }
 0x5b3   :  { %5181 = shalt.err (!%p5178_p1)
}
 0x5b4   :  { %4807 = dma.vmem_to_hbm [thread:$0]  %s4805_s21, 1024, %s7696_s7, [#allocation4]  }
 0x5b5   :  { %5184 = dma.done.wait [#allocation4], 1024  }
 0x5b6   :  { %5185 = vsyncadd [#allocation4], 4294966272 }
 0x5b7   :  { %4811 = vsyncpa [#allocation3], 1 }
 0x5b8   :  { %4812 = vsyncpa [#allocation4], 1 }

</bundles_post_ra>
